<compile_context>
chip_gen: v7x
topology: tpu7x:2x2x1
jax: 0.10.0
libtpu: 0.0.40
codegen_flags: <defaults>
</compile_context>

<pallas_src>
import jax
import jax.numpy as jnp
from jax.experimental import pallas as pl
from jax.experimental.pallas import tpu as pltpu

H = 64        # LSTM hidden / attention embed dim
NH = 4        # attention heads
HD = H // NH  # head dim = 16
F_IN = 10     # LSTM input size
FC1 = 32
OUT = 3
G = 4 * H     # gate width (i, f, g, o)

# rows of the packed f32 bias slab (width 4H)
ROW_B0 = 0
ROW_B1 = 1
ROW_BQ0 = 2                 # rows 2 .. 2+NH-1: per-head q bias (cols 0:HD)
ROW_BO = 2 + NH             # cols 0:H  (bo + bv @ Wo folded)
ROW_BF1 = 3 + NH            # cols 0:FC1
ROW_BF2 = 4 + NH            # cols 0:OUT
BIAS_ROWS = 5 + NH


def quantum_trader_kernel(
    x_ref,        # (S, B, F_IN) f32   (wrapper pre-transposed to seq-major)
    wih0_ref,     # (F_IN, 4H) bf16    layer-0 input weights (cell cols pre-scaled x2)
    rhs_ref,      # (2H, 8H)  bf16     fused per-step RHS: [[whh0;0] | [wih1;whh1]]
    wqk_ref,      # (2*NH, H, HD) bf16 per-head q (idx 2n, pre-scaled 1/sqrt(HD)) / k (idx 2n+1)
    wvo_ref,      # (NH, H, H) bf16    per-head folded Wv_h @ Wo_h
    wf1_ref,      # (H, FC1) bf16
    wf2_ref,      # (FC1, OUT) bf16
    bias_ref,     # (BIAS_ROWS, 4H) f32 packed biases
    out_ref,      # (B, OUT) f32
    hs_ref,       # VMEM scratch (B, S, H) f32: LSTM top-layer outputs
):
    S, B, _ = x_ref.shape
    f32 = jnp.float32
    bf16 = jnp.bfloat16

    b0 = bias_ref[ROW_B0:ROW_B0 + 1, :]          # (1, 4H)
    b1 = bias_ref[ROW_B1:ROW_B1 + 1, :]          # (1, 4H)

    # ---------- LSTM: hoisted layer-0 input projection (one (S*B,F)x(F,4H) matmul) ----------
    x2 = x_ref[...].astype(bf16).reshape(S * B, F_IN)
    xp = jnp.dot(x2, wih0_ref[...], preferred_element_type=f32) + b0      # (S*B, 4H)
    xp = xp.reshape(S, B, G)     # (S, B, 4H): per-step read is a leading-dim slice

    rhs = rhs_ref[...]           # (2H, 8H)

    def lstm_cell(gates, c):
        # exact sigmoid (review: avoid approx-recip error compounding over the recurrence)
        a = 1.0 / (1.0 + jnp.exp(-gates))                       # one full-width pass
        i_g, f_g, o_g = a[:, 0:H], a[:, H:2 * H], a[:, 3 * H:4 * H]
        g_g = 2.0 * a[:, 2 * H:3 * H] - 1.0                     # tanh(z)=2*sigmoid(2z)-1 (weights pre-scaled x2)
        c_new = f_g * c + i_g * g_g
        h_new = o_g * jnp.tanh(c_new)
        return h_new, c_new

    # ---------- skewed 2-layer recurrence: ONE dependent MXU push per step ----------
    # step 0 of layer 0 has zero recurrent input -> no matmul needed.
    h0, c0 = lstm_cell(xp[0], jnp.zeros((B, H), f32))           # h0(0), c0(0)
    h1 = jnp.zeros((B, H), f32)                                 # h1 at step t-2 (rel. to loop iter t)
    c1 = jnp.zeros((B, H), f32)

    for t in range(1, S):                                       # static unroll, S-1 fused steps
        # LHS = [h0(t-1) | h1(t-2)]; RHS columns 0:4H -> layer-0 recurrence for step t,
        # columns 4H:8H -> layer-1 gate pre-activations for step t-1.
        lhs = jnp.concatenate([h0, h1], axis=1).astype(bf16)    # (B, 2H)
        fused = jnp.dot(lhs, rhs, preferred_element_type=f32)   # (B, 8H)

        # layer-1 step t-1
        h1, c1 = lstm_cell(fused[:, 4 * H:8 * H] + b1, c1)
        hs_ref[:, t - 1:t, :] = h1[:, None, :]

        # layer-0 step t
        h0, c0 = lstm_cell(xp[t] + fused[:, 0:4 * H], c0)

    # final layer-1 step (t = S-1), once after the loop
    lhs = jnp.concatenate([h0, h1], axis=1).astype(bf16)
    g1 = jnp.dot(lhs, rhs_ref[:, 4 * H:8 * H], preferred_element_type=f32) + b1
    h1, c1 = lstm_cell(g1, c1)
    hs_ref[:, S - 1:S, :] = h1[:, None, :]

    hs2 = hs_ref[...].reshape(B * S, H).astype(bf16)            # rows (b, s)-ordered

    # ---------- MultiheadAttention (4 heads), batched over B, no lane slices ----------
    # 1/sqrt(HD) is folded into the q weights/bias, the k bias is dropped (exact:
    # softmax-invariant), Wv_h @ Wo_h is pre-folded, and bv @ Wo + bo is one bias row.
    pooled = jnp.zeros((B, H), f32)
    for n in range(NH):                                         # 4 independent heads
        bq = bias_ref[ROW_BQ0 + n:ROW_BQ0 + n + 1, 0:HD]        # (1, HD)
        q = (jnp.dot(hs2, wqk_ref[2 * n], preferred_element_type=f32) + bq)
        q = q.reshape(B, S, HD).astype(bf16)
        k = jnp.dot(hs2, wqk_ref[2 * n + 1], preferred_element_type=f32)
        k = k.reshape(B, S, HD).astype(bf16)

        s_ = jnp.einsum('bqd,bkd->bqk', q, k, preferred_element_type=f32)  # (B, S, S)
        s_ = s_ - jnp.max(s_, axis=-1, keepdims=True)
        p = jnp.exp(s_)
        p = p / jnp.sum(p, axis=-1, keepdims=True)              # exact softmax
        # mean over the query axis (linear) before the value contraction
        p_mean = jnp.mean(p, axis=1, keepdims=True).astype(bf16)            # (B, 1, S)

        vo = jnp.dot(hs2, wvo_ref[n], preferred_element_type=f32)           # (B*S, H) = values already out-projected
        vo = vo.reshape(B, S, H).astype(bf16)
        pooled = pooled + jnp.einsum('bqk,bkd->bqd', p_mean, vo,
                                     preferred_element_type=f32).reshape(B, H)

    pooled = pooled + bias_ref[ROW_BO:ROW_BO + 1, 0:H]          # bo + bv @ Wo

    # ---------- fc: Linear(64,32) -> SiLU -> Linear(32,3) ----------
    z1 = jnp.dot(pooled.astype(bf16), wf1_ref[...], preferred_element_type=f32) \
        + bias_ref[ROW_BF1:ROW_BF1 + 1, 0:FC1]
    z1 = z1 * (1.0 / (1.0 + jnp.exp(-z1)))                      # SiLU
    z2 = jnp.dot(z1.astype(bf16), wf2_ref[...], preferred_element_type=f32) \
        + bias_ref[ROW_BF2:ROW_BF2 + 1, 0:OUT]

    # QuantStub / DeQuantStub are identity in the fp32 (unconverted) path.
    out_ref[...] = z2.astype(out_ref.dtype)


def quantum_trader_forward(x, prepared_params):
    """x: (B, S, F_IN) f32; prepared_params from prepare_params()."""
    B, S, _ = x.shape
    x_sb = jnp.swapaxes(x, 0, 1)      # (S, B, F): layout plumbing in the wrapper
    args = (x_sb,) + tuple(prepared_params)
    vmem = lambda: pl.BlockSpec(memory_space=pltpu.MemorySpace.VMEM)
    return pl.pallas_call(
        quantum_trader_kernel,
        out_shape=jax.ShapeDtypeStruct((B, OUT), jnp.float32),
        in_specs=[vmem() for _ in args],
        out_specs=vmem(),
        scratch_shapes=[pltpu.VMEM((B, S, H), jnp.float32)],
    )(*args)


def init_params(key):
    """Raw synthetic parameters mirroring the PyTorch module's shapes,
    stored transposed as (in, out); LSTM bias = bias_ih + bias_hh."""
    ks = jax.random.split(key, 16)

    def u(k, shape, bound):
        return jax.random.uniform(k, shape, jnp.float32, -bound, bound)

    kl = 1.0 / (H ** 0.5)
    wih0 = u(ks[0], (F_IN, 4 * H), kl)
    whh0 = u(ks[1], (H, 4 * H), kl)
    b0 = u(ks[2], (1, 4 * H), kl) + u(ks[3], (1, 4 * H), kl)
    wih1 = u(ks[4], (H, 4 * H), kl)
    whh1 = u(ks[5], (H, 4 * H), kl)
    b1 = u(ks[6], (1, 4 * H), kl) + u(ks[7], (1, 4 * H), kl)

    xav = (6.0 / (H + 3 * H)) ** 0.5
    win = u(ks[8], (H, 3 * H), xav)
    bin_ = jnp.zeros((1, 3 * H), jnp.float32)
    wo = u(ks[9], (H, H), 1.0 / (H ** 0.5))
    bo = jnp.zeros((1, H), jnp.float32)

    kf1 = 1.0 / (H ** 0.5)
    wf1 = u(ks[10], (H, FC1), kf1)
    bf1 = u(ks[11], (1, FC1), kf1)
    kf2 = 1.0 / (FC1 ** 0.5)
    wf2 = u(ks[12], (FC1, OUT), kf2)
    bf2 = u(ks[13], (1, OUT), kf2)

    return (wih0, whh0, b0, wih1, whh1, b1,
            win, bin_, wo, bo, wf1, bf1, wf2, bf2)


def prepare_params(params):
    """One-time transforms (outside the kernel):
       * pre-scale cell-gate columns by 2 (tanh = 2*sigmoid(2z)-1 trick),
       * build the layer-skew fused per-step RHS  [[whh0;0] | [wih1;whh1]]  (2H, 8H),
       * per-head q/k weight stacks (q scaled by 1/sqrt(HD)), folded Wv_h @ Wo_h stacks,
         drop the (softmax-invariant) k bias, fold bv @ Wo + bo,
       * pack all f32 biases into one slab and cast weights to bf16.
       NOTE: any weight-loading path MUST go through this function (scalings/folds)."""
    (wih0, whh0, b0, wih1, whh1, b1,
     win, bin_, wo, bo, wf1, bf1, wf2, bf2) = params

    def scale_cell(w):
        return w.at[..., 2 * H:3 * H].multiply(2.0)

    wih0s, whh0s, b0s = scale_cell(wih0), scale_cell(whh0), scale_cell(b0)
    wih1s, whh1s, b1s = scale_cell(wih1), scale_cell(whh1), scale_cell(b1)

    # layer-skew fused per-step RHS (2H, 8H)
    rhs0 = jnp.concatenate([whh0s, jnp.zeros((H, 4 * H), jnp.float32)], axis=0)
    rhs1 = jnp.concatenate([wih1s, whh1s], axis=0)
    rhs_step = jnp.concatenate([rhs0, rhs1], axis=1)

    # attention folds
    scale = 1.0 / float(HD) ** 0.5
    wq, wk, wv = win[:, 0:H] * scale, win[:, H:2 * H], win[:, 2 * H:3 * H]
    bq, bv = bin_[:, 0:H] * scale, bin_[:, 2 * H:3 * H]
    per_head = lambda w: w.reshape(H, NH, HD).transpose(1, 0, 2)         # (NH, H, HD)
    wqk_heads = jnp.stack([per_head(wq), per_head(wk)], axis=1)          # (NH, 2, H, HD)
    wqk_heads = wqk_heads.reshape(2 * NH, H, HD)                         # [2n]=q_n, [2n+1]=k_n
    wo_heads = wo.reshape(NH, HD, H)
    wvo_heads = jnp.einsum('nhd,nde->nhe', per_head(wv), wo_heads)       # (NH, H, H)
    bo_eff = bo + bv @ wo                                                # (1, H)

    # packed bias slab
    bias_pack = jnp.zeros((BIAS_ROWS, 4 * H), jnp.float32)
    bias_pack = bias_pack.at[ROW_B0, :].set(b0s[0])
    bias_pack = bias_pack.at[ROW_B1, :].set(b1s[0])
    for n in range(NH):
        bias_pack = bias_pack.at[ROW_BQ0 + n, :HD].set(bq[0, n * HD:(n + 1) * HD])
    bias_pack = bias_pack.at[ROW_BO, :H].set(bo_eff[0])
    bias_pack = bias_pack.at[ROW_BF1, :FC1].set(bf1[0])
    bias_pack = bias_pack.at[ROW_BF2, :OUT].set(bf2[0])

    bf = lambda w: w.astype(jnp.bfloat16)
    return (bf(wih0s), bf(rhs_step), bf(wqk_heads), bf(wvo_heads),
            bf(wf1), bf(wf2), bias_pack)


if __name__ == "__main__":
    key = jax.random.PRNGKey(0)
    kx, kp = jax.random.split(key)

    # B=8 fills the f32 sublanes / bf16 matmul rows (perf review); kernel handles any B.
    B, S = 8, 8
    x = jax.random.normal(kx, (B, S, F_IN), jnp.float32)   # (batch, seq, features=10)
    params = init_params(kp)
    prepared = prepare_params(params)

    out = quantum_trader_forward(x, prepared)
    out = jax.block_until_ready(out)

    assert out.shape == (B, OUT), out.shape
    assert bool(jnp.all(jnp.isfinite(out)))
    print("KERNEL_OK")
</pallas_src>

<mosaic_0001>
module attributes {stable_mosaic.version = 11 : i64} {
  func.func @quantum_trader_kernel(%arg0: memref<8x8x10xf32, #tpu.memory_space<vmem>>, %arg1: memref<10x256xbf16, #tpu.memory_space<vmem>>, %arg2: memref<128x512xbf16, #tpu.memory_space<vmem>>, %arg3: memref<8x64x16xbf16, #tpu.memory_space<vmem>>, %arg4: memref<4x64x64xbf16, #tpu.memory_space<vmem>>, %arg5: memref<64x32xbf16, #tpu.memory_space<vmem>>, %arg6: memref<32x3xbf16, #tpu.memory_space<vmem>>, %arg7: memref<9x256xf32, #tpu.memory_space<vmem>>, %arg8: memref<8x3xf32, #tpu.memory_space<vmem>>, %arg9: memref<8x8x64xf32, #tpu.memory_space<vmem>>) attributes {dimension_semantics = [], scalar_prefetch = 0 : i64, scratch_operands = 1 : i64, tpu.core_type = #tpu.core_type<tc>} {
    %c0 = arith.constant 0 : index
    %c0_0 = arith.constant 0 : index
    %0 = vector.load %arg7[%c0, %c0_0] : memref<9x256xf32, #tpu.memory_space<vmem>>, vector<1x256xf32>
    %c1 = arith.constant 1 : index
    %c0_1 = arith.constant 0 : index
    %1 = vector.load %arg7[%c1, %c0_1] : memref<9x256xf32, #tpu.memory_space<vmem>>, vector<1x256xf32>
    %c0_2 = arith.constant 0 : index
    %c0_3 = arith.constant 0 : index
    %c0_4 = arith.constant 0 : index
    %2 = vector.load %arg0[%c0_2, %c0_3, %c0_4] : memref<8x8x10xf32, #tpu.memory_space<vmem>>, vector<8x8x10xf32>
    %3 = arith.truncf %2 : vector<8x8x10xf32> to vector<8x8x10xbf16>
    %4 = vector.shape_cast %3 : vector<8x8x10xbf16> to vector<64x10xbf16>
    %c0_5 = arith.constant 0 : index
    %c0_6 = arith.constant 0 : index
    %5 = vector.load %arg1[%c0_5, %c0_6] : memref<10x256xbf16, #tpu.memory_space<vmem>>, vector<10x256xbf16>
    %cst = arith.constant dense<0.000000e+00> : vector<64x256xf32>
    %6 = tpu.matmul %4, %5, %cst {dimension_numbers = #tpu.dot_dimension_numbers<[1], [0], [0], [1], [0, 0, 1, 1], [], []>} : vector<64x10xbf16>, vector<10x256xbf16>, vector<64x256xf32> -> vector<64x256xf32>
    %7 = vector.broadcast %0 : vector<1x256xf32> to vector<64x256xf32>
    %8 = arith.addf %6, %7 : vector<64x256xf32>
    %9 = vector.shape_cast %8 : vector<64x256xf32> to vector<8x8x256xf32>
    %c0_7 = arith.constant 0 : index
    %c0_8 = arith.constant 0 : index
    %10 = vector.load %arg2[%c0_7, %c0_8] : memref<128x512xbf16, #tpu.memory_space<vmem>>, vector<128x512xbf16>
    %11 = vector.extract_strided_slice %9 {offsets = [0, 0, 0], sizes = [1, 8, 256], strides = [1, 1, 1]} : vector<8x8x256xf32> to vector<1x8x256xf32>
    %12 = vector.shape_cast %11 : vector<1x8x256xf32> to vector<8x256xf32>
    %cst_9 = arith.constant 0.000000e+00 : f32
    %13 = vector.broadcast %cst_9 : f32 to vector<8x64xf32>
    %cst_10 = arith.constant 0.000000e+00 : f32
    %14 = vector.broadcast %cst_10 : f32 to vector<8x256xf32>
    %15 = arith.subf %14, %12 : vector<8x256xf32>
    %16 = math.exp %15 : vector<8x256xf32>
    %cst_11 = arith.constant 1.000000e+00 : f32
    %17 = vector.broadcast %cst_11 : f32 to vector<8x256xf32>
    %18 = arith.addf %17, %16 : vector<8x256xf32>
    %cst_12 = arith.constant 1.000000e+00 : f32
    %19 = vector.broadcast %cst_12 : f32 to vector<8x256xf32>
    %20 = arith.divf %19, %18 : vector<8x256xf32>
    %21 = vector.extract_strided_slice %20 {offsets = [0, 0], sizes = [8, 64], strides = [1, 1]} : vector<8x256xf32> to vector<8x64xf32>
    %22 = vector.extract_strided_slice %20 {offsets = [0, 64], sizes = [8, 64], strides = [1, 1]} : vector<8x256xf32> to vector<8x64xf32>
    %23 = vector.extract_strided_slice %20 {offsets = [0, 192], sizes = [8, 64], strides = [1, 1]} : vector<8x256xf32> to vector<8x64xf32>
    %24 = vector.extract_strided_slice %20 {offsets = [0, 128], sizes = [8, 64], strides = [1, 1]} : vector<8x256xf32> to vector<8x64xf32>
    %cst_13 = arith.constant 2.000000e+00 : f32
    %25 = vector.broadcast %cst_13 : f32 to vector<8x64xf32>
    %26 = arith.mulf %25, %24 : vector<8x64xf32>
    %cst_14 = arith.constant 1.000000e+00 : f32
    %27 = vector.broadcast %cst_14 : f32 to vector<8x64xf32>
    %28 = arith.subf %26, %27 : vector<8x64xf32>
    %29 = arith.mulf %22, %13 : vector<8x64xf32>
    %30 = arith.mulf %21, %28 : vector<8x64xf32>
    %31 = arith.addf %29, %30 : vector<8x64xf32>
    %32 = math.tanh %31 : vector<8x64xf32>
    %33 = arith.mulf %23, %32 : vector<8x64xf32>
    %cst_15 = arith.constant 0.000000e+00 : f32
    %34 = vector.broadcast %cst_15 : f32 to vector<8x64xf32>
    %cst_16 = arith.constant 0.000000e+00 : f32
    %35 = vector.broadcast %cst_16 : f32 to vector<8x64xf32>
    %36 = tpu.concatenate %33, %34 in 1 : vector<8x64xf32>, vector<8x64xf32> -> vector<8x128xf32>
    %37 = arith.truncf %36 : vector<8x128xf32> to vector<8x128xbf16>
    %cst_17 = arith.constant dense<0.000000e+00> : vector<8x512xf32>
    %38 = tpu.matmul %37, %10, %cst_17 {dimension_numbers = #tpu.dot_dimension_numbers<[1], [0], [0], [1], [0, 0, 1, 1], [], []>} : vector<8x128xbf16>, vector<128x512xbf16>, vector<8x512xf32> -> vector<8x512xf32>
    %39 = vector.extract_strided_slice %38 {offsets = [0, 256], sizes = [8, 256], strides = [1, 1]} : vector<8x512xf32> to vector<8x256xf32>
    %40 = vector.broadcast %1 : vector<1x256xf32> to vector<8x256xf32>
    %41 = arith.addf %39, %40 : vector<8x256xf32>
    %cst_18 = arith.constant 0.000000e+00 : f32
    %42 = vector.broadcast %cst_18 : f32 to vector<8x256xf32>
    %43 = arith.subf %42, %41 : vector<8x256xf32>
    %44 = math.exp %43 : vector<8x256xf32>
    %cst_19 = arith.constant 1.000000e+00 : f32
    %45 = vector.broadcast %cst_19 : f32 to vector<8x256xf32>
    %46 = arith.addf %45, %44 : vector<8x256xf32>
    %cst_20 = arith.constant 1.000000e+00 : f32
    %47 = vector.broadcast %cst_20 : f32 to vector<8x256xf32>
    %48 = arith.divf %47, %46 : vector<8x256xf32>
    %49 = vector.extract_strided_slice %48 {offsets = [0, 0], sizes = [8, 64], strides = [1, 1]} : vector<8x256xf32> to vector<8x64xf32>
    %50 = vector.extract_strided_slice %48 {offsets = [0, 64], sizes = [8, 64], strides = [1, 1]} : vector<8x256xf32> to vector<8x64xf32>
    %51 = vector.extract_strided_slice %48 {offsets = [0, 192], sizes = [8, 64], strides = [1, 1]} : vector<8x256xf32> to vector<8x64xf32>
    %52 = vector.extract_strided_slice %48 {offsets = [0, 128], sizes = [8, 64], strides = [1, 1]} : vector<8x256xf32> to vector<8x64xf32>
    %cst_21 = arith.constant 2.000000e+00 : f32
    %53 = vector.broadcast %cst_21 : f32 to vector<8x64xf32>
    %54 = arith.mulf %53, %52 : vector<8x64xf32>
    %cst_22 = arith.constant 1.000000e+00 : f32
    %55 = vector.broadcast %cst_22 : f32 to vector<8x64xf32>
    %56 = arith.subf %54, %55 : vector<8x64xf32>
    %57 = arith.mulf %50, %35 : vector<8x64xf32>
    %58 = arith.mulf %49, %56 : vector<8x64xf32>
    %59 = arith.addf %57, %58 : vector<8x64xf32>
    %60 = math.tanh %59 : vector<8x64xf32>
    %61 = arith.mulf %51, %60 : vector<8x64xf32>
    %62 = vector.shape_cast %61 : vector<8x64xf32> to vector<8x1x64xf32>
    %c0_23 = arith.constant 0 : index
    %c0_24 = arith.constant 0 : index
    %c0_25 = arith.constant 0 : index
    %63 = vector.load %arg9[%c0_23, %c0_24, %c0_25] : memref<8x8x64xf32, #tpu.memory_space<vmem>>, vector<8x1x64xf32>
    tpu.vector_store %arg9[%c0_23, %c0_24, %c0_25], %62 {strides = array<i32>} : memref<8x8x64xf32, #tpu.memory_space<vmem>>, vector<8x1x64xf32>,
    %64 = vector.extract_strided_slice %9 {offsets = [1, 0, 0], sizes = [1, 8, 256], strides = [1, 1, 1]} : vector<8x8x256xf32> to vector<1x8x256xf32>
    %65 = vector.shape_cast %64 : vector<1x8x256xf32> to vector<8x256xf32>
    %66 = vector.extract_strided_slice %38 {offsets = [0, 0], sizes = [8, 256], strides = [1, 1]} : vector<8x512xf32> to vector<8x256xf32>
    %67 = arith.addf %65, %66 : vector<8x256xf32>
    %cst_26 = arith.constant 0.000000e+00 : f32
    %68 = vector.broadcast %cst_26 : f32 to vector<8x256xf32>
    %69 = arith.subf %68, %67 : vector<8x256xf32>
    %70 = math.exp %69 : vector<8x256xf32>
    %cst_27 = arith.constant 1.000000e+00 : f32
    %71 = vector.broadcast %cst_27 : f32 to vector<8x256xf32>
    %72 = arith.addf %71, %70 : vector<8x256xf32>
    %cst_28 = arith.constant 1.000000e+00 : f32
    %73 = vector.broadcast %cst_28 : f32 to vector<8x256xf32>
    %74 = arith.divf %73, %72 : vector<8x256xf32>
    %75 = vector.extract_strided_slice %74 {offsets = [0, 0], sizes = [8, 64], strides = [1, 1]} : vector<8x256xf32> to vector<8x64xf32>
    %76 = vector.extract_strided_slice %74 {offsets = [0, 64], sizes = [8, 64], strides = [1, 1]} : vector<8x256xf32> to vector<8x64xf32>
    %77 = vector.extract_strided_slice %74 {offsets = [0, 192], sizes = [8, 64], strides = [1, 1]} : vector<8x256xf32> to vector<8x64xf32>
    %78 = vector.extract_strided_slice %74 {offsets = [0, 128], sizes = [8, 64], strides = [1, 1]} : vector<8x256xf32> to vector<8x64xf32>
    %cst_29 = arith.constant 2.000000e+00 : f32
    %79 = vector.broadcast %cst_29 : f32 to vector<8x64xf32>
    %80 = arith.mulf %79, %78 : vector<8x64xf32>
    %cst_30 = arith.constant 1.000000e+00 : f32
    %81 = vector.broadcast %cst_30 : f32 to vector<8x64xf32>
    %82 = arith.subf %80, %81 : vector<8x64xf32>
    %83 = arith.mulf %76, %31 : vector<8x64xf32>
    %84 = arith.mulf %75, %82 : vector<8x64xf32>
    %85 = arith.addf %83, %84 : vector<8x64xf32>
    %86 = math.tanh %85 : vector<8x64xf32>
    %87 = arith.mulf %77, %86 : vector<8x64xf32>
    %88 = tpu.concatenate %87, %61 in 1 : vector<8x64xf32>, vector<8x64xf32> -> vector<8x128xf32>
    %89 = arith.truncf %88 : vector<8x128xf32> to vector<8x128xbf16>
    %cst_31 = arith.constant dense<0.000000e+00> : vector<8x512xf32>
    %90 = tpu.matmul %89, %10, %cst_31 {dimension_numbers = #tpu.dot_dimension_numbers<[1], [0], [0], [1], [0, 0, 1, 1], [], []>} : vector<8x128xbf16>, vector<128x512xbf16>, vector<8x512xf32> -> vector<8x512xf32>
    %91 = vector.extract_strided_slice %90 {offsets = [0, 256], sizes = [8, 256], strides = [1, 1]} : vector<8x512xf32> to vector<8x256xf32>
    %92 = vector.broadcast %1 : vector<1x256xf32> to vector<8x256xf32>
    %93 = arith.addf %91, %92 : vector<8x256xf32>
    %cst_32 = arith.constant 0.000000e+00 : f32
    %94 = vector.broadcast %cst_32 : f32 to vector<8x256xf32>
    %95 = arith.subf %94, %93 : vector<8x256xf32>
    %96 = math.exp %95 : vector<8x256xf32>
    %cst_33 = arith.constant 1.000000e+00 : f32
    %97 = vector.broadcast %cst_33 : f32 to vector<8x256xf32>
    %98 = arith.addf %97, %96 : vector<8x256xf32>
    %cst_34 = arith.constant 1.000000e+00 : f32
    %99 = vector.broadcast %cst_34 : f32 to vector<8x256xf32>
    %100 = arith.divf %99, %98 : vector<8x256xf32>
    %101 = vector.extract_strided_slice %100 {offsets = [0, 0], sizes = [8, 64], strides = [1, 1]} : vector<8x256xf32> to vector<8x64xf32>
    %102 = vector.extract_strided_slice %100 {offsets = [0, 64], sizes = [8, 64], strides = [1, 1]} : vector<8x256xf32> to vector<8x64xf32>
    %103 = vector.extract_strided_slice %100 {offsets = [0, 192], sizes = [8, 64], strides = [1, 1]} : vector<8x256xf32> to vector<8x64xf32>
    %104 = vector.extract_strided_slice %100 {offsets = [0, 128], sizes = [8, 64], strides = [1, 1]} : vector<8x256xf32> to vector<8x64xf32>
    %cst_35 = arith.constant 2.000000e+00 : f32
    %105 = vector.broadcast %cst_35 : f32 to vector<8x64xf32>
    %106 = arith.mulf %105, %104 : vector<8x64xf32>
    %cst_36 = arith.constant 1.000000e+00 : f32
    %107 = vector.broadcast %cst_36 : f32 to vector<8x64xf32>
    %108 = arith.subf %106, %107 : vector<8x64xf32>
    %109 = arith.mulf %102, %59 : vector<8x64xf32>
    %110 = arith.mulf %101, %108 : vector<8x64xf32>
    %111 = arith.addf %109, %110 : vector<8x64xf32>
    %112 = math.tanh %111 : vector<8x64xf32>
    %113 = arith.mulf %103, %112 : vector<8x64xf32>
    %114 = vector.shape_cast %113 : vector<8x64xf32> to vector<8x1x64xf32>
    %c0_37 = arith.constant 0 : index
    %c1_38 = arith.constant 1 : index
    %c0_39 = arith.constant 0 : index
    %115 = vector.load %arg9[%c0_37, %c1_38, %c0_39] : memref<8x8x64xf32, #tpu.memory_space<vmem>>, vector<8x1x64xf32>
    tpu.vector_store %arg9[%c0_37, %c1_38, %c0_39], %114 {strides = array<i32>} : memref<8x8x64xf32, #tpu.memory_space<vmem>>, vector<8x1x64xf32>,
    %116 = vector.extract_strided_slice %9 {offsets = [2, 0, 0], sizes = [1, 8, 256], strides = [1, 1, 1]} : vector<8x8x256xf32> to vector<1x8x256xf32>
    %117 = vector.shape_cast %116 : vector<1x8x256xf32> to vector<8x256xf32>
    %118 = vector.extract_strided_slice %90 {offsets = [0, 0], sizes = [8, 256], strides = [1, 1]} : vector<8x512xf32> to vector<8x256xf32>
    %119 = arith.addf %117, %118 : vector<8x256xf32>
    %cst_40 = arith.constant 0.000000e+00 : f32
    %120 = vector.broadcast %cst_40 : f32 to vector<8x256xf32>
    %121 = arith.subf %120, %119 : vector<8x256xf32>
    %122 = math.exp %121 : vector<8x256xf32>
    %cst_41 = arith.constant 1.000000e+00 : f32
    %123 = vector.broadcast %cst_41 : f32 to vector<8x256xf32>
    %124 = arith.addf %123, %122 : vector<8x256xf32>
    %cst_42 = arith.constant 1.000000e+00 : f32
    %125 = vector.broadcast %cst_42 : f32 to vector<8x256xf32>
    %126 = arith.divf %125, %124 : vector<8x256xf32>
    %127 = vector.extract_strided_slice %126 {offsets = [0, 0], sizes = [8, 64], strides = [1, 1]} : vector<8x256xf32> to vector<8x64xf32>
    %128 = vector.extract_strided_slice %126 {offsets = [0, 64], sizes = [8, 64], strides = [1, 1]} : vector<8x256xf32> to vector<8x64xf32>
    %129 = vector.extract_strided_slice %126 {offsets = [0, 192], sizes = [8, 64], strides = [1, 1]} : vector<8x256xf32> to vector<8x64xf32>
    %130 = vector.extract_strided_slice %126 {offsets = [0, 128], sizes = [8, 64], strides = [1, 1]} : vector<8x256xf32> to vector<8x64xf32>
    %cst_43 = arith.constant 2.000000e+00 : f32
    %131 = vector.broadcast %cst_43 : f32 to vector<8x64xf32>
    %132 = arith.mulf %131, %130 : vector<8x64xf32>
    %cst_44 = arith.constant 1.000000e+00 : f32
    %133 = vector.broadcast %cst_44 : f32 to vector<8x64xf32>
    %134 = arith.subf %132, %133 : vector<8x64xf32>
    %135 = arith.mulf %128, %85 : vector<8x64xf32>
    %136 = arith.mulf %127, %134 : vector<8x64xf32>
    %137 = arith.addf %135, %136 : vector<8x64xf32>
    %138 = math.tanh %137 : vector<8x64xf32>
    %139 = arith.mulf %129, %138 : vector<8x64xf32>
    %140 = tpu.concatenate %139, %113 in 1 : vector<8x64xf32>, vector<8x64xf32> -> vector<8x128xf32>
    %141 = arith.truncf %140 : vector<8x128xf32> to vector<8x128xbf16>
    %cst_45 = arith.constant dense<0.000000e+00> : vector<8x512xf32>
    %142 = tpu.matmul %141, %10, %cst_45 {dimension_numbers = #tpu.dot_dimension_numbers<[1], [0], [0], [1], [0, 0, 1, 1], [], []>} : vector<8x128xbf16>, vector<128x512xbf16>, vector<8x512xf32> -> vector<8x512xf32>
    %143 = vector.extract_strided_slice %142 {offsets = [0, 256], sizes = [8, 256], strides = [1, 1]} : vector<8x512xf32> to vector<8x256xf32>
    %144 = vector.broadcast %1 : vector<1x256xf32> to vector<8x256xf32>
    %145 = arith.addf %143, %144 : vector<8x256xf32>
    %cst_46 = arith.constant 0.000000e+00 : f32
    %146 = vector.broadcast %cst_46 : f32 to vector<8x256xf32>
    %147 = arith.subf %146, %145 : vector<8x256xf32>
    %148 = math.exp %147 : vector<8x256xf32>
    %cst_47 = arith.constant 1.000000e+00 : f32
    %149 = vector.broadcast %cst_47 : f32 to vector<8x256xf32>
    %150 = arith.addf %149, %148 : vector<8x256xf32>
    %cst_48 = arith.constant 1.000000e+00 : f32
    %151 = vector.broadcast %cst_48 : f32 to vector<8x256xf32>
    %152 = arith.divf %151, %150 : vector<8x256xf32>
    %153 = vector.extract_strided_slice %152 {offsets = [0, 0], sizes = [8, 64], strides = [1, 1]} : vector<8x256xf32> to vector<8x64xf32>
    %154 = vector.extract_strided_slice %152 {offsets = [0, 64], sizes = [8, 64], strides = [1, 1]} : vector<8x256xf32> to vector<8x64xf32>
    %155 = vector.extract_strided_slice %152 {offsets = [0, 192], sizes = [8, 64], strides = [1, 1]} : vector<8x256xf32> to vector<8x64xf32>
    %156 = vector.extract_strided_slice %152 {offsets = [0, 128], sizes = [8, 64], strides = [1, 1]} : vector<8x256xf32> to vector<8x64xf32>
    %cst_49 = arith.constant 2.000000e+00 : f32
    %157 = vector.broadcast %cst_49 : f32 to vector<8x64xf32>
    %158 = arith.mulf %157, %156 : vector<8x64xf32>
    %cst_50 = arith.constant 1.000000e+00 : f32
    %159 = vector.broadcast %cst_50 : f32 to vector<8x64xf32>
    %160 = arith.subf %158, %159 : vector<8x64xf32>
    %161 = arith.mulf %154, %111 : vector<8x64xf32>
    %162 = arith.mulf %153, %160 : vector<8x64xf32>
    %163 = arith.addf %161, %162 : vector<8x64xf32>
    %164 = math.tanh %163 : vector<8x64xf32>
    %165 = arith.mulf %155, %164 : vector<8x64xf32>
    %166 = vector.shape_cast %165 : vector<8x64xf32> to vector<8x1x64xf32>
    %c0_51 = arith.constant 0 : index
    %c2 = arith.constant 2 : index
    %c0_52 = arith.constant 0 : index
    %167 = vector.load %arg9[%c0_51, %c2, %c0_52] : memref<8x8x64xf32, #tpu.memory_space<vmem>>, vector<8x1x64xf32>
    tpu.vector_store %arg9[%c0_51, %c2, %c0_52], %166 {strides = array<i32>} : memref<8x8x64xf32, #tpu.memory_space<vmem>>, vector<8x1x64xf32>,
    %168 = vector.extract_strided_slice %9 {offsets = [3, 0, 0], sizes = [1, 8, 256], strides = [1, 1, 1]} : vector<8x8x256xf32> to vector<1x8x256xf32>
    %169 = vector.shape_cast %168 : vector<1x8x256xf32> to vector<8x256xf32>
    %170 = vector.extract_strided_slice %142 {offsets = [0, 0], sizes = [8, 256], strides = [1, 1]} : vector<8x512xf32> to vector<8x256xf32>
    %171 = arith.addf %169, %170 : vector<8x256xf32>
    %cst_53 = arith.constant 0.000000e+00 : f32
    %172 = vector.broadcast %cst_53 : f32 to vector<8x256xf32>
    %173 = arith.subf %172, %171 : vector<8x256xf32>
    %174 = math.exp %173 : vector<8x256xf32>
    %cst_54 = arith.constant 1.000000e+00 : f32
    %175 = vector.broadcast %cst_54 : f32 to vector<8x256xf32>
    %176 = arith.addf %175, %174 : vector<8x256xf32>
    %cst_55 = arith.constant 1.000000e+00 : f32
    %177 = vector.broadcast %cst_55 : f32 to vector<8x256xf32>
    %178 = arith.divf %177, %176 : vector<8x256xf32>
    %179 = vector.extract_strided_slice %178 {offsets = [0, 0], sizes = [8, 64], strides = [1, 1]} : vector<8x256xf32> to vector<8x64xf32>
    %180 = vector.extract_strided_slice %178 {offsets = [0, 64], sizes = [8, 64], strides = [1, 1]} : vector<8x256xf32> to vector<8x64xf32>
    %181 = vector.extract_strided_slice %178 {offsets = [0, 192], sizes = [8, 64], strides = [1, 1]} : vector<8x256xf32> to vector<8x64xf32>
    %182 = vector.extract_strided_slice %178 {offsets = [0, 128], sizes = [8, 64], strides = [1, 1]} : vector<8x256xf32> to vector<8x64xf32>
    %cst_56 = arith.constant 2.000000e+00 : f32
    %183 = vector.broadcast %cst_56 : f32 to vector<8x64xf32>
    %184 = arith.mulf %183, %182 : vector<8x64xf32>
    %cst_57 = arith.constant 1.000000e+00 : f32
    %185 = vector.broadcast %cst_57 : f32 to vector<8x64xf32>
    %186 = arith.subf %184, %185 : vector<8x64xf32>
    %187 = arith.mulf %180, %137 : vector<8x64xf32>
    %188 = arith.mulf %179, %186 : vector<8x64xf32>
    %189 = arith.addf %187, %188 : vector<8x64xf32>
    %190 = math.tanh %189 : vector<8x64xf32>
    %191 = arith.mulf %181, %190 : vector<8x64xf32>
    %192 = tpu.concatenate %191, %165 in 1 : vector<8x64xf32>, vector<8x64xf32> -> vector<8x128xf32>
    %193 = arith.truncf %192 : vector<8x128xf32> to vector<8x128xbf16>
    %cst_58 = arith.constant dense<0.000000e+00> : vector<8x512xf32>
    %194 = tpu.matmul %193, %10, %cst_58 {dimension_numbers = #tpu.dot_dimension_numbers<[1], [0], [0], [1], [0, 0, 1, 1], [], []>} : vector<8x128xbf16>, vector<128x512xbf16>, vector<8x512xf32> -> vector<8x512xf32>
    %195 = vector.extract_strided_slice %194 {offsets = [0, 256], sizes = [8, 256], strides = [1, 1]} : vector<8x512xf32> to vector<8x256xf32>
    %196 = vector.broadcast %1 : vector<1x256xf32> to vector<8x256xf32>
    %197 = arith.addf %195, %196 : vector<8x256xf32>
    %cst_59 = arith.constant 0.000000e+00 : f32
    %198 = vector.broadcast %cst_59 : f32 to vector<8x256xf32>
    %199 = arith.subf %198, %197 : vector<8x256xf32>
    %200 = math.exp %199 : vector<8x256xf32>
    %cst_60 = arith.constant 1.000000e+00 : f32
    %201 = vector.broadcast %cst_60 : f32 to vector<8x256xf32>
    %202 = arith.addf %201, %200 : vector<8x256xf32>
    %cst_61 = arith.constant 1.000000e+00 : f32
    %203 = vector.broadcast %cst_61 : f32 to vector<8x256xf32>
    %204 = arith.divf %203, %202 : vector<8x256xf32>
    %205 = vector.extract_strided_slice %204 {offsets = [0, 0], sizes = [8, 64], strides = [1, 1]} : vector<8x256xf32> to vector<8x64xf32>
    %206 = vector.extract_strided_slice %204 {offsets = [0, 64], sizes = [8, 64], strides = [1, 1]} : vector<8x256xf32> to vector<8x64xf32>
    %207 = vector.extract_strided_slice %204 {offsets = [0, 192], sizes = [8, 64], strides = [1, 1]} : vector<8x256xf32> to vector<8x64xf32>
    %208 = vector.extract_strided_slice %204 {offsets = [0, 128], sizes = [8, 64], strides = [1, 1]} : vector<8x256xf32> to vector<8x64xf32>
    %cst_62 = arith.constant 2.000000e+00 : f32
    %209 = vector.broadcast %cst_62 : f32 to vector<8x64xf32>
    %210 = arith.mulf %209, %208 : vector<8x64xf32>
    %cst_63 = arith.constant 1.000000e+00 : f32
    %211 = vector.broadcast %cst_63 : f32 to vector<8x64xf32>
    %212 = arith.subf %210, %211 : vector<8x64xf32>
    %213 = arith.mulf %206, %163 : vector<8x64xf32>
    %214 = arith.mulf %205, %212 : vector<8x64xf32>
    %215 = arith.addf %213, %214 : vector<8x64xf32>
    %216 = math.tanh %215 : vector<8x64xf32>
    %217 = arith.mulf %207, %216 : vector<8x64xf32>
    %218 = vector.shape_cast %217 : vector<8x64xf32> to vector<8x1x64xf32>
    %c0_64 = arith.constant 0 : index
    %c3 = arith.constant 3 : index
    %c0_65 = arith.constant 0 : index
    %219 = vector.load %arg9[%c0_64, %c3, %c0_65] : memref<8x8x64xf32, #tpu.memory_space<vmem>>, vector<8x1x64xf32>
    tpu.vector_store %arg9[%c0_64, %c3, %c0_65], %218 {strides = array<i32>} : memref<8x8x64xf32, #tpu.memory_space<vmem>>, vector<8x1x64xf32>,
    %220 = vector.extract_strided_slice %9 {offsets = [4, 0, 0], sizes = [1, 8, 256], strides = [1, 1, 1]} : vector<8x8x256xf32> to vector<1x8x256xf32>
    %221 = vector.shape_cast %220 : vector<1x8x256xf32> to vector<8x256xf32>
    %222 = vector.extract_strided_slice %194 {offsets = [0, 0], sizes = [8, 256], strides = [1, 1]} : vector<8x512xf32> to vector<8x256xf32>
    %223 = arith.addf %221, %222 : vector<8x256xf32>
    %cst_66 = arith.constant 0.000000e+00 : f32
    %224 = vector.broadcast %cst_66 : f32 to vector<8x256xf32>
    %225 = arith.subf %224, %223 : vector<8x256xf32>
    %226 = math.exp %225 : vector<8x256xf32>
    %cst_67 = arith.constant 1.000000e+00 : f32
    %227 = vector.broadcast %cst_67 : f32 to vector<8x256xf32>
    %228 = arith.addf %227, %226 : vector<8x256xf32>
    %cst_68 = arith.constant 1.000000e+00 : f32
    %229 = vector.broadcast %cst_68 : f32 to vector<8x256xf32>
    %230 = arith.divf %229, %228 : vector<8x256xf32>
    %231 = vector.extract_strided_slice %230 {offsets = [0, 0], sizes = [8, 64], strides = [1, 1]} : vector<8x256xf32> to vector<8x64xf32>
    %232 = vector.extract_strided_slice %230 {offsets = [0, 64], sizes = [8, 64], strides = [1, 1]} : vector<8x256xf32> to vector<8x64xf32>
    %233 = vector.extract_strided_slice %230 {offsets = [0, 192], sizes = [8, 64], strides = [1, 1]} : vector<8x256xf32> to vector<8x64xf32>
    %234 = vector.extract_strided_slice %230 {offsets = [0, 128], sizes = [8, 64], strides = [1, 1]} : vector<8x256xf32> to vector<8x64xf32>
    %cst_69 = arith.constant 2.000000e+00 : f32
    %235 = vector.broadcast %cst_69 : f32 to vector<8x64xf32>
    %236 = arith.mulf %235, %234 : vector<8x64xf32>
    %cst_70 = arith.constant 1.000000e+00 : f32
    %237 = vector.broadcast %cst_70 : f32 to vector<8x64xf32>
    %238 = arith.subf %236, %237 : vector<8x64xf32>
    %239 = arith.mulf %232, %189 : vector<8x64xf32>
    %240 = arith.mulf %231, %238 : vector<8x64xf32>
    %241 = arith.addf %239, %240 : vector<8x64xf32>
    %242 = math.tanh %241 : vector<8x64xf32>
    %243 = arith.mulf %233, %242 : vector<8x64xf32>
    %244 = tpu.concatenate %243, %217 in 1 : vector<8x64xf32>, vector<8x64xf32> -> vector<8x128xf32>
    %245 = arith.truncf %244 : vector<8x128xf32> to vector<8x128xbf16>
    %cst_71 = arith.constant dense<0.000000e+00> : vector<8x512xf32>
    %246 = tpu.matmul %245, %10, %cst_71 {dimension_numbers = #tpu.dot_dimension_numbers<[1], [0], [0], [1], [0, 0, 1, 1], [], []>} : vector<8x128xbf16>, vector<128x512xbf16>, vector<8x512xf32> -> vector<8x512xf32>
    %247 = vector.extract_strided_slice %246 {offsets = [0, 256], sizes = [8, 256], strides = [1, 1]} : vector<8x512xf32> to vector<8x256xf32>
    %248 = vector.broadcast %1 : vector<1x256xf32> to vector<8x256xf32>
    %249 = arith.addf %247, %248 : vector<8x256xf32>
    %cst_72 = arith.constant 0.000000e+00 : f32
    %250 = vector.broadcast %cst_72 : f32 to vector<8x256xf32>
    %251 = arith.subf %250, %249 : vector<8x256xf32>
    %252 = math.exp %251 : vector<8x256xf32>
    %cst_73 = arith.constant 1.000000e+00 : f32
    %253 = vector.broadcast %cst_73 : f32 to vector<8x256xf32>
    %254 = arith.addf %253, %252 : vector<8x256xf32>
    %cst_74 = arith.constant 1.000000e+00 : f32
    %255 = vector.broadcast %cst_74 : f32 to vector<8x256xf32>
    %256 = arith.divf %255, %254 : vector<8x256xf32>
    %257 = vector.extract_strided_slice %256 {offsets = [0, 0], sizes = [8, 64], strides = [1, 1]} : vector<8x256xf32> to vector<8x64xf32>
    %258 = vector.extract_strided_slice %256 {offsets = [0, 64], sizes = [8, 64], strides = [1, 1]} : vector<8x256xf32> to vector<8x64xf32>
    %259 = vector.extract_strided_slice %256 {offsets = [0, 192], sizes = [8, 64], strides = [1, 1]} : vector<8x256xf32> to vector<8x64xf32>
    %260 = vector.extract_strided_slice %256 {offsets = [0, 128], sizes = [8, 64], strides = [1, 1]} : vector<8x256xf32> to vector<8x64xf32>
    %cst_75 = arith.constant 2.000000e+00 : f32
    %261 = vector.broadcast %cst_75 : f32 to vector<8x64xf32>
    %262 = arith.mulf %261, %260 : vector<8x64xf32>
    %cst_76 = arith.constant 1.000000e+00 : f32
    %263 = vector.broadcast %cst_76 : f32 to vector<8x64xf32>
    %264 = arith.subf %262, %263 : vector<8x64xf32>
    %265 = arith.mulf %258, %215 : vector<8x64xf32>
    %266 = arith.mulf %257, %264 : vector<8x64xf32>
    %267 = arith.addf %265, %266 : vector<8x64xf32>
    %268 = math.tanh %267 : vector<8x64xf32>
    %269 = arith.mulf %259, %268 : vector<8x64xf32>
    %270 = vector.shape_cast %269 : vector<8x64xf32> to vector<8x1x64xf32>
    %c0_77 = arith.constant 0 : index
    %c4 = arith.constant 4 : index
    %c0_78 = arith.constant 0 : index
    %271 = vector.load %arg9[%c0_77, %c4, %c0_78] : memref<8x8x64xf32, #tpu.memory_space<vmem>>, vector<8x1x64xf32>
    tpu.vector_store %arg9[%c0_77, %c4, %c0_78], %270 {strides = array<i32>} : memref<8x8x64xf32, #tpu.memory_space<vmem>>, vector<8x1x64xf32>,
    %272 = vector.extract_strided_slice %9 {offsets = [5, 0, 0], sizes = [1, 8, 256], strides = [1, 1, 1]} : vector<8x8x256xf32> to vector<1x8x256xf32>
    %273 = vector.shape_cast %272 : vector<1x8x256xf32> to vector<8x256xf32>
    %274 = vector.extract_strided_slice %246 {offsets = [0, 0], sizes = [8, 256], strides = [1, 1]} : vector<8x512xf32> to vector<8x256xf32>
    %275 = arith.addf %273, %274 : vector<8x256xf32>
    %cst_79 = arith.constant 0.000000e+00 : f32
    %276 = vector.broadcast %cst_79 : f32 to vector<8x256xf32>
    %277 = arith.subf %276, %275 : vector<8x256xf32>
    %278 = math.exp %277 : vector<8x256xf32>
    %cst_80 = arith.constant 1.000000e+00 : f32
    %279 = vector.broadcast %cst_80 : f32 to vector<8x256xf32>
    %280 = arith.addf %279, %278 : vector<8x256xf32>
    %cst_81 = arith.constant 1.000000e+00 : f32
    %281 = vector.broadcast %cst_81 : f32 to vector<8x256xf32>
    %282 = arith.divf %281, %280 : vector<8x256xf32>
    %283 = vector.extract_strided_slice %282 {offsets = [0, 0], sizes = [8, 64], strides = [1, 1]} : vector<8x256xf32> to vector<8x64xf32>
    %284 = vector.extract_strided_slice %282 {offsets = [0, 64], sizes = [8, 64], strides = [1, 1]} : vector<8x256xf32> to vector<8x64xf32>
    %285 = vector.extract_strided_slice %282 {offsets = [0, 192], sizes = [8, 64], strides = [1, 1]} : vector<8x256xf32> to vector<8x64xf32>
    %286 = vector.extract_strided_slice %282 {offsets = [0, 128], sizes = [8, 64], strides = [1, 1]} : vector<8x256xf32> to vector<8x64xf32>
    %cst_82 = arith.constant 2.000000e+00 : f32
    %287 = vector.broadcast %cst_82 : f32 to vector<8x64xf32>
    %288 = arith.mulf %287, %286 : vector<8x64xf32>
    %cst_83 = arith.constant 1.000000e+00 : f32
    %289 = vector.broadcast %cst_83 : f32 to vector<8x64xf32>
    %290 = arith.subf %288, %289 : vector<8x64xf32>
    %291 = arith.mulf %284, %241 : vector<8x64xf32>
    %292 = arith.mulf %283, %290 : vector<8x64xf32>
    %293 = arith.addf %291, %292 : vector<8x64xf32>
    %294 = math.tanh %293 : vector<8x64xf32>
    %295 = arith.mulf %285, %294 : vector<8x64xf32>
    %296 = tpu.concatenate %295, %269 in 1 : vector<8x64xf32>, vector<8x64xf32> -> vector<8x128xf32>
    %297 = arith.truncf %296 : vector<8x128xf32> to vector<8x128xbf16>
    %cst_84 = arith.constant dense<0.000000e+00> : vector<8x512xf32>
    %298 = tpu.matmul %297, %10, %cst_84 {dimension_numbers = #tpu.dot_dimension_numbers<[1], [0], [0], [1], [0, 0, 1, 1], [], []>} : vector<8x128xbf16>, vector<128x512xbf16>, vector<8x512xf32> -> vector<8x512xf32>
    %299 = vector.extract_strided_slice %298 {offsets = [0, 256], sizes = [8, 256], strides = [1, 1]} : vector<8x512xf32> to vector<8x256xf32>
    %300 = vector.broadcast %1 : vector<1x256xf32> to vector<8x256xf32>
    %301 = arith.addf %299, %300 : vector<8x256xf32>
    %cst_85 = arith.constant 0.000000e+00 : f32
    %302 = vector.broadcast %cst_85 : f32 to vector<8x256xf32>
    %303 = arith.subf %302, %301 : vector<8x256xf32>
    %304 = math.exp %303 : vector<8x256xf32>
    %cst_86 = arith.constant 1.000000e+00 : f32
    %305 = vector.broadcast %cst_86 : f32 to vector<8x256xf32>
    %306 = arith.addf %305, %304 : vector<8x256xf32>
    %cst_87 = arith.constant 1.000000e+00 : f32
    %307 = vector.broadcast %cst_87 : f32 to vector<8x256xf32>
    %308 = arith.divf %307, %306 : vector<8x256xf32>
    %309 = vector.extract_strided_slice %308 {offsets = [0, 0], sizes = [8, 64], strides = [1, 1]} : vector<8x256xf32> to vector<8x64xf32>
    %310 = vector.extract_strided_slice %308 {offsets = [0, 64], sizes = [8, 64], strides = [1, 1]} : vector<8x256xf32> to vector<8x64xf32>
    %311 = vector.extract_strided_slice %308 {offsets = [0, 192], sizes = [8, 64], strides = [1, 1]} : vector<8x256xf32> to vector<8x64xf32>
    %312 = vector.extract_strided_slice %308 {offsets = [0, 128], sizes = [8, 64], strides = [1, 1]} : vector<8x256xf32> to vector<8x64xf32>
    %cst_88 = arith.constant 2.000000e+00 : f32
    %313 = vector.broadcast %cst_88 : f32 to vector<8x64xf32>
    %314 = arith.mulf %313, %312 : vector<8x64xf32>
    %cst_89 = arith.constant 1.000000e+00 : f32
    %315 = vector.broadcast %cst_89 : f32 to vector<8x64xf32>
    %316 = arith.subf %314, %315 : vector<8x64xf32>
    %317 = arith.mulf %310, %267 : vector<8x64xf32>
    %318 = arith.mulf %309, %316 : vector<8x64xf32>
    %319 = arith.addf %317, %318 : vector<8x64xf32>
    %320 = math.tanh %319 : vector<8x64xf32>
    %321 = arith.mulf %311, %320 : vector<8x64xf32>
    %322 = vector.shape_cast %321 : vector<8x64xf32> to vector<8x1x64xf32>
    %c0_90 = arith.constant 0 : index
    %c5 = arith.constant 5 : index
    %c0_91 = arith.constant 0 : index
    %323 = vector.load %arg9[%c0_90, %c5, %c0_91] : memref<8x8x64xf32, #tpu.memory_space<vmem>>, vector<8x1x64xf32>
    tpu.vector_store %arg9[%c0_90, %c5, %c0_91], %322 {strides = array<i32>} : memref<8x8x64xf32, #tpu.memory_space<vmem>>, vector<8x1x64xf32>,
    %324 = vector.extract_strided_slice %9 {offsets = [6, 0, 0], sizes = [1, 8, 256], strides = [1, 1, 1]} : vector<8x8x256xf32> to vector<1x8x256xf32>
    %325 = vector.shape_cast %324 : vector<1x8x256xf32> to vector<8x256xf32>
    %326 = vector.extract_strided_slice %298 {offsets = [0, 0], sizes = [8, 256], strides = [1, 1]} : vector<8x512xf32> to vector<8x256xf32>
    %327 = arith.addf %325, %326 : vector<8x256xf32>
    %cst_92 = arith.constant 0.000000e+00 : f32
    %328 = vector.broadcast %cst_92 : f32 to vector<8x256xf32>
    %329 = arith.subf %328, %327 : vector<8x256xf32>
    %330 = math.exp %329 : vector<8x256xf32>
    %cst_93 = arith.constant 1.000000e+00 : f32
    %331 = vector.broadcast %cst_93 : f32 to vector<8x256xf32>
    %332 = arith.addf %331, %330 : vector<8x256xf32>
    %cst_94 = arith.constant 1.000000e+00 : f32
    %333 = vector.broadcast %cst_94 : f32 to vector<8x256xf32>
    %334 = arith.divf %333, %332 : vector<8x256xf32>
    %335 = vector.extract_strided_slice %334 {offsets = [0, 0], sizes = [8, 64], strides = [1, 1]} : vector<8x256xf32> to vector<8x64xf32>
    %336 = vector.extract_strided_slice %334 {offsets = [0, 64], sizes = [8, 64], strides = [1, 1]} : vector<8x256xf32> to vector<8x64xf32>
    %337 = vector.extract_strided_slice %334 {offsets = [0, 192], sizes = [8, 64], strides = [1, 1]} : vector<8x256xf32> to vector<8x64xf32>
    %338 = vector.extract_strided_slice %334 {offsets = [0, 128], sizes = [8, 64], strides = [1, 1]} : vector<8x256xf32> to vector<8x64xf32>
    %cst_95 = arith.constant 2.000000e+00 : f32
    %339 = vector.broadcast %cst_95 : f32 to vector<8x64xf32>
    %340 = arith.mulf %339, %338 : vector<8x64xf32>
    %cst_96 = arith.constant 1.000000e+00 : f32
    %341 = vector.broadcast %cst_96 : f32 to vector<8x64xf32>
    %342 = arith.subf %340, %341 : vector<8x64xf32>
    %343 = arith.mulf %336, %293 : vector<8x64xf32>
    %344 = arith.mulf %335, %342 : vector<8x64xf32>
    %345 = arith.addf %343, %344 : vector<8x64xf32>
    %346 = math.tanh %345 : vector<8x64xf32>
    %347 = arith.mulf %337, %346 : vector<8x64xf32>
    %348 = tpu.concatenate %347, %321 in 1 : vector<8x64xf32>, vector<8x64xf32> -> vector<8x128xf32>
    %349 = arith.truncf %348 : vector<8x128xf32> to vector<8x128xbf16>
    %cst_97 = arith.constant dense<0.000000e+00> : vector<8x512xf32>
    %350 = tpu.matmul %349, %10, %cst_97 {dimension_numbers = #tpu.dot_dimension_numbers<[1], [0], [0], [1], [0, 0, 1, 1], [], []>} : vector<8x128xbf16>, vector<128x512xbf16>, vector<8x512xf32> -> vector<8x512xf32>
    %351 = vector.extract_strided_slice %350 {offsets = [0, 256], sizes = [8, 256], strides = [1, 1]} : vector<8x512xf32> to vector<8x256xf32>
    %352 = vector.broadcast %1 : vector<1x256xf32> to vector<8x256xf32>
    %353 = arith.addf %351, %352 : vector<8x256xf32>
    %cst_98 = arith.constant 0.000000e+00 : f32
    %354 = vector.broadcast %cst_98 : f32 to vector<8x256xf32>
    %355 = arith.subf %354, %353 : vector<8x256xf32>
    %356 = math.exp %355 : vector<8x256xf32>
    %cst_99 = arith.constant 1.000000e+00 : f32
    %357 = vector.broadcast %cst_99 : f32 to vector<8x256xf32>
    %358 = arith.addf %357, %356 : vector<8x256xf32>
    %cst_100 = arith.constant 1.000000e+00 : f32
    %359 = vector.broadcast %cst_100 : f32 to vector<8x256xf32>
    %360 = arith.divf %359, %358 : vector<8x256xf32>
    %361 = vector.extract_strided_slice %360 {offsets = [0, 0], sizes = [8, 64], strides = [1, 1]} : vector<8x256xf32> to vector<8x64xf32>
    %362 = vector.extract_strided_slice %360 {offsets = [0, 64], sizes = [8, 64], strides = [1, 1]} : vector<8x256xf32> to vector<8x64xf32>
    %363 = vector.extract_strided_slice %360 {offsets = [0, 192], sizes = [8, 64], strides = [1, 1]} : vector<8x256xf32> to vector<8x64xf32>
    %364 = vector.extract_strided_slice %360 {offsets = [0, 128], sizes = [8, 64], strides = [1, 1]} : vector<8x256xf32> to vector<8x64xf32>
    %cst_101 = arith.constant 2.000000e+00 : f32
    %365 = vector.broadcast %cst_101 : f32 to vector<8x64xf32>
    %366 = arith.mulf %365, %364 : vector<8x64xf32>
    %cst_102 = arith.constant 1.000000e+00 : f32
    %367 = vector.broadcast %cst_102 : f32 to vector<8x64xf32>
    %368 = arith.subf %366, %367 : vector<8x64xf32>
    %369 = arith.mulf %362, %319 : vector<8x64xf32>
    %370 = arith.mulf %361, %368 : vector<8x64xf32>
    %371 = arith.addf %369, %370 : vector<8x64xf32>
    %372 = math.tanh %371 : vector<8x64xf32>
    %373 = arith.mulf %363, %372 : vector<8x64xf32>
    %374 = vector.shape_cast %373 : vector<8x64xf32> to vector<8x1x64xf32>
    %c0_103 = arith.constant 0 : index
    %c6 = arith.constant 6 : index
    %c0_104 = arith.constant 0 : index
    %375 = vector.load %arg9[%c0_103, %c6, %c0_104] : memref<8x8x64xf32, #tpu.memory_space<vmem>>, vector<8x1x64xf32>
    tpu.vector_store %arg9[%c0_103, %c6, %c0_104], %374 {strides = array<i32>} : memref<8x8x64xf32, #tpu.memory_space<vmem>>, vector<8x1x64xf32>,
    %376 = vector.extract_strided_slice %9 {offsets = [7, 0, 0], sizes = [1, 8, 256], strides = [1, 1, 1]} : vector<8x8x256xf32> to vector<1x8x256xf32>
    %377 = vector.shape_cast %376 : vector<1x8x256xf32> to vector<8x256xf32>
    %378 = vector.extract_strided_slice %350 {offsets = [0, 0], sizes = [8, 256], strides = [1, 1]} : vector<8x512xf32> to vector<8x256xf32>
    %379 = arith.addf %377, %378 : vector<8x256xf32>
    %cst_105 = arith.constant 0.000000e+00 : f32
    %380 = vector.broadcast %cst_105 : f32 to vector<8x256xf32>
    %381 = arith.subf %380, %379 : vector<8x256xf32>
    %382 = math.exp %381 : vector<8x256xf32>
    %cst_106 = arith.constant 1.000000e+00 : f32
    %383 = vector.broadcast %cst_106 : f32 to vector<8x256xf32>
    %384 = arith.addf %383, %382 : vector<8x256xf32>
    %cst_107 = arith.constant 1.000000e+00 : f32
    %385 = vector.broadcast %cst_107 : f32 to vector<8x256xf32>
    %386 = arith.divf %385, %384 : vector<8x256xf32>
    %387 = vector.extract_strided_slice %386 {offsets = [0, 0], sizes = [8, 64], strides = [1, 1]} : vector<8x256xf32> to vector<8x64xf32>
    %388 = vector.extract_strided_slice %386 {offsets = [0, 64], sizes = [8, 64], strides = [1, 1]} : vector<8x256xf32> to vector<8x64xf32>
    %389 = vector.extract_strided_slice %386 {offsets = [0, 192], sizes = [8, 64], strides = [1, 1]} : vector<8x256xf32> to vector<8x64xf32>
    %390 = vector.extract_strided_slice %386 {offsets = [0, 128], sizes = [8, 64], strides = [1, 1]} : vector<8x256xf32> to vector<8x64xf32>
    %cst_108 = arith.constant 2.000000e+00 : f32
    %391 = vector.broadcast %cst_108 : f32 to vector<8x64xf32>
    %392 = arith.mulf %391, %390 : vector<8x64xf32>
    %cst_109 = arith.constant 1.000000e+00 : f32
    %393 = vector.broadcast %cst_109 : f32 to vector<8x64xf32>
    %394 = arith.subf %392, %393 : vector<8x64xf32>
    %395 = arith.mulf %388, %345 : vector<8x64xf32>
    %396 = arith.mulf %387, %394 : vector<8x64xf32>
    %397 = arith.addf %395, %396 : vector<8x64xf32>
    %398 = math.tanh %397 : vector<8x64xf32>
    %399 = arith.mulf %389, %398 : vector<8x64xf32>
    %400 = tpu.concatenate %399, %373 in 1 : vector<8x64xf32>, vector<8x64xf32> -> vector<8x128xf32>
    %401 = arith.truncf %400 : vector<8x128xf32> to vector<8x128xbf16>
    %c0_110 = arith.constant 0 : index
    %c256 = arith.constant 256 : index
    %402 = vector.load %arg2[%c0_110, %c256] : memref<128x512xbf16, #tpu.memory_space<vmem>>, vector<128x256xbf16>
    %cst_111 = arith.constant dense<0.000000e+00> : vector<8x256xf32>
    %403 = tpu.matmul %401, %402, %cst_111 {dimension_numbers = #tpu.dot_dimension_numbers<[1], [0], [0], [1], [0, 0, 1, 1], [], []>} : vector<8x128xbf16>, vector<128x256xbf16>, vector<8x256xf32> -> vector<8x256xf32>
    %404 = vector.broadcast %1 : vector<1x256xf32> to vector<8x256xf32>
    %405 = arith.addf %403, %404 : vector<8x256xf32>
    %cst_112 = arith.constant 0.000000e+00 : f32
    %406 = vector.broadcast %cst_112 : f32 to vector<8x256xf32>
    %407 = arith.subf %406, %405 : vector<8x256xf32>
    %408 = math.exp %407 : vector<8x256xf32>
    %cst_113 = arith.constant 1.000000e+00 : f32
    %409 = vector.broadcast %cst_113 : f32 to vector<8x256xf32>
    %410 = arith.addf %409, %408 : vector<8x256xf32>
    %cst_114 = arith.constant 1.000000e+00 : f32
    %411 = vector.broadcast %cst_114 : f32 to vector<8x256xf32>
    %412 = arith.divf %411, %410 : vector<8x256xf32>
    %413 = vector.extract_strided_slice %412 {offsets = [0, 0], sizes = [8, 64], strides = [1, 1]} : vector<8x256xf32> to vector<8x64xf32>
    %414 = vector.extract_strided_slice %412 {offsets = [0, 64], sizes = [8, 64], strides = [1, 1]} : vector<8x256xf32> to vector<8x64xf32>
    %415 = vector.extract_strided_slice %412 {offsets = [0, 192], sizes = [8, 64], strides = [1, 1]} : vector<8x256xf32> to vector<8x64xf32>
    %416 = vector.extract_strided_slice %412 {offsets = [0, 128], sizes = [8, 64], strides = [1, 1]} : vector<8x256xf32> to vector<8x64xf32>
    %cst_115 = arith.constant 2.000000e+00 : f32
    %417 = vector.broadcast %cst_115 : f32 to vector<8x64xf32>
    %418 = arith.mulf %417, %416 : vector<8x64xf32>
    %cst_116 = arith.constant 1.000000e+00 : f32
    %419 = vector.broadcast %cst_116 : f32 to vector<8x64xf32>
    %420 = arith.subf %418, %419 : vector<8x64xf32>
    %421 = arith.mulf %414, %371 : vector<8x64xf32>
    %422 = arith.mulf %413, %420 : vector<8x64xf32>
    %423 = arith.addf %421, %422 : vector<8x64xf32>
    %424 = math.tanh %423 : vector<8x64xf32>
    %425 = arith.mulf %415, %424 : vector<8x64xf32>
    %426 = vector.shape_cast %425 : vector<8x64xf32> to vector<8x1x64xf32>
    %c0_117 = arith.constant 0 : index
    %c7 = arith.constant 7 : index
    %c0_118 = arith.constant 0 : index
    %427 = vector.load %arg9[%c0_117, %c7, %c0_118] : memref<8x8x64xf32, #tpu.memory_space<vmem>>, vector<8x1x64xf32>
    tpu.vector_store %arg9[%c0_117, %c7, %c0_118], %426 {strides = array<i32>} : memref<8x8x64xf32, #tpu.memory_space<vmem>>, vector<8x1x64xf32>,
    %c0_119 = arith.constant 0 : index
    %c0_120 = arith.constant 0 : index
    %c0_121 = arith.constant 0 : index
    %428 = vector.load %arg9[%c0_119, %c0_120, %c0_121] : memref<8x8x64xf32, #tpu.memory_space<vmem>>, vector<8x8x64xf32>
    %429 = vector.shape_cast %428 : vector<8x8x64xf32> to vector<64x64xf32>
    %430 = arith.truncf %429 : vector<64x64xf32> to vector<64x64xbf16>
    %cst_122 = arith.constant 0.000000e+00 : f32
    %431 = vector.broadcast %cst_122 : f32 to vector<8x64xf32>
    %c2_123 = arith.constant 2 : index
    %c0_124 = arith.constant 0 : index
    %432 = vector.load %arg7[%c2_123, %c0_124] : memref<9x256xf32, #tpu.memory_space<vmem>>, vector<1x16xf32>
    %c0_125 = arith.constant 0 : index
    %c0_126 = arith.constant 0 : index
    %c0_127 = arith.constant 0 : index
    %433 = vector.load %arg3[%c0_125, %c0_126, %c0_127] : memref<8x64x16xbf16, #tpu.memory_space<vmem>>, vector<1x64x16xbf16>
    %434 = vector.shape_cast %433 : vector<1x64x16xbf16> to vector<64x16xbf16>
    %cst_128 = arith.constant dense<0.000000e+00> : vector<64x16xf32>
    %435 = tpu.matmul %430, %434, %cst_128 {dimension_numbers = #tpu.dot_dimension_numbers<[1], [0], [0], [1], [0, 0, 1, 1], [], []>} : vector<64x64xbf16>, vector<64x16xbf16>, vector<64x16xf32> -> vector<64x16xf32>
    %436 = vector.broadcast %432 : vector<1x16xf32> to vector<64x16xf32>
    %437 = arith.addf %435, %436 : vector<64x16xf32>
    %438 = vector.shape_cast %437 : vector<64x16xf32> to vector<8x8x16xf32>
    %439 = arith.truncf %438 : vector<8x8x16xf32> to vector<8x8x16xbf16>
    %c1_129 = arith.constant 1 : index
    %c0_130 = arith.constant 0 : index
    %c0_131 = arith.constant 0 : index
    %440 = vector.load %arg3[%c1_129, %c0_130, %c0_131] : memref<8x64x16xbf16, #tpu.memory_space<vmem>>, vector<1x64x16xbf16>
    %441 = vector.shape_cast %440 : vector<1x64x16xbf16> to vector<64x16xbf16>
    %cst_132 = arith.constant dense<0.000000e+00> : vector<64x16xf32>
    %442 = tpu.matmul %430, %441, %cst_132 {dimension_numbers = #tpu.dot_dimension_numbers<[1], [0], [0], [1], [0, 0, 1, 1], [], []>} : vector<64x64xbf16>, vector<64x16xbf16>, vector<64x16xf32> -> vector<64x16xf32>
    %443 = vector.shape_cast %442 : vector<64x16xf32> to vector<8x8x16xf32>
    %444 = arith.truncf %443 : vector<8x8x16xf32> to vector<8x8x16xbf16>
    "tpu.trace_start"() <{level = 10 : i32, message = "bqd,bkd->bqk"}> : () -> ()
    %cst_133 = arith.constant dense<0.000000e+00> : vector<8x8x8xf32>
    %445 = tpu.matmul %439, %444, %cst_133 {dimension_numbers = #tpu.dot_dimension_numbers<[2], [2], [1], [1], [0, 0, 0, 1, 1, 1], [0], [0]>} : vector<8x8x16xbf16>, vector<8x8x16xbf16>, vector<8x8x8xf32> -> vector<8x8x8xf32>
    "tpu.trace_stop"() : () -> ()
    %cst_134 = arith.constant dense<0xFF800000> : vector<8x8xf32>
    %446 = vector.multi_reduction <maximumf>, %445, %cst_134 [2] : vector<8x8x8xf32> to vector<8x8xf32>
    %447 = vector.shape_cast %446 : vector<8x8xf32> to vector<8x8x1xf32>
    %448 = vector.broadcast %447 : vector<8x8x1xf32> to vector<8x8x8xf32>
    %449 = arith.subf %445, %448 : vector<8x8x8xf32>
    %450 = math.exp %449 : vector<8x8x8xf32>
    %cst_135 = arith.constant dense<0.000000e+00> : vector<8x8xf32>
    %451 = vector.multi_reduction <add>, %450, %cst_135 [2] : vector<8x8x8xf32> to vector<8x8xf32>
    %452 = vector.shape_cast %451 : vector<8x8xf32> to vector<8x8x1xf32>
    %453 = vector.broadcast %452 : vector<8x8x1xf32> to vector<8x8x8xf32>
    %454 = arith.divf %450, %453 : vector<8x8x8xf32>
    %cst_136 = arith.constant dense<0.000000e+00> : vector<8x8xf32>
    %455 = vector.multi_reduction <add>, %454, %cst_136 [1] : vector<8x8x8xf32> to vector<8x8xf32>
    %456 = vector.shape_cast %455 : vector<8x8xf32> to vector<8x1x8xf32>
    %cst_137 = arith.constant 8.000000e+00 : f32
    %457 = vector.broadcast %cst_137 : f32 to vector<8x1x8xf32>
    %458 = arith.divf %456, %457 : vector<8x1x8xf32>
    %459 = arith.truncf %458 : vector<8x1x8xf32> to vector<8x1x8xbf16>
    %c0_138 = arith.constant 0 : index
    %c0_139 = arith.constant 0 : index
    %c0_140 = arith.constant 0 : index
    %460 = vector.load %arg4[%c0_138, %c0_139, %c0_140] : memref<4x64x64xbf16, #tpu.memory_space<vmem>>, vector<1x64x64xbf16>
    %461 = vector.shape_cast %460 : vector<1x64x64xbf16> to vector<64x64xbf16>
    %cst_141 = arith.constant dense<0.000000e+00> : vector<64x64xf32>
    %462 = tpu.matmul %430, %461, %cst_141 {dimension_numbers = #tpu.dot_dimension_numbers<[1], [0], [0], [1], [0, 0, 1, 1], [], []>} : vector<64x64xbf16>, vector<64x64xbf16>, vector<64x64xf32> -> vector<64x64xf32>
    %463 = vector.shape_cast %462 : vector<64x64xf32> to vector<8x8x64xf32>
    %464 = arith.truncf %463 : vector<8x8x64xf32> to vector<8x8x64xbf16>
    "tpu.trace_start"() <{level = 10 : i32, message = "bqk,bkd->bqd"}> : () -> ()
    %cst_142 = arith.constant dense<0.000000e+00> : vector<8x1x64xf32>
    %465 = tpu.matmul %459, %464, %cst_142 {dimension_numbers = #tpu.dot_dimension_numbers<[2], [1], [1], [2], [0, 0, 0, 1, 1, 2], [0], [0]>} : vector<8x1x8xbf16>, vector<8x8x64xbf16>, vector<8x1x64xf32> -> vector<8x1x64xf32>
    "tpu.trace_stop"() : () -> ()
    %466 = vector.shape_cast %465 : vector<8x1x64xf32> to vector<8x64xf32>
    %467 = arith.addf %431, %466 : vector<8x64xf32>
    %c3_143 = arith.constant 3 : index
    %c0_144 = arith.constant 0 : index
    %468 = vector.load %arg7[%c3_143, %c0_144] : memref<9x256xf32, #tpu.memory_space<vmem>>, vector<1x16xf32>
    %c2_145 = arith.constant 2 : index
    %c0_146 = arith.constant 0 : index
    %c0_147 = arith.constant 0 : index
    %469 = vector.load %arg3[%c2_145, %c0_146, %c0_147] : memref<8x64x16xbf16, #tpu.memory_space<vmem>>, vector<1x64x16xbf16>
    %470 = vector.shape_cast %469 : vector<1x64x16xbf16> to vector<64x16xbf16>
    %cst_148 = arith.constant dense<0.000000e+00> : vector<64x16xf32>
    %471 = tpu.matmul %430, %470, %cst_148 {dimension_numbers = #tpu.dot_dimension_numbers<[1], [0], [0], [1], [0, 0, 1, 1], [], []>} : vector<64x64xbf16>, vector<64x16xbf16>, vector<64x16xf32> -> vector<64x16xf32>
    %472 = vector.broadcast %468 : vector<1x16xf32> to vector<64x16xf32>
    %473 = arith.addf %471, %472 : vector<64x16xf32>
    %474 = vector.shape_cast %473 : vector<64x16xf32> to vector<8x8x16xf32>
    %475 = arith.truncf %474 : vector<8x8x16xf32> to vector<8x8x16xbf16>
    %c3_149 = arith.constant 3 : index
    %c0_150 = arith.constant 0 : index
    %c0_151 = arith.constant 0 : index
    %476 = vector.load %arg3[%c3_149, %c0_150, %c0_151] : memref<8x64x16xbf16, #tpu.memory_space<vmem>>, vector<1x64x16xbf16>
    %477 = vector.shape_cast %476 : vector<1x64x16xbf16> to vector<64x16xbf16>
    %cst_152 = arith.constant dense<0.000000e+00> : vector<64x16xf32>
    %478 = tpu.matmul %430, %477, %cst_152 {dimension_numbers = #tpu.dot_dimension_numbers<[1], [0], [0], [1], [0, 0, 1, 1], [], []>} : vector<64x64xbf16>, vector<64x16xbf16>, vector<64x16xf32> -> vector<64x16xf32>
    %479 = vector.shape_cast %478 : vector<64x16xf32> to vector<8x8x16xf32>
    %480 = arith.truncf %479 : vector<8x8x16xf32> to vector<8x8x16xbf16>
    "tpu.trace_start"() <{level = 10 : i32, message = "bqd,bkd->bqk"}> : () -> ()
    %cst_153 = arith.constant dense<0.000000e+00> : vector<8x8x8xf32>
    %481 = tpu.matmul %475, %480, %cst_153 {dimension_numbers = #tpu.dot_dimension_numbers<[2], [2], [1], [1], [0, 0, 0, 1, 1, 1], [0], [0]>} : vector<8x8x16xbf16>, vector<8x8x16xbf16>, vector<8x8x8xf32> -> vector<8x8x8xf32>
    "tpu.trace_stop"() : () -> ()
    %cst_154 = arith.constant dense<0xFF800000> : vector<8x8xf32>
    %482 = vector.multi_reduction <maximumf>, %481, %cst_154 [2] : vector<8x8x8xf32> to vector<8x8xf32>
    %483 = vector.shape_cast %482 : vector<8x8xf32> to vector<8x8x1xf32>
    %484 = vector.broadcast %483 : vector<8x8x1xf32> to vector<8x8x8xf32>
    %485 = arith.subf %481, %484 : vector<8x8x8xf32>
    %486 = math.exp %485 : vector<8x8x8xf32>
    %cst_155 = arith.constant dense<0.000000e+00> : vector<8x8xf32>
    %487 = vector.multi_reduction <add>, %486, %cst_155 [2] : vector<8x8x8xf32> to vector<8x8xf32>
    %488 = vector.shape_cast %487 : vector<8x8xf32> to vector<8x8x1xf32>
    %489 = vector.broadcast %488 : vector<8x8x1xf32> to vector<8x8x8xf32>
    %490 = arith.divf %486, %489 : vector<8x8x8xf32>
    %cst_156 = arith.constant dense<0.000000e+00> : vector<8x8xf32>
    %491 = vector.multi_reduction <add>, %490, %cst_156 [1] : vector<8x8x8xf32> to vector<8x8xf32>
    %492 = vector.shape_cast %491 : vector<8x8xf32> to vector<8x1x8xf32>
    %cst_157 = arith.constant 8.000000e+00 : f32
    %493 = vector.broadcast %cst_157 : f32 to vector<8x1x8xf32>
    %494 = arith.divf %492, %493 : vector<8x1x8xf32>
    %495 = arith.truncf %494 : vector<8x1x8xf32> to vector<8x1x8xbf16>
    %c1_158 = arith.constant 1 : index
    %c0_159 = arith.constant 0 : index
    %c0_160 = arith.constant 0 : index
    %496 = vector.load %arg4[%c1_158, %c0_159, %c0_160] : memref<4x64x64xbf16, #tpu.memory_space<vmem>>, vector<1x64x64xbf16>
    %497 = vector.shape_cast %496 : vector<1x64x64xbf16> to vector<64x64xbf16>
    %cst_161 = arith.constant dense<0.000000e+00> : vector<64x64xf32>
    %498 = tpu.matmul %430, %497, %cst_161 {dimension_numbers = #tpu.dot_dimension_numbers<[1], [0], [0], [1], [0, 0, 1, 1], [], []>} : vector<64x64xbf16>, vector<64x64xbf16>, vector<64x64xf32> -> vector<64x64xf32>
    %499 = vector.shape_cast %498 : vector<64x64xf32> to vector<8x8x64xf32>
    %500 = arith.truncf %499 : vector<8x8x64xf32> to vector<8x8x64xbf16>
    "tpu.trace_start"() <{level = 10 : i32, message = "bqk,bkd->bqd"}> : () -> ()
    %cst_162 = arith.constant dense<0.000000e+00> : vector<8x1x64xf32>
    %501 = tpu.matmul %495, %500, %cst_162 {dimension_numbers = #tpu.dot_dimension_numbers<[2], [1], [1], [2], [0, 0, 0, 1, 1, 2], [0], [0]>} : vector<8x1x8xbf16>, vector<8x8x64xbf16>, vector<8x1x64xf32> -> vector<8x1x64xf32>
    "tpu.trace_stop"() : () -> ()
    %502 = vector.shape_cast %501 : vector<8x1x64xf32> to vector<8x64xf32>
    %503 = arith.addf %467, %502 : vector<8x64xf32>
    %c4_163 = arith.constant 4 : index
    %c0_164 = arith.constant 0 : index
    %504 = vector.load %arg7[%c4_163, %c0_164] : memref<9x256xf32, #tpu.memory_space<vmem>>, vector<1x16xf32>
    %c4_165 = arith.constant 4 : index
    %c0_166 = arith.constant 0 : index
    %c0_167 = arith.constant 0 : index
    %505 = vector.load %arg3[%c4_165, %c0_166, %c0_167] : memref<8x64x16xbf16, #tpu.memory_space<vmem>>, vector<1x64x16xbf16>
    %506 = vector.shape_cast %505 : vector<1x64x16xbf16> to vector<64x16xbf16>
    %cst_168 = arith.constant dense<0.000000e+00> : vector<64x16xf32>
    %507 = tpu.matmul %430, %506, %cst_168 {dimension_numbers = #tpu.dot_dimension_numbers<[1], [0], [0], [1], [0, 0, 1, 1], [], []>} : vector<64x64xbf16>, vector<64x16xbf16>, vector<64x16xf32> -> vector<64x16xf32>
    %508 = vector.broadcast %504 : vector<1x16xf32> to vector<64x16xf32>
    %509 = arith.addf %507, %508 : vector<64x16xf32>
    %510 = vector.shape_cast %509 : vector<64x16xf32> to vector<8x8x16xf32>
    %511 = arith.truncf %510 : vector<8x8x16xf32> to vector<8x8x16xbf16>
    %c5_169 = arith.constant 5 : index
    %c0_170 = arith.constant 0 : index
    %c0_171 = arith.constant 0 : index
    %512 = vector.load %arg3[%c5_169, %c0_170, %c0_171] : memref<8x64x16xbf16, #tpu.memory_space<vmem>>, vector<1x64x16xbf16>
    %513 = vector.shape_cast %512 : vector<1x64x16xbf16> to vector<64x16xbf16>
    %cst_172 = arith.constant dense<0.000000e+00> : vector<64x16xf32>
    %514 = tpu.matmul %430, %513, %cst_172 {dimension_numbers = #tpu.dot_dimension_numbers<[1], [0], [0], [1], [0, 0, 1, 1], [], []>} : vector<64x64xbf16>, vector<64x16xbf16>, vector<64x16xf32> -> vector<64x16xf32>
    %515 = vector.shape_cast %514 : vector<64x16xf32> to vector<8x8x16xf32>
    %516 = arith.truncf %515 : vector<8x8x16xf32> to vector<8x8x16xbf16>
    "tpu.trace_start"() <{level = 10 : i32, message = "bqd,bkd->bqk"}> : () -> ()
    %cst_173 = arith.constant dense<0.000000e+00> : vector<8x8x8xf32>
    %517 = tpu.matmul %511, %516, %cst_173 {dimension_numbers = #tpu.dot_dimension_numbers<[2], [2], [1], [1], [0, 0, 0, 1, 1, 1], [0], [0]>} : vector<8x8x16xbf16>, vector<8x8x16xbf16>, vector<8x8x8xf32> -> vector<8x8x8xf32>
    "tpu.trace_stop"() : () -> ()
    %cst_174 = arith.constant dense<0xFF800000> : vector<8x8xf32>
    %518 = vector.multi_reduction <maximumf>, %517, %cst_174 [2] : vector<8x8x8xf32> to vector<8x8xf32>
    %519 = vector.shape_cast %518 : vector<8x8xf32> to vector<8x8x1xf32>
    %520 = vector.broadcast %519 : vector<8x8x1xf32> to vector<8x8x8xf32>
    %521 = arith.subf %517, %520 : vector<8x8x8xf32>
    %522 = math.exp %521 : vector<8x8x8xf32>
    %cst_175 = arith.constant dense<0.000000e+00> : vector<8x8xf32>
    %523 = vector.multi_reduction <add>, %522, %cst_175 [2] : vector<8x8x8xf32> to vector<8x8xf32>
    %524 = vector.shape_cast %523 : vector<8x8xf32> to vector<8x8x1xf32>
    %525 = vector.broadcast %524 : vector<8x8x1xf32> to vector<8x8x8xf32>
    %526 = arith.divf %522, %525 : vector<8x8x8xf32>
    %cst_176 = arith.constant dense<0.000000e+00> : vector<8x8xf32>
    %527 = vector.multi_reduction <add>, %526, %cst_176 [1] : vector<8x8x8xf32> to vector<8x8xf32>
    %528 = vector.shape_cast %527 : vector<8x8xf32> to vector<8x1x8xf32>
    %cst_177 = arith.constant 8.000000e+00 : f32
    %529 = vector.broadcast %cst_177 : f32 to vector<8x1x8xf32>
    %530 = arith.divf %528, %529 : vector<8x1x8xf32>
    %531 = arith.truncf %530 : vector<8x1x8xf32> to vector<8x1x8xbf16>
    %c2_178 = arith.constant 2 : index
    %c0_179 = arith.constant 0 : index
    %c0_180 = arith.constant 0 : index
    %532 = vector.load %arg4[%c2_178, %c0_179, %c0_180] : memref<4x64x64xbf16, #tpu.memory_space<vmem>>, vector<1x64x64xbf16>
    %533 = vector.shape_cast %532 : vector<1x64x64xbf16> to vector<64x64xbf16>
    %cst_181 = arith.constant dense<0.000000e+00> : vector<64x64xf32>
    %534 = tpu.matmul %430, %533, %cst_181 {dimension_numbers = #tpu.dot_dimension_numbers<[1], [0], [0], [1], [0, 0, 1, 1], [], []>} : vector<64x64xbf16>, vector<64x64xbf16>, vector<64x64xf32> -> vector<64x64xf32>
    %535 = vector.shape_cast %534 : vector<64x64xf32> to vector<8x8x64xf32>
    %536 = arith.truncf %535 : vector<8x8x64xf32> to vector<8x8x64xbf16>
    "tpu.trace_start"() <{level = 10 : i32, message = "bqk,bkd->bqd"}> : () -> ()
    %cst_182 = arith.constant dense<0.000000e+00> : vector<8x1x64xf32>
    %537 = tpu.matmul %531, %536, %cst_182 {dimension_numbers = #tpu.dot_dimension_numbers<[2], [1], [1], [2], [0, 0, 0, 1, 1, 2], [0], [0]>} : vector<8x1x8xbf16>, vector<8x8x64xbf16>, vector<8x1x64xf32> -> vector<8x1x64xf32>
    "tpu.trace_stop"() : () -> ()
    %538 = vector.shape_cast %537 : vector<8x1x64xf32> to vector<8x64xf32>
    %539 = arith.addf %503, %538 : vector<8x64xf32>
    %c5_183 = arith.constant 5 : index
    %c0_184 = arith.constant 0 : index
    %540 = vector.load %arg7[%c5_183, %c0_184] : memref<9x256xf32, #tpu.memory_space<vmem>>, vector<1x16xf32>
    %c6_185 = arith.constant 6 : index
    %c0_186 = arith.constant 0 : index
    %c0_187 = arith.constant 0 : index
    %541 = vector.load %arg3[%c6_185, %c0_186, %c0_187] : memref<8x64x16xbf16, #tpu.memory_space<vmem>>, vector<1x64x16xbf16>
    %542 = vector.shape_cast %541 : vector<1x64x16xbf16> to vector<64x16xbf16>
    %cst_188 = arith.constant dense<0.000000e+00> : vector<64x16xf32>
    %543 = tpu.matmul %430, %542, %cst_188 {dimension_numbers = #tpu.dot_dimension_numbers<[1], [0], [0], [1], [0, 0, 1, 1], [], []>} : vector<64x64xbf16>, vector<64x16xbf16>, vector<64x16xf32> -> vector<64x16xf32>
    %544 = vector.broadcast %540 : vector<1x16xf32> to vector<64x16xf32>
    %545 = arith.addf %543, %544 : vector<64x16xf32>
    %546 = vector.shape_cast %545 : vector<64x16xf32> to vector<8x8x16xf32>
    %547 = arith.truncf %546 : vector<8x8x16xf32> to vector<8x8x16xbf16>
    %c7_189 = arith.constant 7 : index
    %c0_190 = arith.constant 0 : index
    %c0_191 = arith.constant 0 : index
    %548 = vector.load %arg3[%c7_189, %c0_190, %c0_191] : memref<8x64x16xbf16, #tpu.memory_space<vmem>>, vector<1x64x16xbf16>
    %549 = vector.shape_cast %548 : vector<1x64x16xbf16> to vector<64x16xbf16>
    %cst_192 = arith.constant dense<0.000000e+00> : vector<64x16xf32>
    %550 = tpu.matmul %430, %549, %cst_192 {dimension_numbers = #tpu.dot_dimension_numbers<[1], [0], [0], [1], [0, 0, 1, 1], [], []>} : vector<64x64xbf16>, vector<64x16xbf16>, vector<64x16xf32> -> vector<64x16xf32>
    %551 = vector.shape_cast %550 : vector<64x16xf32> to vector<8x8x16xf32>
    %552 = arith.truncf %551 : vector<8x8x16xf32> to vector<8x8x16xbf16>
    "tpu.trace_start"() <{level = 10 : i32, message = "bqd,bkd->bqk"}> : () -> ()
    %cst_193 = arith.constant dense<0.000000e+00> : vector<8x8x8xf32>
    %553 = tpu.matmul %547, %552, %cst_193 {dimension_numbers = #tpu.dot_dimension_numbers<[2], [2], [1], [1], [0, 0, 0, 1, 1, 1], [0], [0]>} : vector<8x8x16xbf16>, vector<8x8x16xbf16>, vector<8x8x8xf32> -> vector<8x8x8xf32>
    "tpu.trace_stop"() : () -> ()
    %cst_194 = arith.constant dense<0xFF800000> : vector<8x8xf32>
    %554 = vector.multi_reduction <maximumf>, %553, %cst_194 [2] : vector<8x8x8xf32> to vector<8x8xf32>
    %555 = vector.shape_cast %554 : vector<8x8xf32> to vector<8x8x1xf32>
    %556 = vector.broadcast %555 : vector<8x8x1xf32> to vector<8x8x8xf32>
    %557 = arith.subf %553, %556 : vector<8x8x8xf32>
    %558 = math.exp %557 : vector<8x8x8xf32>
    %cst_195 = arith.constant dense<0.000000e+00> : vector<8x8xf32>
    %559 = vector.multi_reduction <add>, %558, %cst_195 [2] : vector<8x8x8xf32> to vector<8x8xf32>
    %560 = vector.shape_cast %559 : vector<8x8xf32> to vector<8x8x1xf32>
    %561 = vector.broadcast %560 : vector<8x8x1xf32> to vector<8x8x8xf32>
    %562 = arith.divf %558, %561 : vector<8x8x8xf32>
    %cst_196 = arith.constant dense<0.000000e+00> : vector<8x8xf32>
    %563 = vector.multi_reduction <add>, %562, %cst_196 [1] : vector<8x8x8xf32> to vector<8x8xf32>
    %564 = vector.shape_cast %563 : vector<8x8xf32> to vector<8x1x8xf32>
    %cst_197 = arith.constant 8.000000e+00 : f32
    %565 = vector.broadcast %cst_197 : f32 to vector<8x1x8xf32>
    %566 = arith.divf %564, %565 : vector<8x1x8xf32>
    %567 = arith.truncf %566 : vector<8x1x8xf32> to vector<8x1x8xbf16>
    %c3_198 = arith.constant 3 : index
    %c0_199 = arith.constant 0 : index
    %c0_200 = arith.constant 0 : index
    %568 = vector.load %arg4[%c3_198, %c0_199, %c0_200] : memref<4x64x64xbf16, #tpu.memory_space<vmem>>, vector<1x64x64xbf16>
    %569 = vector.shape_cast %568 : vector<1x64x64xbf16> to vector<64x64xbf16>
    %cst_201 = arith.constant dense<0.000000e+00> : vector<64x64xf32>
    %570 = tpu.matmul %430, %569, %cst_201 {dimension_numbers = #tpu.dot_dimension_numbers<[1], [0], [0], [1], [0, 0, 1, 1], [], []>} : vector<64x64xbf16>, vector<64x64xbf16>, vector<64x64xf32> -> vector<64x64xf32>
    %571 = vector.shape_cast %570 : vector<64x64xf32> to vector<8x8x64xf32>
    %572 = arith.truncf %571 : vector<8x8x64xf32> to vector<8x8x64xbf16>
    "tpu.trace_start"() <{level = 10 : i32, message = "bqk,bkd->bqd"}> : () -> ()
    %cst_202 = arith.constant dense<0.000000e+00> : vector<8x1x64xf32>
    %573 = tpu.matmul %567, %572, %cst_202 {dimension_numbers = #tpu.dot_dimension_numbers<[2], [1], [1], [2], [0, 0, 0, 1, 1, 2], [0], [0]>} : vector<8x1x8xbf16>, vector<8x8x64xbf16>, vector<8x1x64xf32> -> vector<8x1x64xf32>
    "tpu.trace_stop"() : () -> ()
    %574 = vector.shape_cast %573 : vector<8x1x64xf32> to vector<8x64xf32>
    %575 = arith.addf %539, %574 : vector<8x64xf32>
    %c6_203 = arith.constant 6 : index
    %c0_204 = arith.constant 0 : index
    %576 = vector.load %arg7[%c6_203, %c0_204] : memref<9x256xf32, #tpu.memory_space<vmem>>, vector<1x64xf32>
    %577 = vector.broadcast %576 : vector<1x64xf32> to vector<8x64xf32>
    %578 = arith.addf %575, %577 : vector<8x64xf32>
    %579 = arith.truncf %578 : vector<8x64xf32> to vector<8x64xbf16>
    %c0_205 = arith.constant 0 : index
    %c0_206 = arith.constant 0 : index
    %580 = vector.load %arg5[%c0_205, %c0_206] : memref<64x32xbf16, #tpu.memory_space<vmem>>, vector<64x32xbf16>
    %cst_207 = arith.constant dense<0.000000e+00> : vector<8x32xf32>
    %581 = tpu.matmul %579, %580, %cst_207 {dimension_numbers = #tpu.dot_dimension_numbers<[1], [0], [0], [1], [0, 0, 1, 1], [], []>} : vector<8x64xbf16>, vector<64x32xbf16>, vector<8x32xf32> -> vector<8x32xf32>
    %c7_208 = arith.constant 7 : index
    %c0_209 = arith.constant 0 : index
    %582 = vector.load %arg7[%c7_208, %c0_209] : memref<9x256xf32, #tpu.memory_space<vmem>>, vector<1x32xf32>
    %583 = vector.broadcast %582 : vector<1x32xf32> to vector<8x32xf32>
    %584 = arith.addf %581, %583 : vector<8x32xf32>
    %cst_210 = arith.constant 0.000000e+00 : f32
    %585 = vector.broadcast %cst_210 : f32 to vector<8x32xf32>
    %586 = arith.subf %585, %584 : vector<8x32xf32>
    %587 = math.exp %586 : vector<8x32xf32>
    %cst_211 = arith.constant 1.000000e+00 : f32
    %588 = vector.broadcast %cst_211 : f32 to vector<8x32xf32>
    %589 = arith.addf %588, %587 : vector<8x32xf32>
    %cst_212 = arith.constant 1.000000e+00 : f32
    %590 = vector.broadcast %cst_212 : f32 to vector<8x32xf32>
    %591 = arith.divf %590, %589 : vector<8x32xf32>
    %592 = arith.mulf %584, %591 : vector<8x32xf32>
    %593 = arith.truncf %592 : vector<8x32xf32> to vector<8x32xbf16>
    %c0_213 = arith.constant 0 : index
    %c0_214 = arith.constant 0 : index
    %594 = vector.load %arg6[%c0_213, %c0_214] : memref<32x3xbf16, #tpu.memory_space<vmem>>, vector<32x3xbf16>
    %cst_215 = arith.constant dense<0.000000e+00> : vector<8x3xf32>
    %595 = tpu.matmul %593, %594, %cst_215 {dimension_numbers = #tpu.dot_dimension_numbers<[1], [0], [0], [1], [0, 0, 1, 1], [], []>} : vector<8x32xbf16>, vector<32x3xbf16>, vector<8x3xf32> -> vector<8x3xf32>
    %c8 = arith.constant 8 : index
    %c0_216 = arith.constant 0 : index
    %596 = vector.load %arg7[%c8, %c0_216] : memref<9x256xf32, #tpu.memory_space<vmem>>, vector<1x3xf32>
    %597 = vector.broadcast %596 : vector<1x3xf32> to vector<8x3xf32>
    %598 = arith.addf %595, %597 : vector<8x3xf32>
    %c0_217 = arith.constant 0 : index
    %c0_218 = arith.constant 0 : index
    %599 = vector.load %arg8[%c0_217, %c0_218] : memref<8x3xf32, #tpu.memory_space<vmem>>, vector<8x3xf32>
    tpu.vector_store %arg8[%c0_217, %c0_218], %598 {strides = array<i32>} : memref<8x3xf32, #tpu.memory_space<vmem>>, vector<8x3xf32>,
    return
  }
}

</mosaic_0001>

<bundles_post_ra>
// kernel: tpu_custom_call.1
= control target key start
LH: loop header
LB: loop body
LE: loop exit
PB: predicated region body
PF: predicated region fallthrough
CT: control target
= control target key end

     0   :  { %13 = vsyncpa [#allocation4], 0  ;;  %s11629_s0 = inlined_call_operand.hbm [shape: f32[8,8,10], index: 0, kind: input, shape index: {}]   ;;  %s11630_s1 = inlined_call_operand.hbm [shape: bf16[10,256], index: 1, kind: input, shape index: {}]   ;;  %s11631_s2 = inlined_call_operand.vmem [shape: bf16[128,512], index: 2, kind: input, shape index: {}]   ;;  %s11632_s3 = inlined_call_operand.vmem [shape: bf16[8,64,16], index: 3, kind: input, shape index: {}]   ;;  %s11633_s4 = inlined_call_operand.vmem [shape: bf16[4,64,64], index: 4, kind: input, shape index: {}]   ;;  %s11634_s5 = inlined_call_operand.vmem [shape: bf16[64,32], index: 5, kind: input, shape index: {}]   ;;  %s11635_s6 = inlined_call_operand.vmem [shape: bf16[32,3], index: 6, kind: input, shape index: {}]   ;;  %s11636_s7 = inlined_call_operand.hbm [shape: f32[9,256], index: 7, kind: input, shape index: {}]   ;;  %s11637_s8 = inlined_call_operand.vmem [shape: f32[8,3], index: 8, kind: output, shape index: {}]  }
   0x1   :  { %14 = vsyncpa [#allocation6], 0  ;;  %s9318_s27 = smov [#allocation5]   ;;  %s9319_s29 = smov [#allocation3]  }
   0x2   :  { %s32_s28 = sshll.u32 %s9318_s27, 4  ;;  %s20_s30 = sshll.u32 %s9319_s29, 4  ;;  %s33_s28 = int_to_ptr.vmem [resolvable:$true] %s32_s28  ;;  %s9375_s30 = int_to_ptr.vmem [resolvable:$true] %s20_s30 }
   0x3   :  { %s9248_s11 = scalar_lea.hbm %s11630_s1, 256 }
   0x4   :  { %p9249_p0 = scmp.ne.s32.totalorder %s11630_s1, %s9248_s11  ;;  %p9252_p1 = scmp.lt.u32.totalorder %s9248_s11, %s11630_s1 }
   0x6   :  { %p9254_p2 = pnand %p9252_p1, %p9249_p0 }
   0x8   :  { %9257 = shalt.err (!%p9254_p2)
}
   0x9   :  { %s9258_s16 = scalar_lea.vmem %s33_s28, 256  ;;  %p9263_p4 = scmp.lt.s32.totalorder %s33_s28, %s33_s28 }
   0xa   :  { %p9259_p3 = scmp.ne.s32.totalorder %s33_s28, %s9258_s16  ;;  %p9264_p5 = scmp.lt.s32.totalorder %s9258_s16, %s9258_s16 }
   0xc   :  { %p9265_p6 = por %p9264_p5, %p9263_p4 }
   0xe   :  { %p9266_p7 = pnand %p9265_p6, %p9259_p3 }
  0x10   :  { %9269 = shalt.err (!%p9266_p7)
}
  0x11   :  { %s9320_s17 = smov 128   ;;  %s9321_s18 = smov 8  }
  0x12   :  { %38 = dma.hbm_to_vmem [thread:$0]  %s11630_s1, 256, %s33_s28, [#allocation6], %s9320_s17, %s9320_s17, %s9321_s18  }
  0x13   :  { %s9270_s23 = scalar_lea.hbm %s11629_s0, 1024 }
  0x14   :  { %p9271_p8 = scmp.ne.s32.totalorder %s11629_s0, %s9270_s23  ;;  %p9274_p9 = scmp.lt.u32.totalorder %s9270_s23, %s11629_s0 }
  0x16   :  { %p9276_p10 = pnand %p9274_p9, %p9271_p8 }
  0x18   :  { %9279 = shalt.err (!%p9276_p10)
}
  0x19   :  { %s9280_s29 = scalar_lea.vmem %s9375_s30, 1024  ;;  %p9285_p12 = scmp.lt.s32.totalorder %s9375_s30, %s9375_s30 }
  0x1a   :  { %p9281_p11 = scmp.ne.s32.totalorder %s9375_s30, %s9280_s29  ;;  %p9286_p13 = scmp.lt.s32.totalorder %s9280_s29, %s9280_s29 }
  0x1c   :  { %p9287_p0 = por %p9286_p13, %p9285_p12 }
  0x1e   :  { %p9288_p1 = pnand %p9287_p0, %p9281_p11 }
  0x20   :  { %9291 = shalt.err (!%p9288_p1)
}
  0x21   :  { %26 = dma.hbm_to_vmem [thread:$0]  %s11629_s0, 1024, %s9375_s30, [#allocation4], %s9320_s17, %s9320_s17, %s9321_s18  }
  0x22   :  { %s9322_s9 = smov [#allocation7]   ;;  %s9292_s13 = scalar_lea.hbm %s11636_s7, 512 }
  0x23   :  { %s54_s10 = sshll.u32 %s9322_s9, 4  ;;  %p9293_p2 = scmp.ne.s32.totalorder %s11636_s7, %s9292_s13  ;;  %s55_s10 = int_to_ptr.vmem [resolvable:$true] %s54_s10 }
  0x24   :  { %p9296_p3 = scmp.lt.u32.totalorder %s9292_s13, %s11636_s7 }
  0x26   :  { %p9298_p4 = pnand %p9296_p3, %p9293_p2 }
  0x28   :  { %9301 = shalt.err (!%p9298_p4)
}
  0x29   :  { %s9302_s20 = scalar_lea.vmem %s55_s10, 512  ;;  %p9307_p6 = scmp.lt.s32.totalorder %s55_s10, %s55_s10 }
  0x2a   :  { %p9303_p5 = scmp.ne.s32.totalorder %s55_s10, %s9302_s20  ;;  %p9308_p7 = scmp.lt.s32.totalorder %s9302_s20, %s9302_s20 }
  0x2c   :  { %p9309_p8 = por %p9308_p7, %p9307_p6 }
  0x2e   :  { %p9310_p9 = pnand %p9309_p8, %p9303_p5 }
  0x30   :  { %9313 = shalt.err (!%p9310_p9)
}
  0x31   :  { %s9323_s0 = smov 256   ;;  %s9324_s30 = smov 16  }
  0x32   :  { %60 = dma.hbm_to_vmem [thread:$0]  %s11636_s7, 512, %s55_s10, [#allocation6], %s9323_s0, %s9323_s0, %s9324_s30  }
  0x33   :  { %9314 = dma.done.wait [#allocation4], 1024  }
  0x34   :  { %9315 = vsyncadd [#allocation4], 4294966272 }
  0x35   :  { %9316 = dma.done.wait [#allocation6], 768  }
  0x36   :  { %9317 = vsyncadd [#allocation6], 4294966528  ;;  %v11638_v0 = vmov 0   ;;  %vm144_vm0 = vcmask 1044480   ;;  %v74_v3 = vld [vmem:[#allocation3] sm:$0xff]  ;;  %v75_v4 = vld [vmem:[#allocation3 + $0x8] sm:$0xff]  ;;  %v93_v7 = vlaneseq }
  0x37   :  { %183 = vmatprep.mubr.bf16.mxu0 %v11638_v0  ;;  %478 = vmatprep.mubr.bf16.mxu1 %v11638_v0  ;;  %v8795_v1 = vld [vmem:[#allocation5 + $0x4] ss:$8 sps:$4 sm:$0x1f]   ;;  %v8797_v2 = vld [vmem:[#allocation5] ss:$8 sps:$4 sm:$0x1f]   ;;  %v7951_v6 = vpack.c.bf16 %v75_v4, %v74_v3 }
  0x38   :  { %7628 = vmatprep.subr.msk.bf16.mxu0 %vm144_vm0, %v8795_v1  ;;  %v146_v5 = vsel %vm144_vm0, %v8797_v2, 0  ;;  %vm131_vm1 = vcmask 80896   ;;  %v9422_v8 = vshrl.u32 %v93_v7, 7  ;;  %v71_v10 = vld [vmem:[#allocation7] ss:$8 sm:$0x3] }
  0x39   :  { %152 = vmatpush1.bf16.msra.mxu0 %v146_v5  ;;  %s9326_s7 = smov 64   ;;  %v9451_v33 = vld [vmem:[%s11631_s2 + $0x4] ss:$16 sps:$4 sm:$0xff]   ;;  %v9456_v34 = vld [vmem:[%s11631_s2 + $0xc] ss:$16 sps:$4 sm:$0xff]   ;;  %vm283_vm2 = vcmask 523264  }
  0x3a   :  { %11645 = vst [vmem:[#allocation10_spill] sm:$0xff] %v9422_v8  ;;  %v9425_v9 = vsub.s32 0, %v9422_v8  ;;  %v99_v11 = vsub.s32 1, %v9422_v8  ;;  %v9461_v35 = vld [vmem:[%s11631_s2] ss:$16 sps:$4 sm:$0xff]   ;;  %446 = vmatprep.subr.bf16.mxu1 %v9451_v33  ;;  %487 = vmatprep.subr.bf16.mxu0 %v9456_v34  ;;  %v77_v42 = vld [vmem:[#allocation3 + $0x18] sm:$0xff]  ;;  %vm7666_vm3 = vmpackc.low %vm283_vm2, %vm283_vm2 }
  0x3b   :  { %v9466_v36 = vld [vmem:[%s11631_s2 + $0x8] ss:$16 sps:$4 sm:$0xff]   ;;  %v9471_v37 = vld [vmem:[%s11631_s2 + $0x24] ss:$16 sps:$4 sm:$0xff]   ;;  %v9476_v38 = vld [vmem:[%s11631_s2 + $0x2c] ss:$16 sps:$4 sm:$0xff]   ;;  %447 = vmatpush1.bf16.msra.mxu1 %v9461_v35 }
  0x3c   :  { %7629 = vmatmul.mubr.msk.bf16.vlgmr.msra.gmra.mrb[0].mxu0 %vm131_vm1, %v7951_v6  ;;  %11646 = vst [vmem:[#allocation11_spill] sm:$0xff] %v9425_v9  ;;  %v9429_v12 = vrot.slane %v71_v10, %v9425_v9  ;;  %v9433_v13 = vrot.slane %v71_v10, %v99_v11  ;;  %v76_v39 = vld [vmem:[#allocation3 + $0x10] sm:$0xff]  ;;  %v9490_v41 = vld [vmem:[%s11631_s2 + $0x28] ss:$16 sps:$4 sm:$0xff]   ;;  %448 = vmatprep.subr.bf16.mxu1 %v9471_v37  ;;  %v9502_v45 = vld [vmem:[%s11631_s2 + $0x4c] ss:$16 sps:$4 sm:$0xff]  }
  0x3d   :  { %193 = vmatprep.mubr.bf16.mxu0 %v11638_v0  ;;  %488 = vmatpush1.bf16.msra.mxu0 %v9466_v36  ;;  %v9485_v40 = vld [vmem:[%s11631_s2 + $0x20] ss:$16 sps:$4 sm:$0xff]   ;;  %v7952_v43 = vpack.c.bf16 %v77_v42, %v76_v39  ;;  %v9497_v44 = vld [vmem:[%s11631_s2 + $0x44] ss:$16 sps:$4 sm:$0xff]   ;;  %v9515_v47 = vld [vmem:[%s11631_s2 + $0x48] ss:$16 sps:$4 sm:$0xff]  }
  0x3e   :  { %489 = vmatprep.subr.bf16.mxu0 %v9476_v38  ;;  %v9508_v46 = vld [vmem:[%s11631_s2 + $0x40] ss:$16 sps:$4 sm:$0xff]   ;;  %v79_v49 = vld [vmem:[#allocation3 + $0x28] sm:$0xff]  ;;  %v9522_v50 = vld [vmem:[%s11631_s2 + $0x64] ss:$16 sps:$4 sm:$0xff]   ;;  %vm670_vm4 = vcmask 516096  }
  0x3f   :  { %449 = vmatpush1.bf16.msra.mxu1 %v9485_v40  ;;  %v78_v48 = vld [vmem:[#allocation3 + $0x20] sm:$0xff]  ;;  %v9527_v51 = vld [vmem:[%s11631_s2 + $0x6c] ss:$16 sps:$4 sm:$0xff]   ;;  %v9540_v54 = vld [vmem:[%s11631_s2 + $0x68] ss:$16 sps:$4 sm:$0xff]   ;;  %vm9329_vm5 = vmmov 0  }
  0x40   :  { %450 = vmatprep.subr.bf16.mxu1 %v9497_v44  ;;  %v7953_v52 = vpack.c.bf16 %v79_v49, %v78_v48  ;;  %v9535_v53 = vld [vmem:[%s11631_s2 + $0x60] ss:$16 sps:$4 sm:$0xff]   ;;  %v9547_v55 = vld [vmem:[%s11631_s2 + $0x84] ss:$16 sps:$4 sm:$0xff]   ;;  %v9552_v56 = vld [vmem:[%s11631_s2 + $0x8c] ss:$16 sps:$4 sm:$0xff]  }
  0x41   :  { %490 = vmatpush1.bf16.msra.mxu0 %v9490_v41  ;;  %v9558_v57 = vld [vmem:[%s11631_s2 + $0x80] ss:$16 sps:$4 sm:$0xff]   ;;  %v9565_v58 = vld [vmem:[%s11631_s2 + $0x88] ss:$16 sps:$4 sm:$0xff]   ;;  %v9572_v61 = vld [vmem:[%s11631_s2 + $0xa4] ss:$16 sps:$4 sm:$0xff]  }
  0x42   :  { %491 = vmatprep.subr.bf16.mxu0 %v9502_v45  ;;  %v80_v59 = vld [vmem:[#allocation3 + $0x30] sm:$0xff]  ;;  %v81_v60 = vld [vmem:[#allocation3 + $0x38] sm:$0xff]  ;;  %vm2732_vm6 = vcmask 130048   ;;  %vm3101_vm7 = vcmask 64512   ;;  %vm3371_vm8 = vcmask 1043456   ;;  %vm7457_vm9 = vcmask 1041409  }
  0x43   :  { %451 = vmatpush1.bf16.msra.mxu1 %v9508_v46  ;;  %v9577_v62 = vld [vmem:[%s11631_s2 + $0xac] ss:$16 sps:$4 sm:$0xff]   ;;  %v7954_v63 = vpack.c.bf16 %v81_v60, %v80_v59  ;;  %v9585_v1 = vld [vmem:[%s11631_s2 + $0xa0] ss:$16 sps:$4 sm:$0xff]   ;;  %v9590_v2 = vld [vmem:[%s11631_s2 + $0xa8] ss:$16 sps:$4 sm:$0xff]  }
  0x44   :  { %7630 = vmatmul.mubr.msk.bf16.gmra.mrb[4].mxu0 %vm131_vm1, %v7952_v43  ;;  %452 = vmatprep.subr.bf16.mxu1 %v9522_v50  ;;  %v9597_v3 = vld [vmem:[%s11631_s2 + $0xc4] ss:$16 sps:$4 sm:$0xff]   ;;  %v9602_v4 = vld [vmem:[%s11631_s2 + $0xcc] ss:$16 sps:$4 sm:$0xff]   ;;  %v9610_v5 = vld [vmem:[%s11631_s2 + $0xc0] ss:$16 sps:$4 sm:$0xff]  }
  0x45   :  { %203 = vmatprep.mubr.bf16.mxu0 %v11638_v0  ;;  %492 = vmatpush1.bf16.msra.mxu0 %v9515_v47  ;;  %v9615_v6 = vld [vmem:[%s11631_s2 + $0xc8] ss:$16 sps:$4 sm:$0xff]   ;;  %v9622_v7 = vld [vmem:[%s11631_s2 + $0xe4] ss:$16 sps:$4 sm:$0xff]   ;;  %v9627_v10 = vld [vmem:[%s11631_s2 + $0xec] ss:$16 sps:$4 sm:$0xff]  }
  0x46   :  { %493 = vmatprep.subr.bf16.mxu0 %v9527_v51  ;;  %v73_v49 = vld [vmem:[#allocation7 + $0x1] ss:$8 sm:$0x3]  ;;  %vm7460_vm10 = vcmask 1042434   ;;  %vm7463_vm11 = vcmask 1043459   ;;  %vm7466_vm12 = vcmask 1044484  }
  0x47   :  { %453 = vmatpush1.bf16.msra.mxu1 %v9535_v53  ;;  %v9719_v59 = vrot.slane %v73_v49, %v99_v11  ;;  %vm7469_vm13 = vcmask 1045509   ;;  %vm7472_vm14 = vcmask 1046534   ;;  %vm7475_vm15 = vcmask 1047559  }
  0x48   :  { %454 = vmatprep.subr.bf16.mxu1 %v9547_v55  ;;  %vm7570_vm0 = vcmask 261120  }
  0x49   :  { %494 = vmatpush1.bf16.msra.mxu0 %v9540_v54 }
  0x4a   :  { %495 = vmatprep.subr.bf16.mxu0 %v9552_v56 }
  0x4b   :  { %455 = vmatpush1.bf16.msra.mxu1 %v9558_v57 }
  0x4c   :  { %7631 = vmatmul.mubr.msk.bf16.gmra.mrb[8].mxu0 %vm131_vm1, %v7953_v52  ;;  %456 = vmatprep.subr.bf16.mxu1 %v9572_v61  ;;  %v9715_v52 = vrot.slane %v73_v49, %v9425_v9 }
  0x4d   :  { %213 = vmatprep.mubr.bf16.mxu0 %v11638_v0  ;;  %496 = vmatpush1.bf16.msra.mxu0 %v9565_v58 }
  0x4e   :  { %497 = vmatprep.subr.bf16.mxu0 %v9577_v62 }
  0x4f   :  { %457 = vmatpush1.bf16.msra.mxu1 %v9585_v1 }
  0x50   :  { %458 = vmatprep.subr.bf16.mxu1 %v9597_v3 }
  0x51   :  { %498 = vmatpush1.bf16.msra.mxu0 %v9590_v2 }
  0x52   :  { %499 = vmatprep.subr.bf16.mxu0 %v9602_v4 }
  0x53   :  { %459 = vmatpush1.bf16.msra.mxu1 %v9610_v5 }
  0x54   :  { %7632 = vmatmul.mubr.msk.bf16.gmra.mrb[12].mxu0 %vm131_vm1, %v7954_v63  ;;  %460 = vmatprep.subr.bf16.mxu1 %v9622_v7  ;;  %vm7614_vm1 = vcmask 23552  }
  0x55   :  { %519 = vmatprep.mubr.bf16.mxu0 %v11638_v0  ;;  %500 = vmatpush1.bf16.msra.mxu0 %v9615_v6 }
  0x56   :  { %501 = vmatprep.subr.bf16.mxu0 %v9627_v10 }
 0x10f   :  { %v185_v14 = vpop.f32.mrb[0].mxu0 }
 0x110   :  { %v186_v15 = vadd.f32 %v185_v14, %v9429_v12  ;;  %v187_v16 = vpop.f32.mrb[1].mxu0  ;;  %v9635_v14 = vld [vmem:[%s11631_s2 + $0xe0] ss:$16 sps:$4 sm:$0xff]  }
 0x111   :  { %v188_v17 = vadd.f32 %v187_v16, %v9433_v13  ;;  %v9437_v18 = vpop.f32.mrb[2].mxu0  ;;  %461 = vmatpush1.bf16.msra.mxu1 %v9635_v14 }
 0x112   :  { %v256_v19 = vsub.f32 0.0, %v186_v15  ;;  %v9439_v20 = vpop.f32.mrb[3].mxu0  ;;  %v9640_v15 = vld [vmem:[%s11631_s2 + $0xe8] ss:$16 sps:$4 sm:$0xff]   ;;  %710 = vmatprep.subr.bf16.mxu1 %v9451_v33  ;;  %v190_v60 = vadd.f32 %v9437_v18, %v9429_v12 }
 0x113   :  { %v257_v21 = vsub.f32 0.0, %v188_v17  ;;  %502 = vmatpush1.bf16.msra.mxu0 %v9640_v15  ;;  %v192_v63 = vadd.f32 %v9439_v20, %v9433_v13 }
 0x114   :  { %v258_v22 = vmul.f32 1.442695, %v256_v19  ;;  %751 = vmatprep.subr.bf16.mxu0 %v9456_v34 }
 0x115   :  { %v260_v23 = vmul.f32 1.442695, %v257_v21 }
 0x116   :  { %8924 = vpow2.f32 %v258_v22 }
 0x117   :  { %8926 = vpow2.f32 %v260_v23  ;;  %v9654_v23 = vpop.f32.mrb[4].mxu0 }
 0x120   :  { %v8925_v24 = vpop.eup %8924 }
 0x121   :  { %v8927_v25 = vpop.eup %8926  ;;  %v262_v27 = vadd.f32 1.0, %v8925_v24  ;;  %v9656_v24 = vpop.f32.mrb[5].mxu0 }
 0x122   :  { %v263_v26 = vadd.f32 1.0, %v8927_v25  ;;  %v9658_v25 = vpop.f32.mrb[6].mxu0 }
 0x124   :  { %8928 = vrcp.f32 %v263_v26  ;;  %v9660_v26 = vpop.f32.mrb[7].mxu0 }
 0x125   :  { %8930 = vrcp.f32 %v262_v27  ;;  %v9662_v27 = vpop.f32.mrb[8].mxu0 }
 0x12e   :  { %v9441_v28 = vpop.eup %8928 }
 0x12f   :  { %v268_v29 = vmul.f32 2.0, %v9441_v28  ;;  %v9444_v31 = vpop.eup %8930 }
 0x130   :  { %v270_v16 = vmul.f32 0.0, %v9444_v31 }
 0x131   :  { %v7633_v30 = vadd.f32 -1.0, %v268_v29  ;;  %v9664_v29 = vpop.f32.mrb[9].mxu0 }
 0x132   :  { %11647 = vst [vmem:[#allocation12_spill] sm:$0xff] %v9664_v29 }
 0x133   :  { %v271_v32 = vmul.f32 %v9444_v31, %v7633_v30  ;;  %v9666_v30 = vpop.f32.mrb[10].mxu0 }
 0x134   :  { %11648 = vst [vmem:[#allocation13_spill] sm:$0xff] %v9666_v30  ;;  %v9668_v31 = vpop.f32.mrb[11].mxu0 }
 0x135   :  { %273 = vrot.lane.b32.xlu0 %v271_v32, %s9326_s7  ;;  %11649 = vst [vmem:[#allocation14_spill] sm:$0xff] %v9668_v31  ;;  %v9670_v32 = vpop.f32.mrb[12].mxu0 }
 0x136   :  { %11650 = vst [vmem:[#allocation15_spill] sm:$0xff] %v9670_v32 }
 0x1a7   :  { %v274_v17 = vpop.permute.xlu0 %273 }
 0x1a8   :  { %v9649_v19 = vadd.f32 %v274_v17, %v270_v16 }
 0x1aa   :  { %8932 = vtanh.f32 %v9649_v19 }
 0x1b4   :  { %v8933_v21 = vpop.eup %8932 }
 0x1b5   :  { %v278_v22 = vmul.f32 %v8933_v21, %v9441_v28  ;;  %v9672_v28 = vpop.f32.mrb[13].mxu0 }
 0x1b6   :  { %11651 = vst [vmem:[#allocation16_spill] sm:$0xff] %v9672_v28  ;;  %v9674_v39 = vpop.f32.mrb[14].mxu0 }
 0x1b7   :  { %280 = vrot.lane.b32.xlu0 %v278_v22, %s9326_s7  ;;  %11652 = vst [vmem:[#allocation17_spill] sm:$0xff] %v9674_v39  ;;  %v9676_v42 = vpop.f32.mrb[15].mxu0 }
 0x1b8   :  { %11653 = vst [vmem:[#allocation18_spill] sm:$0xff] %v9676_v42 }
 0x229   :  { %v281_v43 = vpop.permute.xlu0 %280 }
 0x22a   :  { %v7667_v48 = vpack.c.bf16 %v281_v43, %v281_v43 }
 0x22c   :  { %7668 = vmatmul.mubr.msk.bf16.vlgmr.msra.gmra.mrb[0].mxu1 %vm7666_vm3, %v7667_v48  ;;  %7671 = vmatmul.mubr.msk.bf16.vlgmr.msra.gmra.mrb[16].mxu0 %vm7666_vm3, %v7667_v48 }
 0x22d   :  { %711 = vmatpush1.bf16.msra.mxu1 %v9461_v35  ;;  %752 = vmatpush1.bf16.msra.mxu0 %v9466_v36 }
 0x22e   :  { %712 = vmatprep.subr.bf16.mxu1 %v9471_v37  ;;  %753 = vmatprep.subr.bf16.mxu0 %v9476_v38 }
 0x22f   :  { %742 = vmatprep.mubr.bf16.mxu1 %v11638_v0  ;;  %783 = vmatprep.mubr.bf16.mxu0 %v11638_v0 }
 0x231   :  { %713 = vmatpush1.bf16.msra.mxu1 %v9485_v40  ;;  %754 = vmatpush1.bf16.msra.mxu0 %v9490_v41 }
 0x232   :  { %714 = vmatprep.subr.bf16.mxu1 %v9497_v44  ;;  %755 = vmatprep.subr.bf16.mxu0 %v9502_v45 }
 0x235   :  { %715 = vmatpush1.bf16.msra.mxu1 %v9508_v46  ;;  %756 = vmatpush1.bf16.msra.mxu0 %v9515_v47 }
 0x236   :  { %716 = vmatprep.subr.bf16.mxu1 %v9522_v50  ;;  %757 = vmatprep.subr.bf16.mxu0 %v9527_v51 }
 0x239   :  { %717 = vmatpush1.bf16.msra.mxu1 %v9535_v53  ;;  %758 = vmatpush1.bf16.msra.mxu0 %v9540_v54 }
 0x23a   :  { %718 = vmatprep.subr.bf16.mxu1 %v9547_v55  ;;  %759 = vmatprep.subr.bf16.mxu0 %v9552_v56 }
 0x23d   :  { %719 = vmatpush1.bf16.msra.mxu1 %v9558_v57  ;;  %760 = vmatpush1.bf16.msra.mxu0 %v9565_v58 }
 0x23e   :  { %720 = vmatprep.subr.bf16.mxu1 %v9572_v61  ;;  %761 = vmatprep.subr.bf16.mxu0 %v9577_v62 }
 0x241   :  { %721 = vmatpush1.bf16.msra.mxu1 %v9585_v1  ;;  %762 = vmatpush1.bf16.msra.mxu0 %v9590_v2 }
 0x242   :  { %722 = vmatprep.subr.bf16.mxu1 %v9597_v3  ;;  %763 = vmatprep.subr.bf16.mxu0 %v9602_v4 }
 0x245   :  { %723 = vmatpush1.bf16.msra.mxu1 %v9610_v5  ;;  %764 = vmatpush1.bf16.msra.mxu0 %v9615_v6 }
 0x246   :  { %724 = vmatprep.subr.bf16.mxu1 %v9622_v7  ;;  %765 = vmatprep.subr.bf16.mxu0 %v9627_v10 }
 0x249   :  { %725 = vmatpush1.bf16.msra.mxu1 %v9635_v14  ;;  %766 = vmatpush1.bf16.msra.mxu0 %v9640_v15 }
 0x24a   :  { %962 = vmatprep.subr.bf16.mxu1 %v9451_v33  ;;  %1003 = vmatprep.subr.bf16.mxu0 %v9456_v34 }
 0x2ff   :  { %v480_v16 = vpop.f32.mrb[0].mxu1  ;;  %v521_v17 = vpop.f32.mrb[16].mxu0 }
 0x300   :  { %v679_v21 = vadd.f32 %v480_v16, %v190_v60  ;;  %v539_v22 = vadd.f32 %v9715_v52, %v521_v17  ;;  %v482_v43 = vpop.f32.mrb[1].mxu1  ;;  %v523_v48 = vpop.f32.mrb[17].mxu0 }
 0x301   :  { %v680_v0 = vadd.f32 %v482_v43, %v192_v63  ;;  %v540_v9 = vadd.f32 %v9719_v59, %v523_v48  ;;  %v484_v42 = vpop.f32.mrb[2].mxu1  ;;  %v525_v8 = vpop.f32.mrb[18].mxu0 }
 0x302   :  { %v681_v11 = vsub.f32 0.0, %v679_v21  ;;  %v485_v49 = vpop.f32.mrb[3].mxu1  ;;  %v526_v39 = vpop.f32.mrb[19].mxu0  ;;  %v541_v31 = vsub.f32 0.0, %v539_v22 }
 0x303   :  { %v682_v28 = vsub.f32 0.0, %v680_v0  ;;  %v542_v18 = vsub.f32 0.0, %v540_v9 }
 0x304   :  { %v683_v32 = vmul.f32 1.442695, %v681_v11  ;;  %v543_v60 = vmul.f32 1.442695, %v541_v31 }
 0x305   :  { %v685_v20 = vmul.f32 1.442695, %v682_v28  ;;  %v545_v30 = vmul.f32 1.442695, %v542_v18 }
 0x306   :  { %8934 = vpow2.f32 %v683_v32 }
 0x307   :  { %8936 = vpow2.f32 %v685_v20 }
 0x308   :  { %8938 = vpow2.f32 %v545_v30 }
 0x309   :  { %8940 = vpow2.f32 %v543_v60 }
 0x310   :  { %v8935_v16 = vpop.eup %8934 }
 0x311   :  { %v8937_v63 = vpop.eup %8936  ;;  %v687_v8 = vadd.f32 1.0, %v8935_v16 }
 0x312   :  { %v8939_v17 = vpop.eup %8938  ;;  %v688_v43 = vadd.f32 1.0, %v8937_v63 }
 0x313   :  { %v548_v42 = vadd.f32 1.0, %v8939_v17  ;;  %v8941_v21 = vpop.eup %8940 }
 0x314   :  { %8942 = vrcp.f32 %v688_v43  ;;  %v547_v0 = vadd.f32 1.0, %v8941_v21 }
 0x315   :  { %8944 = vrcp.f32 %v548_v42 }
 0x316   :  { %8946 = vrcp.f32 %v687_v8 }
 0x317   :  { %8948 = vrcp.f32 %v547_v0 }
 0x31e   :  { %v8943_v9 = vpop.eup %8942 }
 0x31f   :  { %v8945_v28 = vpop.eup %8944  ;;  %v693_v39 = vmul.f32 2.0, %v8943_v9 }
 0x320   :  { %v553_v32 = vmul.f32 2.0, %v8945_v28  ;;  %v8947_v22 = vpop.eup %8946 }
 0x321   :  { %v7673_v31 = vadd.f32 -1.0, %v693_v39  ;;  %v8949_v11 = vpop.eup %8948  ;;  %v695_v18 = vmul.f32 %v8947_v22, %v9649_v19 }
 0x322   :  { %v7672_v48 = vadd.f32 -1.0, %v553_v32  ;;  %v555_v43 = vmul.f32 0.0, %v8949_v11  ;;  %v198_v32 = vadd.f32 %v9656_v24, %v9433_v13 }
 0x323   :  { %v696_v30 = vmul.f32 %v8947_v22, %v7673_v31 }
 0x324   :  { %v556_v49 = vmul.f32 %v8949_v11, %v7672_v48 }
 0x325   :  { %698 = vrot.lane.b32.xlu1 %v696_v30, %s9326_s7 }
 0x329   :  { %558 = vrot.lane.b32.xlu1 %v556_v49, %s9326_s7 }
 0x397   :  { %v699_v20 = vpop.permute.xlu1 %698 }
 0x398   :  { %v9730_v60 = vadd.f32 %v699_v20, %v695_v18 }
 0x39a   :  { %8950 = vtanh.f32 %v9730_v60 }
 0x39b   :  { %v559_v17 = vpop.permute.xlu1 %558 }
 0x39c   :  { %v9734_v42 = vadd.f32 %v559_v17, %v555_v43 }
 0x39e   :  { %8952 = vtanh.f32 %v9734_v42 }
 0x3a4   :  { %v8951_v16 = vpop.eup %8950 }
 0x3a5   :  { %v703_v63 = vmul.f32 %v8951_v16, %v8943_v9  ;;  %v11655_v9 = vmov 0  }
 0x3a7   :  { %705 = vrot.lane.b32.xlu0 %v703_v63, %s9326_s7 }
 0x3a8   :  { %v8953_v8 = vpop.eup %8952 }
 0x3a9   :  { %v9737_v21 = vmul.f32 %v8953_v8, %v8945_v28  ;;  %v196_v28 = vadd.f32 %v9654_v23, %v9429_v12 }
 0x3ab   :  { %11654 = vst [vmem:[#allocation19_spill] sm:$0xff] %v9737_v21 }
 0x419   :  { %v706_v0 = vpop.permute.xlu0 %705 }
 0x41a   :  { %v708_v19 = vsel %vm283_vm2, %v706_v0, %v9737_v21 }
 0x41b   :  { %v709_v39 = vpack.c.bf16 %v708_v19, %v708_v19 }
 0x41d   :  { %743 = vmatmul.mubr.bf16.vlgmr.msra.gmra.mrb[4].mxu1 %v709_v39  ;;  %784 = vmatmul.mubr.bf16.vlgmr.msra.gmra.mrb[20].mxu0 %v709_v39 }
 0x41e   :  { %963 = vmatpush1.bf16.msra.mxu1 %v9461_v35  ;;  %1004 = vmatpush1.bf16.msra.mxu0 %v9466_v36 }
 0x41f   :  { %964 = vmatprep.subr.bf16.mxu1 %v9471_v37  ;;  %1005 = vmatprep.subr.bf16.mxu0 %v9476_v38 }
 0x420   :  { %994 = vmatprep.mubr.bf16.mxu1 %v11655_v9  ;;  %1035 = vmatprep.mubr.bf16.mxu0 %v11655_v9 }
 0x422   :  { %965 = vmatpush1.bf16.msra.mxu1 %v9485_v40  ;;  %1006 = vmatpush1.bf16.msra.mxu0 %v9490_v41 }
 0x423   :  { %966 = vmatprep.subr.bf16.mxu1 %v9497_v44  ;;  %1007 = vmatprep.subr.bf16.mxu0 %v9502_v45 }
 0x426   :  { %967 = vmatpush1.bf16.msra.mxu1 %v9508_v46  ;;  %1008 = vmatpush1.bf16.msra.mxu0 %v9515_v47 }
 0x427   :  { %968 = vmatprep.subr.bf16.mxu1 %v9522_v50  ;;  %1009 = vmatprep.subr.bf16.mxu0 %v9527_v51 }
 0x42a   :  { %969 = vmatpush1.bf16.msra.mxu1 %v9535_v53  ;;  %1010 = vmatpush1.bf16.msra.mxu0 %v9540_v54 }
 0x42b   :  { %970 = vmatprep.subr.bf16.mxu1 %v9547_v55  ;;  %1011 = vmatprep.subr.bf16.mxu0 %v9552_v56 }
 0x42e   :  { %971 = vmatpush1.bf16.msra.mxu1 %v9558_v57  ;;  %1012 = vmatpush1.bf16.msra.mxu0 %v9565_v58 }
 0x42f   :  { %972 = vmatprep.subr.bf16.mxu1 %v9572_v61  ;;  %1013 = vmatprep.subr.bf16.mxu0 %v9577_v62 }
 0x432   :  { %973 = vmatpush1.bf16.msra.mxu1 %v9585_v1  ;;  %1014 = vmatpush1.bf16.msra.mxu0 %v9590_v2 }
 0x433   :  { %974 = vmatprep.subr.bf16.mxu1 %v9597_v3  ;;  %1015 = vmatprep.subr.bf16.mxu0 %v9602_v4 }
 0x436   :  { %975 = vmatpush1.bf16.msra.mxu1 %v9610_v5  ;;  %1016 = vmatpush1.bf16.msra.mxu0 %v9615_v6 }
 0x437   :  { %976 = vmatprep.subr.bf16.mxu1 %v9622_v7  ;;  %1017 = vmatprep.subr.bf16.mxu0 %v9627_v10 }
 0x43a   :  { %977 = vmatpush1.bf16.msra.mxu1 %v9635_v14  ;;  %1018 = vmatpush1.bf16.msra.mxu0 %v9640_v15 }
 0x43b   :  { %1214 = vmatprep.subr.bf16.mxu1 %v9451_v33  ;;  %1255 = vmatprep.subr.bf16.mxu0 %v9456_v34 }
 0x4f0   :  { %v744_v31 = vpop.f32.mrb[4].mxu1  ;;  %v785_v22 = vpop.f32.mrb[20].mxu0 }
 0x4f1   :  { %v931_v30 = vadd.f32 %v744_v31, %v196_v28  ;;  %v792_v48 = vadd.f32 %v785_v22, %v9715_v52  ;;  %v746_v11 = vpop.f32.mrb[5].mxu1  ;;  %v787_v49 = vpop.f32.mrb[21].mxu0 }
 0x4f2   :  { %v932_v18 = vadd.f32 %v746_v11, %v198_v32  ;;  %v793_v20 = vadd.f32 %v787_v49, %v9719_v59  ;;  %v748_v16 = vpop.f32.mrb[6].mxu1  ;;  %v789_v63 = vpop.f32.mrb[22].mxu0 }
 0x4f3   :  { %v933_v17 = vsub.f32 0.0, %v931_v30  ;;  %v794_v43 = vsub.f32 0.0, %v792_v48  ;;  %v749_v8 = vpop.f32.mrb[7].mxu1  ;;  %v790_v0 = vpop.f32.mrb[23].mxu0 }
 0x4f4   :  { %v934_v23 = vsub.f32 0.0, %v932_v18  ;;  %v795_v19 = vsub.f32 0.0, %v793_v20 }
 0x4f5   :  { %v935_v39 = vmul.f32 1.442695, %v933_v17  ;;  %v796_v24 = vmul.f32 1.442695, %v794_v43 }
 0x4f6   :  { %v937_v21 = vmul.f32 1.442695, %v934_v23  ;;  %v798_v29 = vmul.f32 1.442695, %v795_v19 }
 0x4f7   :  { %8954 = vpow2.f32 %v935_v39 }
 0x4f8   :  { %8956 = vpow2.f32 %v796_v24 }
 0x4f9   :  { %8958 = vpow2.f32 %v937_v21 }
 0x4fa   :  { %8960 = vpow2.f32 %v798_v29 }
 0x501   :  { %v8955_v28 = vpop.eup %8954 }
 0x502   :  { %v8957_v32 = vpop.eup %8956  ;;  %v939_v30 = vadd.f32 1.0, %v8955_v28 }
 0x503   :  { %v8959_v31 = vpop.eup %8958  ;;  %v800_v48 = vadd.f32 1.0, %v8957_v32 }
 0x504   :  { %v8961_v22 = vpop.eup %8960  ;;  %v940_v11 = vadd.f32 1.0, %v8959_v31 }
 0x505   :  { %v801_v49 = vadd.f32 1.0, %v8961_v22 }
 0x506   :  { %8962 = vrcp.f32 %v940_v11 }
 0x507   :  { %8964 = vrcp.f32 %v801_v49 }
 0x508   :  { %8966 = vrcp.f32 %v939_v30 }
 0x509   :  { %8968 = vrcp.f32 %v800_v48 }
 0x510   :  { %v8963_v18 = vpop.eup %8962 }
 0x511   :  { %v8965_v20 = vpop.eup %8964  ;;  %v945_v16 = vmul.f32 2.0, %v8963_v18 }
 0x512   :  { %v806_v63 = vmul.f32 2.0, %v8965_v20  ;;  %v8967_v43 = vpop.eup %8966 }
 0x513   :  { %v7675_v17 = vadd.f32 -1.0, %v945_v16  ;;  %v8969_v29 = vpop.eup %8968  ;;  %v947_v23 = vmul.f32 %v8967_v43, %v9730_v60 }
 0x514   :  { %v7674_v21 = vadd.f32 -1.0, %v806_v63  ;;  %v808_v31 = vmul.f32 %v8969_v29, %v9734_v42  ;;  %v200_v42 = vadd.f32 %v9658_v25, %v9429_v12 }
 0x515   :  { %v948_v8 = vmul.f32 %v8967_v43, %v7675_v17 }
 0x516   :  { %v809_v0 = vmul.f32 %v8969_v29, %v7674_v21 }
 0x517   :  { %950 = vrot.lane.b32.xlu1 %v948_v8, %s9326_s7 }
 0x518   :  { %811 = vrot.lane.b32.xlu0 %v809_v0, %s9326_s7 }
 0x589   :  { %v951_v19 = vpop.permute.xlu1 %950 }
 0x58a   :  { %v9784_v39 = vadd.f32 %v951_v19, %v947_v23  ;;  %v812_v32 = vpop.permute.xlu0 %811 }
 0x58b   :  { %v9789_v22 = vadd.f32 %v812_v32, %v808_v31 }
 0x58c   :  { %8970 = vtanh.f32 %v9784_v39 }
 0x58d   :  { %8972 = vtanh.f32 %v9789_v22 }
 0x596   :  { %v8971_v24 = vpop.eup %8970 }
 0x597   :  { %v955_v28 = vmul.f32 %v8971_v24, %v8963_v18  ;;  %v8973_v11 = vpop.eup %8972  ;;  %v202_v18 = vadd.f32 %v9660_v26, %v9433_v13 }
 0x598   :  { %v9792_v49 = vmul.f32 %v8973_v11, %v8965_v20 }
 0x599   :  { %957 = vrot.lane.b32.xlu1 %v955_v28, %s9326_s7 }
 0x60b   :  { %v958_v60 = vpop.permute.xlu1 %957 }
 0x60c   :  { %v960_v30 = vsel %vm283_vm2, %v958_v60, %v9792_v49 }
 0x60d   :  { %v961_v48 = vpack.c.bf16 %v960_v30, %v960_v30 }
 0x60f   :  { %995 = vmatmul.mubr.bf16.vlgmr.msra.gmra.mrb[8].mxu1 %v961_v48  ;;  %1036 = vmatmul.mubr.bf16.vlgmr.msra.gmra.mrb[24].mxu0 %v961_v48 }
 0x610   :  { %1215 = vmatpush1.bf16.msra.mxu1 %v9461_v35  ;;  %1256 = vmatpush1.bf16.msra.mxu0 %v9466_v36 }
 0x611   :  { %1216 = vmatprep.subr.bf16.mxu1 %v9471_v37  ;;  %1257 = vmatprep.subr.bf16.mxu0 %v9476_v38 }
 0x612   :  { %1246 = vmatprep.mubr.bf16.mxu1 %v11655_v9  ;;  %1287 = vmatprep.mubr.bf16.mxu0 %v11655_v9 }
 0x614   :  { %1217 = vmatpush1.bf16.msra.mxu1 %v9485_v40  ;;  %1258 = vmatpush1.bf16.msra.mxu0 %v9490_v41 }
 0x615   :  { %1218 = vmatprep.subr.bf16.mxu1 %v9497_v44  ;;  %1259 = vmatprep.subr.bf16.mxu0 %v9502_v45 }
 0x618   :  { %1219 = vmatpush1.bf16.msra.mxu1 %v9508_v46  ;;  %1260 = vmatpush1.bf16.msra.mxu0 %v9515_v47 }
 0x619   :  { %1220 = vmatprep.subr.bf16.mxu1 %v9522_v50  ;;  %1261 = vmatprep.subr.bf16.mxu0 %v9527_v51 }
 0x61c   :  { %1221 = vmatpush1.bf16.msra.mxu1 %v9535_v53  ;;  %1262 = vmatpush1.bf16.msra.mxu0 %v9540_v54 }
 0x61d   :  { %1222 = vmatprep.subr.bf16.mxu1 %v9547_v55  ;;  %1263 = vmatprep.subr.bf16.mxu0 %v9552_v56 }
 0x620   :  { %1223 = vmatpush1.bf16.msra.mxu1 %v9558_v57  ;;  %1264 = vmatpush1.bf16.msra.mxu0 %v9565_v58 }
 0x621   :  { %1224 = vmatprep.subr.bf16.mxu1 %v9572_v61  ;;  %1265 = vmatprep.subr.bf16.mxu0 %v9577_v62 }
 0x624   :  { %1225 = vmatpush1.bf16.msra.mxu1 %v9585_v1  ;;  %1266 = vmatpush1.bf16.msra.mxu0 %v9590_v2 }
 0x625   :  { %1226 = vmatprep.subr.bf16.mxu1 %v9597_v3  ;;  %1267 = vmatprep.subr.bf16.mxu0 %v9602_v4 }
 0x628   :  { %1227 = vmatpush1.bf16.msra.mxu1 %v9610_v5  ;;  %1268 = vmatpush1.bf16.msra.mxu0 %v9615_v6 }
 0x629   :  { %1228 = vmatprep.subr.bf16.mxu1 %v9622_v7  ;;  %1269 = vmatprep.subr.bf16.mxu0 %v9627_v10 }
 0x62c   :  { %1229 = vmatpush1.bf16.msra.mxu1 %v9635_v14  ;;  %1270 = vmatpush1.bf16.msra.mxu0 %v9640_v15 }
 0x62d   :  { %1466 = vmatprep.subr.bf16.mxu1 %v9451_v33  ;;  %1507 = vmatprep.subr.bf16.mxu0 %v9456_v34 }
 0x6e2   :  { %v996_v20 = vpop.f32.mrb[8].mxu1  ;;  %v1037_v16 = vpop.f32.mrb[24].mxu0 }
 0x6e3   :  { %v1183_v63 = vadd.f32 %v996_v20, %v200_v42  ;;  %v1044_v17 = vadd.f32 %v1037_v16, %v9715_v52  ;;  %v998_v43 = vpop.f32.mrb[9].mxu1  ;;  %v1039_v21 = vpop.f32.mrb[25].mxu0 }
 0x6e4   :  { %v1184_v29 = vadd.f32 %v998_v43, %v202_v18  ;;  %v1045_v8 = vadd.f32 %v1039_v21, %v9719_v59  ;;  %v1000_v0 = vpop.f32.mrb[10].mxu1  ;;  %v1041_v23 = vpop.f32.mrb[26].mxu0 }
 0x6e5   :  { %v1185_v19 = vsub.f32 0.0, %v1183_v63  ;;  %v1046_v24 = vsub.f32 0.0, %v1044_v17  ;;  %v1001_v28 = vpop.f32.mrb[11].mxu1  ;;  %v1042_v32 = vpop.f32.mrb[27].mxu0 }
 0x6e6   :  { %v1186_v25 = vsub.f32 0.0, %v1184_v29  ;;  %v1047_v31 = vsub.f32 0.0, %v1045_v8 }
 0x6e7   :  { %v1187_v11 = vmul.f32 1.442695, %v1185_v19  ;;  %v1048_v26 = vmul.f32 1.442695, %v1046_v24 }
 0x6e8   :  { %v1189_v60 = vmul.f32 1.442695, %v1186_v25  ;;  %v1050_v30 = vmul.f32 1.442695, %v1047_v31 }
 0x6e9   :  { %8974 = vpow2.f32 %v1187_v11 }
 0x6ea   :  { %8976 = vpow2.f32 %v1048_v26 }
 0x6eb   :  { %8978 = vpow2.f32 %v1189_v60 }
 0x6ec   :  { %8980 = vpow2.f32 %v1050_v30 }
 0x6f3   :  { %v8975_v48 = vpop.eup %8974 }
 0x6f4   :  { %v8977_v42 = vpop.eup %8976  ;;  %v1191_v63 = vadd.f32 1.0, %v8975_v48 }
 0x6f5   :  { %v8979_v18 = vpop.eup %8978  ;;  %v1052_v17 = vadd.f32 1.0, %v8977_v42 }
 0x6f6   :  { %v8981_v20 = vpop.eup %8980  ;;  %v1192_v16 = vadd.f32 1.0, %v8979_v18 }
 0x6f7   :  { %v1053_v43 = vadd.f32 1.0, %v8981_v20 }
 0x6f8   :  { %8982 = vrcp.f32 %v1192_v16 }
 0x6f9   :  { %8984 = vrcp.f32 %v1053_v43 }
 0x6fa   :  { %8986 = vrcp.f32 %v1191_v63 }
 0x6fb   :  { %8988 = vrcp.f32 %v1052_v17 }
 0x702   :  { %v8983_v21 = vpop.eup %8982 }
 0x703   :  { %v8985_v29 = vpop.eup %8984  ;;  %v1197_v8 = vmul.f32 2.0, %v8983_v21 }
 0x704   :  { %v1058_v0 = vmul.f32 2.0, %v8985_v29  ;;  %v8987_v19 = vpop.eup %8986 }
 0x705   :  { %v7677_v23 = vadd.f32 -1.0, %v1197_v8  ;;  %v8989_v28 = vpop.eup %8988  ;;  %v1199_v31 = vmul.f32 %v8987_v19, %v9784_v39 }
 0x706   :  { %v7676_v24 = vadd.f32 -1.0, %v1058_v0  ;;  %v1060_v42 = vmul.f32 %v8989_v28, %v9789_v22 }
 0x707   :  { %v1200_v32 = vmul.f32 %v8987_v19, %v7677_v23 }
 0x708   :  { %v1061_v25 = vmul.f32 %v8989_v28, %v7676_v24 }
 0x709   :  { %1202 = vrot.lane.b32.xlu0 %v1200_v32, %s9326_s7 }
 0x70a   :  { %1063 = vrot.lane.b32.xlu1 %v1061_v25, %s9326_s7 }
 0x77b   :  { %v1203_v11 = vpop.permute.xlu0 %1202 }
 0x77c   :  { %v9839_v26 = vadd.f32 %v1203_v11, %v1199_v31  ;;  %v1064_v48 = vpop.permute.xlu1 %1063 }
 0x77d   :  { %v9844_v18 = vadd.f32 %v1064_v48, %v1060_v42 }
 0x77e   :  { %8990 = vtanh.f32 %v9839_v26 }
 0x77f   :  { %8992 = vtanh.f32 %v9844_v18 }
 0x788   :  { %v8991_v60 = vpop.eup %8990 }
 0x789   :  { %v1207_v30 = vmul.f32 %v8991_v60, %v8983_v21  ;;  %v8993_v20 = vpop.eup %8992 }
 0x78a   :  { %v9847_v16 = vmul.f32 %v8993_v20, %v8985_v29 }
 0x78b   :  { %1209 = vrot.lane.b32.xlu0 %v1207_v30, %s9326_s7 }
 0x7fd   :  { %v1210_v39 = vpop.permute.xlu0 %1209 }
 0x7fe   :  { %v1212_v43 = vsel %vm283_vm2, %v1210_v39, %v9847_v16 }
 0x7ff   :  { %v1213_v63 = vpack.c.bf16 %v1212_v43, %v1212_v43 }
 0x801   :  { %1247 = vmatmul.mubr.bf16.vlgmr.msra.gmra.mrb[12].mxu1 %v1213_v63  ;;  %1288 = vmatmul.mubr.bf16.vlgmr.msra.gmra.mrb[28].mxu0 %v1213_v63 }
 0x802   :  { %1467 = vmatpush1.bf16.msra.mxu1 %v9461_v35  ;;  %1508 = vmatpush1.bf16.msra.mxu0 %v9466_v36  ;;  %v206_v35 = vadd.f32 %v9662_v27, %v9429_v12  ;;  %v11656_v36 = vld [vmem:[#allocation12_spill] sm:$0xff] }
 0x803   :  { %1468 = vmatprep.subr.bf16.mxu1 %v9471_v37  ;;  %1509 = vmatprep.subr.bf16.mxu0 %v9476_v38  ;;  %v208_v37 = vadd.f32 %v11656_v36, %v9433_v13 }
 0x804   :  { %1498 = vmatprep.mubr.bf16.mxu1 %v11655_v9  ;;  %1539 = vmatprep.mubr.bf16.mxu0 %v11655_v9 }
 0x806   :  { %1469 = vmatpush1.bf16.msra.mxu1 %v9485_v40  ;;  %1510 = vmatpush1.bf16.msra.mxu0 %v9490_v41 }
 0x807   :  { %1470 = vmatprep.subr.bf16.mxu1 %v9497_v44  ;;  %1511 = vmatprep.subr.bf16.mxu0 %v9502_v45 }
 0x80a   :  { %1471 = vmatpush1.bf16.msra.mxu1 %v9508_v46  ;;  %1512 = vmatpush1.bf16.msra.mxu0 %v9515_v47 }
 0x80b   :  { %1472 = vmatprep.subr.bf16.mxu1 %v9522_v50  ;;  %1513 = vmatprep.subr.bf16.mxu0 %v9527_v51 }
 0x80e   :  { %1473 = vmatpush1.bf16.msra.mxu1 %v9535_v53  ;;  %1514 = vmatpush1.bf16.msra.mxu0 %v9540_v54 }
 0x80f   :  { %1474 = vmatprep.subr.bf16.mxu1 %v9547_v55  ;;  %1515 = vmatprep.subr.bf16.mxu0 %v9552_v56 }
 0x812   :  { %1475 = vmatpush1.bf16.msra.mxu1 %v9558_v57  ;;  %1516 = vmatpush1.bf16.msra.mxu0 %v9565_v58 }
 0x813   :  { %1476 = vmatprep.subr.bf16.mxu1 %v9572_v61  ;;  %1517 = vmatprep.subr.bf16.mxu0 %v9577_v62 }
 0x816   :  { %1477 = vmatpush1.bf16.msra.mxu1 %v9585_v1  ;;  %1518 = vmatpush1.bf16.msra.mxu0 %v9590_v2 }
 0x817   :  { %1478 = vmatprep.subr.bf16.mxu1 %v9597_v3  ;;  %1519 = vmatprep.subr.bf16.mxu0 %v9602_v4 }
 0x81a   :  { %1479 = vmatpush1.bf16.msra.mxu1 %v9610_v5  ;;  %1520 = vmatpush1.bf16.msra.mxu0 %v9615_v6 }
 0x81b   :  { %1480 = vmatprep.subr.bf16.mxu1 %v9622_v7  ;;  %1521 = vmatprep.subr.bf16.mxu0 %v9627_v10 }
 0x81e   :  { %1481 = vmatpush1.bf16.msra.mxu1 %v9635_v14  ;;  %1522 = vmatpush1.bf16.msra.mxu0 %v9640_v15 }
 0x81f   :  { %1718 = vmatprep.subr.bf16.mxu1 %v9451_v33  ;;  %1759 = vmatprep.subr.bf16.mxu0 %v9456_v34 }
 0x8d4   :  { %v1248_v38 = vpop.f32.mrb[12].mxu1  ;;  %v1289_v40 = vpop.f32.mrb[28].mxu0 }
 0x8d5   :  { %v1435_v41 = vadd.f32 %v1248_v38, %v206_v35  ;;  %v1296_v22 = vadd.f32 %v1289_v40, %v9715_v52  ;;  %v1250_v17 = vpop.f32.mrb[13].mxu1  ;;  %v1291_v21 = vpop.f32.mrb[29].mxu0 }
 0x8d6   :  { %v1436_v29 = vadd.f32 %v1250_v17, %v208_v37  ;;  %v1297_v8 = vadd.f32 %v1291_v21, %v9719_v59  ;;  %v1252_v0 = vpop.f32.mrb[14].mxu1  ;;  %v1293_v33 = vpop.f32.mrb[30].mxu0 }
 0x8d7   :  { %v1437_v23 = vsub.f32 0.0, %v1435_v41  ;;  %v1298_v34 = vsub.f32 0.0, %v1296_v22  ;;  %v1253_v19 = vpop.f32.mrb[15].mxu1  ;;  %v1294_v24 = vpop.f32.mrb[31].mxu0 }
 0x8d8   :  { %v1438_v27 = vsub.f32 0.0, %v1436_v29  ;;  %v1299_v28 = vsub.f32 0.0, %v1297_v8 }
 0x8d9   :  { %v1439_v32 = vmul.f32 1.442695, %v1437_v23  ;;  %v1300_v25 = vmul.f32 1.442695, %v1298_v34 }
 0x8da   :  { %v1441_v31 = vmul.f32 1.442695, %v1438_v27  ;;  %v1302_v11 = vmul.f32 1.442695, %v1299_v28 }
 0x8db   :  { %8994 = vpow2.f32 %v1439_v32 }
 0x8dc   :  { %8996 = vpow2.f32 %v1300_v25 }
 0x8dd   :  { %8998 = vpow2.f32 %v1441_v31 }
 0x8de   :  { %9000 = vpow2.f32 %v1302_v11  ;;  %v9909_v11 = vld [vmem:[%s11631_s2] ss:$16 sps:$4 sm:$0xff]  }
 0x8e5   :  { %v8995_v60 = vpop.eup %8994 }
 0x8e6   :  { %v8997_v30 = vpop.eup %8996  ;;  %v1443_v43 = vadd.f32 1.0, %v8995_v60  ;;  %v9921_v60 = vld [vmem:[%s11631_s2 + $0x24] ss:$16 sps:$4 sm:$0xff]  }
 0x8e7   :  { %v8999_v48 = vpop.eup %8998  ;;  %v1304_v63 = vadd.f32 1.0, %v8997_v30  ;;  %v9927_v30 = vld [vmem:[%s11631_s2 + $0x2c] ss:$16 sps:$4 sm:$0xff]  }
 0x8e8   :  { %v9001_v42 = vpop.eup %9000  ;;  %v1444_v20 = vadd.f32 1.0, %v8999_v48  ;;  %v9935_v48 = vld [vmem:[%s11631_s2 + $0x20] ss:$16 sps:$4 sm:$0xff]  }
 0x8e9   :  { %v1305_v39 = vadd.f32 1.0, %v9001_v42  ;;  %v9941_v42 = vld [vmem:[%s11631_s2 + $0x28] ss:$16 sps:$4 sm:$0xff]  }
 0x8ea   :  { %9002 = vrcp.f32 %v1444_v20 }
 0x8eb   :  { %9004 = vrcp.f32 %v1305_v39 }
 0x8ec   :  { %9006 = vrcp.f32 %v1443_v43 }
 0x8ed   :  { %9008 = vrcp.f32 %v1304_v63 }
 0x8f4   :  { %v9003_v35 = vpop.eup %9002 }
 0x8f5   :  { %v9005_v36 = vpop.eup %9004  ;;  %v1449_v37 = vmul.f32 2.0, %v9003_v35 }
 0x8f6   :  { %v1310_v38 = vmul.f32 2.0, %v9005_v36  ;;  %v9007_v41 = vpop.eup %9006 }
 0x8f7   :  { %v7679_v40 = vadd.f32 -1.0, %v1449_v37  ;;  %v9009_v17 = vpop.eup %9008  ;;  %v1451_v8 = vmul.f32 %v9007_v41, %v9839_v26 }
 0x8f8   :  { %v7678_v22 = vadd.f32 -1.0, %v1310_v38  ;;  %v1312_v24 = vmul.f32 %v9009_v17, %v9844_v18  ;;  %v9915_v18 = vld [vmem:[%s11631_s2 + $0x8] ss:$16 sps:$4 sm:$0xff]  }
 0x8f9   :  { %v1452_v21 = vmul.f32 %v9007_v41, %v7679_v40 }
 0x8fa   :  { %v1313_v29 = vmul.f32 %v9009_v17, %v7678_v22 }
 0x8fb   :  { %1454 = vrot.lane.b32.xlu1 %v1452_v21, %s9326_s7 }
 0x8fc   :  { %1315 = vrot.lane.b32.xlu0 %v1313_v29, %s9326_s7 }
 0x96d   :  { %v1455_v0 = vpop.permute.xlu1 %1454 }
 0x96e   :  { %v9894_v33 = vadd.f32 %v1455_v0, %v1451_v8  ;;  %v1316_v19 = vpop.permute.xlu0 %1315 }
 0x96f   :  { %v9899_v27 = vadd.f32 %v1316_v19, %v1312_v24 }
 0x970   :  { %9010 = vtanh.f32 %v9894_v33 }
 0x971   :  { %9012 = vtanh.f32 %v9899_v27 }
 0x97a   :  { %v9011_v23 = vpop.eup %9010 }
 0x97b   :  { %v1459_v34 = vmul.f32 %v9011_v23, %v9003_v35  ;;  %v9013_v28 = vpop.eup %9012 }
 0x97c   :  { %v9902_v32 = vmul.f32 %v9013_v28, %v9005_v36 }
 0x97d   :  { %1461 = vrot.lane.b32.xlu1 %v1459_v34, %s9326_s7 }
 0x9ef   :  { %v1462_v26 = vpop.permute.xlu1 %1461 }
 0x9f0   :  { %v1464_v25 = vsel %vm283_vm2, %v1462_v26, %v9902_v32 }
 0x9f1   :  { %v1465_v31 = vpack.c.bf16 %v1464_v25, %v1464_v25 }
 0x9f3   :  { %1499 = vmatmul.mubr.bf16.vlgmr.msra.gmra.mrb[16].mxu1 %v1465_v31  ;;  %1540 = vmatmul.mubr.bf16.vlgmr.msra.gmra.mrb[32].mxu0 %v1465_v31 }
 0x9f4   :  { %1719 = vmatpush1.bf16.msra.mxu1 %v9909_v11  ;;  %1760 = vmatpush1.bf16.msra.mxu0 %v9915_v18 }
 0x9f5   :  { %1720 = vmatprep.subr.bf16.mxu1 %v9921_v60  ;;  %1761 = vmatprep.subr.bf16.mxu0 %v9927_v30 }
 0x9f6   :  { %1750 = vmatprep.mubr.bf16.mxu1 %v11655_v9  ;;  %1791 = vmatprep.mubr.bf16.mxu0 %v11655_v9 }
 0x9f8   :  { %1721 = vmatpush1.bf16.msra.mxu1 %v9935_v48  ;;  %1762 = vmatpush1.bf16.msra.mxu0 %v9941_v42 }
 0x9f9   :  { %1722 = vmatprep.subr.bf16.mxu1 %v9497_v44  ;;  %1763 = vmatprep.subr.bf16.mxu0 %v9502_v45  ;;  %v9222_v44 = vld [vmem:[%s11631_s2 + $0x4] ss:$16 sps:$4 sm:$0xff]   ;;  %v9223_v45 = vld [vmem:[%s11631_s2 + $0xc] ss:$16 sps:$4 sm:$0xff]  }
 0x9fc   :  { %1723 = vmatpush1.bf16.msra.mxu1 %v9508_v46  ;;  %1764 = vmatpush1.bf16.msra.mxu0 %v9515_v47  ;;  %v11657_v46 = vld [vmem:[#allocation13_spill] sm:$0xff] }
 0x9fd   :  { %1724 = vmatprep.subr.bf16.mxu1 %v9522_v50  ;;  %1765 = vmatprep.subr.bf16.mxu0 %v9527_v51  ;;  %v210_v47 = vadd.f32 %v11657_v46, %v9429_v12  ;;  %v11658_v50 = vld [vmem:[#allocation14_spill] sm:$0xff] }
 0x9fe   :  { %v212_v51 = vadd.f32 %v11658_v50, %v9433_v13 }
 0xa00   :  { %1725 = vmatpush1.bf16.msra.mxu1 %v9535_v53  ;;  %1766 = vmatpush1.bf16.msra.mxu0 %v9540_v54 }
 0xa01   :  { %1726 = vmatprep.subr.bf16.mxu1 %v9547_v55  ;;  %1767 = vmatprep.subr.bf16.mxu0 %v9552_v56 }
 0xa04   :  { %1727 = vmatpush1.bf16.msra.mxu1 %v9558_v57  ;;  %1768 = vmatpush1.bf16.msra.mxu0 %v9565_v58 }
 0xa05   :  { %1728 = vmatprep.subr.bf16.mxu1 %v9572_v61  ;;  %1769 = vmatprep.subr.bf16.mxu0 %v9577_v62 }
 0xa08   :  { %1729 = vmatpush1.bf16.msra.mxu1 %v9585_v1  ;;  %1770 = vmatpush1.bf16.msra.mxu0 %v9590_v2 }
 0xa09   :  { %1730 = vmatprep.subr.bf16.mxu1 %v9597_v3  ;;  %1771 = vmatprep.subr.bf16.mxu0 %v9602_v4 }
 0xa0c   :  { %1731 = vmatpush1.bf16.msra.mxu1 %v9610_v5  ;;  %1772 = vmatpush1.bf16.msra.mxu0 %v9615_v6 }
 0xa0d   :  { %1732 = vmatprep.subr.bf16.mxu1 %v9622_v7  ;;  %1773 = vmatprep.subr.bf16.mxu0 %v9627_v10 }
 0xa10   :  { %1733 = vmatpush1.bf16.msra.mxu1 %v9635_v14  ;;  %1774 = vmatpush1.bf16.msra.mxu0 %v9640_v15 }
 0xa11   :  { %1970 = vmatprep.subr.bf16.mxu1 %v9222_v44  ;;  %2011 = vmatprep.subr.bf16.mxu0 %v9223_v45 }
 0xac6   :  { %v1500_v53 = vpop.f32.mrb[16].mxu1  ;;  %v1541_v54 = vpop.f32.mrb[32].mxu0 }
 0xac7   :  { %v1687_v55 = vadd.f32 %v1500_v53, %v210_v47  ;;  %v1548_v56 = vadd.f32 %v1541_v54, %v9715_v52  ;;  %v1502_v57 = vpop.f32.mrb[17].mxu1  ;;  %v1543_v58 = vpop.f32.mrb[33].mxu0 }
 0xac8   :  { %v1688_v61 = vadd.f32 %v1502_v57, %v212_v51  ;;  %v1549_v62 = vadd.f32 %v1543_v58, %v9719_v59  ;;  %v1504_v1 = vpop.f32.mrb[18].mxu1  ;;  %v1545_v2 = vpop.f32.mrb[34].mxu0  ;;  %v9233_v57 = vld [vmem:[%s11631_s2 + $0x8c] ss:$16 sps:$4 sm:$0xff]   ;;  %v9234_v58 = vld [vmem:[%s11631_s2 + $0x80] ss:$16 sps:$4 sm:$0xff]  }
 0xac9   :  { %v1689_v3 = vsub.f32 0.0, %v1687_v55  ;;  %v1550_v4 = vsub.f32 0.0, %v1548_v56  ;;  %v1505_v5 = vpop.f32.mrb[19].mxu1  ;;  %v1546_v6 = vpop.f32.mrb[35].mxu0  ;;  %v9231_v55 = vld [vmem:[%s11631_s2 + $0x68] ss:$16 sps:$4 sm:$0xff]  }
 0xaca   :  { %v1690_v7 = vsub.f32 0.0, %v1688_v61  ;;  %v1551_v10 = vsub.f32 0.0, %v1549_v62  ;;  %v9232_v56 = vld [vmem:[%s11631_s2 + $0x84] ss:$16 sps:$4 sm:$0xff]   ;;  %v9235_v61 = vld [vmem:[%s11631_s2 + $0x88] ss:$16 sps:$4 sm:$0xff]  }
 0xacb   :  { %v1691_v14 = vmul.f32 1.442695, %v1689_v3  ;;  %v1552_v15 = vmul.f32 1.442695, %v1550_v4  ;;  %v9236_v62 = vld [vmem:[%s11631_s2 + $0xa4] ss:$16 sps:$4 sm:$0xff]  }
 0xacc   :  { %v1693_v20 = vmul.f32 1.442695, %v1690_v7  ;;  %v1554_v39 = vmul.f32 1.442695, %v1551_v10  ;;  %v9237_v1 = vld [vmem:[%s11631_s2 + $0xac] ss:$16 sps:$4 sm:$0xff]  }
 0xacd   :  { %9014 = vpow2.f32 %v1691_v14  ;;  %v9238_v2 = vld [vmem:[%s11631_s2 + $0xa0] ss:$16 sps:$4 sm:$0xff]   ;;  %v9239_v3 = vld [vmem:[%s11631_s2 + $0xa8] ss:$16 sps:$4 sm:$0xff]   ;;  %v9240_v4 = vld [vmem:[%s11631_s2 + $0xc4] ss:$16 sps:$4 sm:$0xff]  }
 0xace   :  { %9016 = vpow2.f32 %v1552_v15  ;;  %v9241_v5 = vld [vmem:[%s11631_s2 + $0xcc] ss:$16 sps:$4 sm:$0xff]   ;;  %v9242_v6 = vld [vmem:[%s11631_s2 + $0xc0] ss:$16 sps:$4 sm:$0xff]   ;;  %v9243_v7 = vld [vmem:[%s11631_s2 + $0xc8] ss:$16 sps:$4 sm:$0xff]  }
 0xacf   :  { %9018 = vpow2.f32 %v1693_v20  ;;  %v9244_v10 = vld [vmem:[%s11631_s2 + $0xe4] ss:$16 sps:$4 sm:$0xff]   ;;  %v9245_v14 = vld [vmem:[%s11631_s2 + $0xec] ss:$16 sps:$4 sm:$0xff]   ;;  %v9246_v15 = vld [vmem:[%s11631_s2 + $0xe0] ss:$16 sps:$4 sm:$0xff]  }
 0xad0   :  { %9020 = vpow2.f32 %v1554_v39  ;;  %v9247_v20 = vld [vmem:[%s11631_s2 + $0xe8] ss:$16 sps:$4 sm:$0xff]  }
 0xad1   :  { %v11659_v39 = vld [vmem:[#allocation15_spill] sm:$0xff] }
 0xad7   :  { %v9015_v43 = vpop.eup %9014 }
 0xad8   :  { %v9017_v63 = vpop.eup %9016  ;;  %v1695_v40 = vadd.f32 1.0, %v9015_v43  ;;  %v216_v43 = vadd.f32 %v11659_v39, %v9429_v12 }
 0xad9   :  { %v9019_v35 = vpop.eup %9018  ;;  %v1556_v41 = vadd.f32 1.0, %v9017_v63  ;;  %v11660_v63 = vld [vmem:[#allocation16_spill] sm:$0xff] }
 0xada   :  { %v9021_v36 = vpop.eup %9020  ;;  %v1696_v37 = vadd.f32 1.0, %v9019_v35  ;;  %v218_v35 = vadd.f32 %v11660_v63, %v9433_v13 }
 0xadb   :  { %v1557_v38 = vadd.f32 1.0, %v9021_v36 }
 0xadc   :  { %9022 = vrcp.f32 %v1696_v37 }
 0xadd   :  { %9024 = vrcp.f32 %v1557_v38 }
 0xade   :  { %9026 = vrcp.f32 %v1695_v40 }
 0xadf   :  { %9028 = vrcp.f32 %v1556_v41 }
 0xae6   :  { %v9023_v22 = vpop.eup %9022 }
 0xae7   :  { %v9025_v17 = vpop.eup %9024  ;;  %v1701_v21 = vmul.f32 2.0, %v9023_v22 }
 0xae8   :  { %v1562_v29 = vmul.f32 2.0, %v9025_v17  ;;  %v9027_v0 = vpop.eup %9026 }
 0xae9   :  { %v7681_v8 = vadd.f32 -1.0, %v1701_v21  ;;  %v9029_v34 = vpop.eup %9028  ;;  %v1703_v28 = vmul.f32 %v9027_v0, %v9894_v33 }
 0xaea   :  { %v7680_v23 = vadd.f32 -1.0, %v1562_v29  ;;  %v1564_v46 = vmul.f32 %v9029_v34, %v9899_v27  ;;  %v9224_v27 = vld [vmem:[%s11631_s2 + $0x44] ss:$16 sps:$4 sm:$0xff]  }
 0xaeb   :  { %v1704_v19 = vmul.f32 %v9027_v0, %v7681_v8 }
 0xaec   :  { %v1565_v24 = vmul.f32 %v9029_v34, %v7680_v23 }
 0xaed   :  { %1706 = vrot.lane.b32.xlu0 %v1704_v19, %s9326_s7 }
 0xaee   :  { %1567 = vrot.lane.b32.xlu1 %v1565_v24, %s9326_s7 }
 0xb5f   :  { %v1707_v26 = vpop.permute.xlu0 %1706 }
 0xb60   :  { %v9983_v25 = vadd.f32 %v1707_v26, %v1703_v28  ;;  %v1568_v45 = vpop.permute.xlu1 %1567 }
 0xb61   :  { %v9988_v47 = vadd.f32 %v1568_v45, %v1564_v46 }
 0xb62   :  { %9030 = vtanh.f32 %v9983_v25 }
 0xb63   :  { %9032 = vtanh.f32 %v9988_v47 }
 0xb6c   :  { %v9031_v31 = vpop.eup %9030 }
 0xb6d   :  { %v1711_v44 = vmul.f32 %v9031_v31, %v9023_v22  ;;  %v9033_v50 = vpop.eup %9032 }
 0xb6e   :  { %v9991_v51 = vmul.f32 %v9033_v50, %v9025_v17 }
 0xb6f   :  { %1713 = vrot.lane.b32.xlu0 %v1711_v44, %s9326_s7 }
 0xbe1   :  { %v1714_v33 = vpop.permute.xlu0 %1713 }
 0xbe2   :  { %v1716_v53 = vsel %vm283_vm2, %v1714_v33, %v9991_v51 }
 0xbe3   :  { %v1717_v54 = vpack.c.bf16 %v1716_v53, %v1716_v53 }
 0xbe5   :  { %1751 = vmatmul.mubr.bf16.vlgmr.msra.gmra.mrb[20].mxu1 %v1717_v54  ;;  %1792 = vmatmul.mubr.bf16.vlgmr.msra.gmra.mrb[36].mxu0 %v1717_v54 }
 0xbe6   :  { %1971 = vmatpush1.bf16.msra.mxu1 %v9909_v11  ;;  %2012 = vmatpush1.bf16.msra.mxu0 %v9915_v18  ;;  %v9225_v11 = vld [vmem:[%s11631_s2 + $0x4c] ss:$16 sps:$4 sm:$0xff]   ;;  %v9226_v18 = vld [vmem:[%s11631_s2 + $0x40] ss:$16 sps:$4 sm:$0xff]  }
 0xbe7   :  { %1972 = vmatprep.subr.bf16.mxu1 %v9921_v60  ;;  %2013 = vmatprep.subr.bf16.mxu0 %v9927_v30  ;;  %v9227_v60 = vld [vmem:[%s11631_s2 + $0x48] ss:$16 sps:$4 sm:$0xff]   ;;  %v9228_v30 = vld [vmem:[%s11631_s2 + $0x64] ss:$16 sps:$4 sm:$0xff]  }
 0xbe8   :  { %2002 = vmatprep.mubr.bf16.mxu1 %v11655_v9  ;;  %2043 = vmatprep.mubr.bf16.mxu0 %v11655_v9 }
 0xbea   :  { %1973 = vmatpush1.bf16.msra.mxu1 %v9935_v48  ;;  %2014 = vmatpush1.bf16.msra.mxu0 %v9941_v42  ;;  %v9229_v48 = vld [vmem:[%s11631_s2 + $0x6c] ss:$16 sps:$4 sm:$0xff]   ;;  %v9230_v42 = vld [vmem:[%s11631_s2 + $0x60] ss:$16 sps:$4 sm:$0xff]  }
 0xbeb   :  { %1974 = vmatprep.subr.bf16.mxu1 %v9224_v27  ;;  %2015 = vmatprep.subr.bf16.mxu0 %v9225_v11 }
 0xbee   :  { %1975 = vmatpush1.bf16.msra.mxu1 %v9226_v18  ;;  %2016 = vmatpush1.bf16.msra.mxu0 %v9227_v60 }
 0xbef   :  { %1976 = vmatprep.subr.bf16.mxu1 %v9228_v30  ;;  %2017 = vmatprep.subr.bf16.mxu0 %v9229_v48 }
 0xbf2   :  { %1977 = vmatpush1.bf16.msra.mxu1 %v9230_v42  ;;  %2018 = vmatpush1.bf16.msra.mxu0 %v9231_v55 }
 0xbf3   :  { %1978 = vmatprep.subr.bf16.mxu1 %v9232_v56  ;;  %2019 = vmatprep.subr.bf16.mxu0 %v9233_v57 }
 0xbf6   :  { %1979 = vmatpush1.bf16.msra.mxu1 %v9234_v58  ;;  %2020 = vmatpush1.bf16.msra.mxu0 %v9235_v61 }
 0xbf7   :  { %1980 = vmatprep.subr.bf16.mxu1 %v9236_v62  ;;  %2021 = vmatprep.subr.bf16.mxu0 %v9237_v1 }
 0xbfa   :  { %1981 = vmatpush1.bf16.msra.mxu1 %v9238_v2  ;;  %2022 = vmatpush1.bf16.msra.mxu0 %v9239_v3 }
 0xbfb   :  { %1982 = vmatprep.subr.bf16.mxu1 %v9240_v4  ;;  %2023 = vmatprep.subr.bf16.mxu0 %v9241_v5 }
 0xbfe   :  { %1983 = vmatpush1.bf16.msra.mxu1 %v9242_v6  ;;  %2024 = vmatpush1.bf16.msra.mxu0 %v9243_v7 }
 0xbff   :  { %1984 = vmatprep.subr.bf16.mxu1 %v9244_v10  ;;  %2025 = vmatprep.subr.bf16.mxu0 %v9245_v14 }
 0xc02   :  { %1985 = vmatpush1.bf16.msra.mxu1 %v9246_v15  ;;  %2026 = vmatpush1.bf16.msra.mxu0 %v9247_v20 }
 0xcb8   :  { %v1752_v36 = vpop.f32.mrb[20].mxu1  ;;  %v1793_v37 = vpop.f32.mrb[36].mxu0 }
 0xcb9   :  { %v1939_v38 = vadd.f32 %v1752_v36, %v216_v43  ;;  %v1800_v40 = vadd.f32 %v1793_v37, %v9715_v52  ;;  %v1754_v41 = vpop.f32.mrb[21].mxu1  ;;  %v1795_v22 = vpop.f32.mrb[37].mxu0  ;;  %v11661_v43 = vld [vmem:[#allocation17_spill] sm:$0xff] }
 0xcba   :  { %v1940_v17 = vadd.f32 %v1754_v41, %v218_v35  ;;  %v1801_v21 = vadd.f32 %v1795_v22, %v9719_v59  ;;  %v1756_v29 = vpop.f32.mrb[22].mxu1  ;;  %v1797_v8 = vpop.f32.mrb[38].mxu0  ;;  %v220_v63 = vadd.f32 %v11661_v43, %v9429_v12 }
 0xcbb   :  { %v1941_v0 = vsub.f32 0.0, %v1939_v38  ;;  %v1802_v23 = vsub.f32 0.0, %v1800_v40  ;;  %v1757_v34 = vpop.f32.mrb[23].mxu1  ;;  %v1798_v19 = vpop.f32.mrb[39].mxu0 }
 0xcbc   :  { %v1942_v24 = vsub.f32 0.0, %v1940_v17  ;;  %v1803_v28 = vsub.f32 0.0, %v1801_v21 }
 0xcbd   :  { %v1943_v26 = vmul.f32 1.442695, %v1941_v0  ;;  %v1804_v31 = vmul.f32 1.442695, %v1802_v23 }
 0xcbe   :  { %v1945_v44 = vmul.f32 1.442695, %v1942_v24  ;;  %v1806_v45 = vmul.f32 1.442695, %v1803_v28 }
 0xcbf   :  { %9034 = vpow2.f32 %v1943_v26 }
 0xcc0   :  { %9036 = vpow2.f32 %v1804_v31 }
 0xcc1   :  { %9038 = vpow2.f32 %v1945_v44 }
 0xcc2   :  { %9040 = vpow2.f32 %v1806_v45  ;;  %v9327_v45 = vmov 1966171168  }
 0xcc9   :  { %v9035_v46 = vpop.eup %9034 }
 0xcca   :  { %v9037_v50 = vpop.eup %9036  ;;  %v1947_v11 = vadd.f32 1.0, %v9035_v46  ;;  %v567_v46 = vunpack.c.l.s4 %v9327_v45  ;;  %v8852_v45 = vld [vmem:[%s11631_s2 + $0x48] ss:$16 sps:$4 sm:$0xff]  }
 0xccb   :  { %v9039_v33 = vpop.eup %9038  ;;  %v1808_v18 = vadd.f32 1.0, %v9037_v50 }
 0xccc   :  { %v9041_v53 = vpop.eup %9040  ;;  %v1948_v54 = vadd.f32 1.0, %v9039_v33 }
 0xccd   :  { %v1809_v27 = vadd.f32 1.0, %v9041_v53 }
 0xcce   :  { %9042 = vrcp.f32 %v1948_v54 }
 0xccf   :  { %9044 = vrcp.f32 %v1809_v27  ;;  %v568_v27 = vunpack.c.0.s8 %v567_v46  ;;  %v8854_v46 = vld [vmem:[%s11631_s2 + $0x4c] ss:$16 sps:$4 sm:$0xff]  }
 0xcd0   :  { %9046 = vrcp.f32 %v1947_v11 }
 0xcd1   :  { %9048 = vrcp.f32 %v1808_v18 }
 0xcd8   :  { %v9043_v60 = vpop.eup %9042 }
 0xcd9   :  { %v9045_v30 = vpop.eup %9044  ;;  %v1953_v48 = vmul.f32 2.0, %v9043_v60 }
 0xcda   :  { %v1814_v42 = vmul.f32 2.0, %v9045_v30  ;;  %v9047_v56 = vpop.eup %9046 }
 0xcdb   :  { %v7683_v55 = vadd.f32 -1.0, %v1953_v48  ;;  %v9049_v58 = vpop.eup %9048  ;;  %v1955_v1 = vmul.f32 %v9047_v56, %v9983_v25  ;;  %v11664_v48 = vld [vmem:[#allocation19_spill] sm:$0xff] }
 0xcdc   :  { %v7682_v57 = vadd.f32 -1.0, %v1814_v42  ;;  %v1816_v7 = vmul.f32 %v9049_v58, %v9988_v47  ;;  %v11662_v47 = vld [vmem:[#allocation18_spill] sm:$0xff] }
 0xcdd   :  { %v1956_v61 = vmul.f32 %v9047_v56, %v7683_v55  ;;  %v222_v35 = vadd.f32 %v11662_v47, %v9433_v13 }
 0xcde   :  { %v1817_v62 = vmul.f32 %v9049_v58, %v7682_v57 }
 0xcdf   :  { %1958 = vrot.lane.b32.xlu1 %v1956_v61, %s9326_s7 }
 0xce0   :  { %1819 = vrot.lane.b32.xlu0 %v1817_v62, %s9326_s7 }
 0xd51   :  { %v1959_v2 = vpop.permute.xlu1 %1958 }
 0xd52   :  { %v10084_v3 = vadd.f32 %v1959_v2, %v1955_v1  ;;  %v1820_v6 = vpop.permute.xlu0 %1819 }
 0xd53   :  { %v10089_v10 = vadd.f32 %v1820_v6, %v1816_v7 }
 0xd54   :  { %9050 = vtanh.f32 %v10084_v3 }
 0xd55   :  { %9052 = vtanh.f32 %v10089_v10 }
 0xd5e   :  { %v9051_v4 = vpop.eup %9050 }
 0xd5f   :  { %v1963_v5 = vmul.f32 %v9051_v4, %v9043_v60  ;;  %v9053_v14 = vpop.eup %9052  ;;  %v11663_v60 = vld [vmem:[#allocation10_spill] sm:$0xff] }
 0xd60   :  { %v10092_v15 = vmul.f32 %v9053_v14, %v9045_v30  ;;  %v10104_v30 = vsub.s32 %v568_v27, %v11663_v60  ;;  %v8861_v27 = vld [vmem:[%s11631_s2 + $0xa8] ss:$16 sps:$4 sm:$0xff]   ;;  %v8866_v60 = vld [vmem:[%s11631_s2 + $0xcc] ss:$16 sps:$4 sm:$0xff]  }
 0xd61   :  { %1965 = vrot.lane.b32.xlu1 %v1963_v5, %s9326_s7 }
 0xd62   :  { %v10108_v42 = vrot.slane %v11664_v48, %v10104_v30  ;;  %v10120_v62 = vrot.slane %v9792_v49, %v10104_v30 }
 0xd64   :  { %v580_v61 = vcombine.high %v10108_v42, %v10108_v42 }
 0xd66   :  { %v602_v14 = vrot.slane %v580_v61, %v10104_v30 }
 0xdd3   :  { %v1966_v25 = vpop.permute.xlu1 %1965 }
 0xdd4   :  { %v1968_v20 = vsel %vm283_vm2, %v1966_v25, %v10092_v15  ;;  %v833_v25 = vcombine.high %v10120_v62, %v10120_v62 }
 0xdd5   :  { %v1969_v39 = vpack.c.bf16 %v1968_v20, %v1968_v20  ;;  %v10133_v20 = vrot.slane %v9847_v16, %v10104_v30 }
 0xdd7   :  { %2003 = vmatmul.mubr.bf16.vlgmr.msra.gmra.mrb[24].mxu1 %v1969_v39  ;;  %2044 = vmatmul.mubr.bf16.vlgmr.msra.gmra.mrb[40].mxu0 %v1969_v39  ;;  %v11665_v39 = vld [vmem:[#allocation11_spill] sm:$0xff]  ;;  %v1085_v47 = vcombine.high %v10133_v20, %v10133_v20 }
 0xdd8   :  { %2350 = vmatprep.mubr.bf16.mxu1 %v11655_v9  ;;  %v621_v43 = vrot.slane %v602_v14, %v11665_v39 }
 0xeaa   :  { %v2004_v36 = vpop.f32.mrb[24].mxu1  ;;  %v2045_v37 = vpop.f32.mrb[40].mxu0 }
 0xeab   :  { %v2191_v38 = vadd.f32 %v2004_v36, %v220_v63  ;;  %v2052_v40 = vadd.f32 %v2045_v37, %v9715_v52  ;;  %v2006_v41 = vpop.f32.mrb[25].mxu1  ;;  %v2047_v22 = vpop.f32.mrb[41].mxu0  ;;  %v855_v63 = vrot.slane %v833_v25, %v10104_v30  ;;  %v10148_v37 = vrot.slane %v1085_v47, %v10104_v30 }
 0xeac   :  { %v2192_v17 = vadd.f32 %v2006_v41, %v222_v35  ;;  %v2053_v21 = vadd.f32 %v2047_v22, %v9719_v59  ;;  %v2008_v29 = vpop.f32.mrb[26].mxu1  ;;  %v2049_v8 = vpop.f32.mrb[42].mxu0  ;;  %v10143_v35 = vrot.slane %v9902_v32, %v10104_v30 }
 0xead   :  { %v2193_v0 = vsub.f32 0.0, %v2191_v38  ;;  %v2054_v9 = vsub.f32 0.0, %v2052_v40  ;;  %v2009_v23 = vpop.f32.mrb[27].mxu1  ;;  %v2050_v34 = vpop.f32.mrb[43].mxu0  ;;  %v874_v36 = vrot.slane %v855_v63, %v11665_v39  ;;  %v10154_v40 = vrot.slane %v9991_v51, %v10104_v30 }
 0xeae   :  { %v2194_v12 = vsub.f32 0.0, %v2192_v17  ;;  %v2055_v19 = vsub.f32 0.0, %v2053_v21  ;;  %v1337_v38 = vcombine.high %v10143_v35, %v10143_v35  ;;  %v1126_v41 = vrot.slane %v10148_v37, %v11665_v39 }
 0xeaf   :  { %v2195_v24 = vmul.f32 1.442695, %v2193_v0  ;;  %v2056_v13 = vmul.f32 1.442695, %v2054_v9  ;;  %v1589_v17 = vcombine.high %v10154_v40, %v10154_v40  ;;  %v10166_v21 = vrot.slane %v10092_v15, %v10104_v30 }
 0xeb0   :  { %v2197_v28 = vmul.f32 1.442695, %v2194_v12  ;;  %v2058_v26 = vmul.f32 1.442695, %v2055_v19  ;;  %v10160_v22 = vrot.slane %v1337_v38, %v10104_v30  ;;  %v612_v12 = vcombine.high %v602_v14, %v602_v14 }
 0xeb1   :  { %9054 = vpow2.f32 %v2195_v24  ;;  %v10172_v8 = vrot.slane %v1589_v17, %v10104_v30  ;;  %v1841_v0 = vcombine.high %v10166_v21, %v10166_v21  ;;  %v865_v24 = vcombine.high %v855_v63, %v855_v63 }
 0xeb2   :  { %9056 = vpow2.f32 %v2056_v13  ;;  %v1378_v29 = vrot.slane %v10160_v22, %v11665_v39  ;;  %v629_v19 = vrot.slane %v612_v12, %v11665_v39  ;;  %v588_v63 = vrot.slane %v10108_v42, %v10104_v30 }
 0xeb3   :  { %9058 = vpow2.f32 %v2197_v28  ;;  %v1630_v9 = vrot.slane %v10172_v8, %v11665_v39  ;;  %v10180_v23 = vrot.slane %v1841_v0, %v10104_v30  ;;  %v882_v13 = vrot.slane %v865_v24, %v11665_v39  ;;  %v8846_v28 = vld [vmem:[%s11631_s2 + $0x8] ss:$16 sps:$4 sm:$0xff]  }
 0xeb4   :  { %9060 = vpow2.f32 %v2058_v26  ;;  %v8848_v26 = vld [vmem:[%s11631_s2 + $0xc] ss:$16 sps:$4 sm:$0xff]   ;;  %v841_v17 = vrot.slane %v10120_v62, %v10104_v30  ;;  %v1093_v0 = vrot.slane %v10133_v20, %v10104_v30  ;;  %v1345_v12 = vrot.slane %v10143_v35, %v10104_v30 }
 0xeb5   :  { %v1882_v34 = vrot.slane %v10180_v23, %v11665_v39  ;;  %2318 = vmatprep.subr.bf16.mxu1 %v8848_v26  ;;  %v1597_v24 = vrot.slane %v10154_v40, %v10104_v30  ;;  %v1849_v35 = vrot.slane %v10166_v21, %v10104_v30 }
 0xeb6   :  { %2319 = vmatpush1.bf16.msra.mxu1 %v8846_v28  ;;  %v1374_v20 = vrot.slane %v1345_v12, %v11665_v39  ;;  %v863_v40 = vcombine.high %v841_v17, %v841_v17 }
 0xeb7   :  { %v1626_v28 = vrot.slane %v1597_v24, %v11665_v39  ;;  %v1878_v26 = vrot.slane %v1849_v35, %v11665_v39 }
 0xebb   :  { %v9055_v31 = vpop.eup %9054 }
 0xebc   :  { %v9057_v44 = vpop.eup %9056  ;;  %v2199_v11 = vadd.f32 1.0, %v9055_v31  ;;  %v8849_v31 = vld [vmem:[%s11631_s2 + $0x28] ss:$16 sps:$4 sm:$0xff]  }
 0xebd   :  { %v9059_v50 = vpop.eup %9058  ;;  %v2060_v18 = vadd.f32 1.0, %v9057_v44  ;;  %v8851_v44 = vld [vmem:[%s11631_s2 + $0x2c] ss:$16 sps:$4 sm:$0xff]  }
 0xebe   :  { %v9061_v33 = vpop.eup %9060  ;;  %v2200_v53 = vadd.f32 1.0, %v9059_v50  ;;  %2320 = vmatprep.subr.bf16.mxu1 %v8851_v44  ;;  %v8855_v50 = vld [vmem:[%s11631_s2 + $0x68] ss:$16 sps:$4 sm:$0xff]  }
 0xebf   :  { %v2061_v54 = vadd.f32 1.0, %v9061_v33  ;;  %2321 = vmatpush1.bf16.msra.mxu1 %v8849_v31  ;;  %v8857_v33 = vld [vmem:[%s11631_s2 + $0x6c] ss:$16 sps:$4 sm:$0xff]   ;;  %v610_v31 = vcombine.high %v588_v63, %v588_v63 }
 0xec0   :  { %9062 = vrcp.f32 %v2200_v53  ;;  %2322 = vmatprep.subr.bf16.mxu1 %v8854_v46  ;;  %v8858_v53 = vld [vmem:[%s11631_s2 + $0x88] ss:$16 sps:$4 sm:$0xff]   ;;  %v1115_v46 = vcombine.high %v1093_v0, %v1093_v0 }
 0xec1   :  { %9064 = vrcp.f32 %v2061_v54  ;;  %v8860_v54 = vld [vmem:[%s11631_s2 + $0x8c] ss:$16 sps:$4 sm:$0xff]   ;;  %v625_v44 = vrot.slane %v610_v31, %v11665_v39 }
 0xec2   :  { %9066 = vrcp.f32 %v2199_v11  ;;  %v8863_v11 = vld [vmem:[%s11631_s2 + $0xac] ss:$16 sps:$4 sm:$0xff]  }
 0xec3   :  { %9068 = vrcp.f32 %v2060_v18  ;;  %2323 = vmatpush1.bf16.msra.mxu1 %v8852_v45  ;;  %v8864_v18 = vld [vmem:[%s11631_s2 + $0xc8] ss:$16 sps:$4 sm:$0xff]   ;;  %v878_v45 = vrot.slane %v863_v40, %v11665_v39 }
 0xec4   :  { %2324 = vmatprep.subr.bf16.mxu1 %v8857_v33 }
 0xec7   :  { %2325 = vmatpush1.bf16.msra.mxu1 %v8855_v50  ;;  %v1130_v50 = vrot.slane %v1115_v46, %v11665_v39 }
 0xec8   :  { %2326 = vmatprep.subr.bf16.mxu1 %v8860_v54 }
 0xeca   :  { %v10110_v55 = vpop.eup %9062 }
 0xecb   :  { %v10112_v56 = vpop.eup %9064  ;;  %v2205_v57 = vmul.f32 2.0, %v10110_v55  ;;  %2327 = vmatpush1.bf16.msra.mxu1 %v8858_v53  ;;  %v1367_v53 = vcombine.high %v1345_v12, %v1345_v12 }
 0xecc   :  { %v2066_v58 = vmul.f32 2.0, %v10112_v56  ;;  %v10122_v2 = vpop.eup %9066  ;;  %2328 = vmatprep.subr.bf16.mxu1 %v8863_v11 }
 0xecd   :  { %v7685_v1 = vadd.f32 -1.0, %v2205_v57  ;;  %v10124_v5 = vpop.eup %9068  ;;  %v2207_v57 = vmul.f32 %v10122_v2, %v10084_v3  ;;  %v1382_v54 = vrot.slane %v1367_v53, %v11665_v39 }
 0xece   :  { %v7684_v4 = vadd.f32 -1.0, %v2066_v58  ;;  %v2068_v58 = vmul.f32 %v10124_v5, %v10089_v10 }
 0xecf   :  { %v2208_v6 = vmul.f32 %v10122_v2, %v7685_v1  ;;  %2329 = vmatpush1.bf16.msra.mxu1 %v8861_v27  ;;  %v8867_v1 = vld [vmem:[%s11631_s2 + $0xe8] ss:$16 sps:$4 sm:$0xff]   ;;  %v1619_v27 = vcombine.high %v1597_v24, %v1597_v24 }
 0xed0   :  { %v2069_v7 = vmul.f32 %v10124_v5, %v7684_v4  ;;  %2330 = vmatprep.subr.bf16.mxu1 %v8866_v60  ;;  %v8869_v4 = vld [vmem:[%s11631_s2 + $0xec] ss:$16 sps:$4 sm:$0xff]   ;;  %v565_v60 = vcombine.high %v11664_v48, %v11664_v48 }
 0xed1   :  { %2210 = vrot.lane.b32.xlu0 %v2208_v6, %s9326_s7  ;;  %v1634_v11 = vrot.slane %v1619_v27, %v11665_v39 }
 0xed2   :  { %2071 = vrot.lane.b32.xlu1 %v2069_v7, %s9326_s7 }
 0xed3   :  { %2331 = vmatpush1.bf16.msra.mxu1 %v8864_v18  ;;  %v1871_v18 = vcombine.high %v1849_v35, %v1849_v35 }
 0xed4   :  { %2332 = vmatprep.subr.bf16.mxu1 %v8869_v4 }
 0xed6   :  { %648 = vrot.lane.b32.xlu1 %v621_v43, %s9326_s7 }
 0xed7   :  { %2333 = vmatpush1.bf16.msra.mxu1 %v8867_v1  ;;  %v818_v1 = vcombine.high %v9792_v49, %v9792_v49 }
 0xed9   :  { %v10316_v48 = vrot.slane %v818_v1, %v10104_v30 }
 0xeda   :  { %901 = vrot.lane.b32.xlu1 %v874_v36, %s9326_s7 }
 0xedb   :  { %v848_v49 = vrot.slane %v10316_v48, %v10104_v30 }
 0xede   :  { %1153 = vrot.lane.b32.xlu1 %v1126_v41, %s9326_s7  ;;  %v617_v41 = vrot.slane %v588_v63, %v11665_v39 }
 0xee2   :  { %1405 = vrot.lane.b32.xlu1 %v1378_v29, %s9326_s7  ;;  %v870_v29 = vrot.slane %v841_v17, %v11665_v39 }
 0xee6   :  { %1657 = vrot.lane.b32.xlu1 %v1630_v9, %s9326_s7 }
 0xeea   :  { %1909 = vrot.lane.b32.xlu1 %v1882_v34, %s9326_s7  ;;  %v1122_v34 = vrot.slane %v1093_v0, %v11665_v39 }
 0xeee   :  { %652 = vrot.lane.b32.xlu1 %v629_v19, %s9326_s7 }
 0xef2   :  { %905 = vrot.lane.b32.xlu1 %v882_v13, %s9326_s7 }
 0xf43   :  { %v2211_v61 = vpop.permute.xlu0 %2210 }
 0xf44   :  { %v2072_v6 = vpop.permute.xlu1 %2071  ;;  %v2213_v7 = vadd.f32 %v2211_v61, %v2207_v57  ;;  %v1886_v57 = vrot.slane %v1871_v18, %v11665_v39  ;;  %v10307_v61 = vrot.slane %v565_v60, %v10104_v30 }
 0xf45   :  { %v10242_v14 = vadd.f32 %v2072_v6, %v2068_v58 }
 0xf46   :  { %9070 = vtanh.f32 %v2213_v7  ;;  %v595_v6 = vrot.slane %v10307_v61, %v10104_v30  ;;  %v1070_v7 = vcombine.high %v9847_v16, %v9847_v16 }
 0xf47   :  { %9072 = vtanh.f32 %v10242_v14 }
 0xf48   :  { %v649_v3 = vpop.permute.xlu1 %648 }
 0xf49   :  { %672 = vst.msk [vmem:[#allocation2 + $0x8] sm:$0x1] %vm670_vm4, %v649_v3  ;;  %v633_v3 = vrot.slane %v595_v6, %v11665_v39 }
 0xf4c   :  { %v902_v10 = vpop.permute.xlu1 %901 }
 0xf4d   :  { %924 = vst.msk [vmem:[#allocation2 + $0x9] sm:$0x1] %vm670_vm4, %v902_v10  ;;  %v10325_v10 = vrot.slane %v1070_v7, %v10104_v30 }
 0xf4f   :  { %v1100_v16 = vrot.slane %v10325_v10, %v10104_v30 }
 0xf50   :  { %v9071_v2 = vpop.eup %9070  ;;  %v1154_v5 = vpop.permute.xlu1 %1153 }
 0xf51   :  { %v9073_v25 = vpop.eup %9072  ;;  %1176 = vst.msk [vmem:[#allocation2 + $0xa] sm:$0x1] %vm670_vm4, %v1154_v5  ;;  %v2215_v43 = vmul.f32 %v9071_v2, %v10110_v55  ;;  %v1322_v2 = vcombine.high %v9902_v32, %v9902_v32  ;;  %v886_v5 = vrot.slane %v848_v49, %v11665_v39  ;;  %v1138_v63 = vrot.slane %v1100_v16, %v11665_v39 }
 0xf52   :  { %v10252_v47 = vmul.f32 %v9073_v25, %v10112_v56  ;;  %v1116_v24 = vcombine.high %v1100_v16, %v1100_v16 }
 0xf53   :  { %2217 = vrot.lane.b32.xlu0 %v2215_v43, %s9326_s7  ;;  %v10334_v25 = vrot.slane %v1322_v2, %v10104_v30  ;;  %v1574_v43 = vcombine.high %v9991_v51, %v9991_v51 }
 0xf54   :  { %v1406_v36 = vpop.permute.xlu1 %1405  ;;  %v2085_v38 = vrot.slane %v10252_v47, %v10104_v30 }
 0xf55   :  { %1428 = vst.msk [vmem:[#allocation2 + $0xb] sm:$0x1] %vm670_vm4, %v1406_v36  ;;  %v1352_v32 = vrot.slane %v10334_v25, %v10104_v30  ;;  %v10343_v36 = vrot.slane %v1574_v43, %v10104_v30 }
 0xf56   :  { %v2093_v55 = vcombine.high %v2085_v38, %v2085_v38  ;;  %v2101_v21 = vrot.slane %v2085_v38, %v10104_v30  ;;  %v1826_v38 = vcombine.high %v10092_v15, %v10092_v15 }
 0xf57   :  { %646 = vrot.lane.b32.xlu0 %v617_v41, %s9326_s7  ;;  %v1390_v41 = vrot.slane %v1352_v32, %v11665_v39  ;;  %v1604_v51 = vrot.slane %v10343_v36, %v10104_v30 }
 0xf58   :  { %v1658_v42 = vpop.permute.xlu1 %1657  ;;  %v10263_v56 = vrot.slane %v2093_v55, %v10104_v30  ;;  %v2130_v33 = vrot.slane %v2101_v21, %v11665_v39  ;;  %v2123_v58 = vcombine.high %v2101_v21, %v2101_v21  ;;  %v10352_v17 = vrot.slane %v1826_v38, %v10104_v30 }
 0xf59   :  { %1680 = vst.msk [vmem:[#allocation2 + $0xc] sm:$0x1] %vm670_vm4, %v1658_v42  ;;  %v2078_v55 = vcombine.high %v10252_v47, %v10252_v47  ;;  %v1642_v42 = vrot.slane %v1604_v51, %v11665_v39 }
 0xf5a   :  { %v2134_v9 = vrot.slane %v10263_v56, %v11665_v39  ;;  %v2138_v4 = vrot.slane %v2123_v58, %v11665_v39  ;;  %v1856_v15 = vrot.slane %v10352_v17, %v10104_v30 }
 0xf5b   :  { %899 = vrot.lane.b32.xlu0 %v870_v29, %s9326_s7  ;;  %v10361_v29 = vrot.slane %v2078_v55, %v10104_v30 }
 0xf5c   :  { %2161 = vrot.lane.b32.xlu1 %v2134_v9, %s9326_s7  ;;  %v1910_v62 = vpop.permute.xlu1 %1909  ;;  %v1894_v0 = vrot.slane %v1856_v15, %v11665_v39 }
 0xf5d   :  { %1932 = vst.msk [vmem:[#allocation2 + $0xd] sm:$0x1] %vm670_vm4, %v1910_v62  ;;  %v2108_v9 = vrot.slane %v10361_v29, %v10104_v30 }
 0xf5f   :  { %1151 = vrot.lane.b32.xlu0 %v1122_v34, %s9326_s7  ;;  %v2146_v62 = vrot.slane %v2108_v9, %v11665_v39  ;;  %v611_v34 = vcombine.high %v595_v6, %v595_v6 }
 0xf60   :  { %v653_v19 = vpop.permute.xlu1 %652 }
 0xf61   :  { %674 = vst.msk [vmem:[#allocation2 + $0x18] sm:$0x1] %vm670_vm4, %v653_v19  ;;  %v641_v12 = vrot.slane %v611_v34, %v11665_v39  ;;  %v864_v19 = vcombine.high %v848_v49, %v848_v49 }
 0xf63   :  { %1403 = vrot.lane.b32.xlu0 %v1374_v20, %s9326_s7  ;;  %v894_v20 = vrot.slane %v864_v19, %v11665_v39 }
 0xf64   :  { %v906_v13 = vpop.permute.xlu1 %905 }
 0xf65   :  { %926 = vst.msk [vmem:[#allocation2 + $0x19] sm:$0x1] %vm670_vm4, %v906_v13  ;;  %v1146_v13 = vrot.slane %v1116_v24, %v11665_v39 }
 0xf67   :  { %1655 = vrot.lane.b32.xlu0 %v1626_v28, %s9326_s7  ;;  %v1368_v28 = vcombine.high %v1352_v32, %v1352_v32 }
 0xf69   :  { %v1398_v35 = vrot.slane %v1368_v28, %v11665_v39 }
 0xf6b   :  { %1907 = vrot.lane.b32.xlu0 %v1878_v26, %s9326_s7  ;;  %v1620_v26 = vcombine.high %v1604_v51, %v1604_v51 }
 0xf6d   :  { %v1650_v31 = vrot.slane %v1620_v26, %v11665_v39 }
 0xf6f   :  { %650 = vrot.lane.b32.xlu0 %v625_v44, %s9326_s7  ;;  %v1872_v44 = vcombine.high %v1856_v15, %v1856_v15 }
 0xf71   :  { %v1902_v40 = vrot.slane %v1872_v44, %v11665_v39 }
 0xf73   :  { %903 = vrot.lane.b32.xlu0 %v878_v45, %s9326_s7  ;;  %v2124_v45 = vcombine.high %v2108_v9, %v2108_v9 }
 0xf75   :  { %v2154_v46 = vrot.slane %v2124_v45, %v11665_v39 }
 0xf77   :  { %1155 = vrot.lane.b32.xlu0 %v1130_v50, %s9326_s7 }
 0xf7b   :  { %2159 = vrot.lane.b32.xlu0 %v2130_v33, %s9326_s7 }
 0xf7f   :  { %1407 = vrot.lane.b32.xlu0 %v1382_v54, %s9326_s7 }
 0xf83   :  { %1659 = vrot.lane.b32.xlu0 %v1634_v11, %s9326_s7 }
 0xf87   :  { %1911 = vrot.lane.b32.xlu0 %v1886_v57, %s9326_s7 }
 0xf8b   :  { %2163 = vrot.lane.b32.xlu0 %v2138_v4, %s9326_s7 }
 0xf8f   :  { %654 = vrot.lane.b32.xlu0 %v633_v3, %s9326_s7 }
 0xf93   :  { %907 = vrot.lane.b32.xlu0 %v886_v5, %s9326_s7 }
 0xf97   :  { %1159 = vrot.lane.b32.xlu0 %v1138_v63, %s9326_s7 }
 0xf9b   :  { %1411 = vrot.lane.b32.xlu0 %v1390_v41, %s9326_s7 }
 0xf9f   :  { %1663 = vrot.lane.b32.xlu0 %v1642_v42, %s9326_s7 }
 0xfa3   :  { %1915 = vrot.lane.b32.xlu0 %v1894_v0, %s9326_s7 }
 0xfa7   :  { %2167 = vrot.lane.b32.xlu0 %v2146_v62, %s9326_s7 }
 0xfab   :  { %658 = vrot.lane.b32.xlu0 %v641_v12, %s9326_s7 }
 0xfaf   :  { %911 = vrot.lane.b32.xlu0 %v894_v20, %s9326_s7 }
 0xfb3   :  { %1163 = vrot.lane.b32.xlu0 %v1146_v13, %s9326_s7 }
 0xfb7   :  { %1415 = vrot.lane.b32.xlu0 %v1398_v35, %s9326_s7 }
 0xfbb   :  { %1667 = vrot.lane.b32.xlu0 %v1650_v31, %s9326_s7 }
 0xfbf   :  { %1919 = vrot.lane.b32.xlu0 %v1902_v40, %s9326_s7 }
 0xfc3   :  { %2171 = vrot.lane.b32.xlu0 %v2154_v46, %s9326_s7 }
 0xfc5   :  { %v2218_v50 = vpop.permute.xlu0 %2217 }
 0xfc6   :  { %v2220_v21 = vsel %vm283_vm2, %v2218_v50, %v10252_v47 }
 0xfc7   :  { %v2221_v33 = vpack.c.bf16 %v2220_v21, %v2220_v21 }
 0xfc9   :  { %2351 = vmatmul.mubr.bf16.vlgmr.msra.gmra.mrb[28].mxu1 %v2221_v33  ;;  %v647_v53 = vpop.permute.xlu0 %646  ;;  %v1117_v33 = vcombine.high %v10148_v37, %v10148_v37  ;;  %v1873_v37 = vcombine.high %v10180_v23, %v10180_v23 }
 0xfca   :  { %671 = vst.msk [vmem:[#allocation2] sm:$0x1] %vm670_vm4, %v647_v53 }
 0xfcb   :  { %v1134_v53 = vrot.slane %v1117_v33, %v11665_v39 }
 0xfcd   :  { %v900_v54 = vpop.permute.xlu0 %899 }
 0xfce   :  { %v2162_v27 = vpop.permute.xlu1 %2161  ;;  %923 = vst.msk [vmem:[#allocation2 + $0x1] sm:$0x1] %vm670_vm4, %v900_v54  ;;  %v1369_v54 = vcombine.high %v10160_v22, %v10160_v22  ;;  %v2125_v22 = vcombine.high %v10263_v56, %v10263_v56  ;;  %v1086_v56 = vcombine.high %v10325_v10, %v10325_v10 }
 0xfcf   :  { %2184 = vst.msk [vmem:[#allocation2 + $0xe] sm:$0x1] %vm670_vm4, %v2162_v27 }
 0xfd0   :  { %v1386_v27 = vrot.slane %v1369_v54, %v11665_v39 }
 0xfd1   :  { %v1152_v11 = vpop.permute.xlu0 %1151 }
 0xfd2   :  { %1175 = vst.msk [vmem:[#allocation2 + $0x2] sm:$0x1] %vm670_vm4, %v1152_v11  ;;  %v1621_v11 = vcombine.high %v10172_v8, %v10172_v8  ;;  %v2142_v8 = vrot.slane %v2125_v22, %v11665_v39 }
 0xfd5   :  { %v1404_v18 = vpop.permute.xlu0 %1403 }
 0xfd6   :  { %1427 = vst.msk [vmem:[#allocation2 + $0x3] sm:$0x1] %vm670_vm4, %v1404_v18  ;;  %v1638_v18 = vrot.slane %v1621_v11, %v11665_v39  ;;  %v8873_v11 = vld [vmem:[%s11632_s3 + $0x18] sm:$0xff]  }
 0xfd9   :  { %v1656_v60 = vpop.permute.xlu0 %1655 }
 0xfda   :  { %1679 = vst.msk [vmem:[#allocation2 + $0x4] sm:$0x1] %vm670_vm4, %v1656_v60  ;;  %v1890_v60 = vrot.slane %v1873_v37, %v11665_v39 }
 0xfdd   :  { %v1908_v47 = vpop.permute.xlu0 %1907 }
 0xfde   :  { %1931 = vst.msk [vmem:[#allocation2 + $0x5] sm:$0x1] %vm670_vm4, %v1908_v47  ;;  %v581_v47 = vcombine.high %v10307_v61, %v10307_v61 }
 0xfe1   :  { %v651_v57 = vpop.permute.xlu0 %650 }
 0xfe2   :  { %673 = vst.msk [vmem:[#allocation2 + $0x10] sm:$0x1] %vm670_vm4, %v651_v57  ;;  %v609_v57 = vrot.slane %v581_v47, %v10104_v30 }
 0xfe4   :  { %v637_v23 = vrot.slane %v609_v57, %v11665_v39 }
 0xfe5   :  { %v904_v58 = vpop.permute.xlu0 %903 }
 0xfe6   :  { %925 = vst.msk [vmem:[#allocation2 + $0x11] sm:$0x1] %vm670_vm4, %v904_v58  ;;  %v834_v58 = vcombine.high %v10316_v48, %v10316_v48 }
 0xfe9   :  { %v1156_v1 = vpop.permute.xlu0 %1155 }
 0xfea   :  { %1177 = vst.msk [vmem:[#allocation2 + $0x12] sm:$0x1] %vm670_vm4, %v1156_v1  ;;  %v862_v1 = vrot.slane %v834_v58, %v10104_v30 }
 0xfec   :  { %v890_v61 = vrot.slane %v862_v1, %v11665_v39 }
 0xfed   :  { %v2160_v4 = vpop.permute.xlu0 %2159 }
 0xfee   :  { %2183 = vst.msk [vmem:[#allocation2 + $0x6] sm:$0x1] %vm670_vm4, %v2160_v4  ;;  %v1114_v4 = vrot.slane %v1086_v56, %v10104_v30 }
 0xff0   :  { %v1142_v48 = vrot.slane %v1114_v4, %v11665_v39 }
 0xff1   :  { %v1408_v6 = vpop.permute.xlu0 %1407 }
 0xff2   :  { %1429 = vst.msk [vmem:[#allocation2 + $0x13] sm:$0x1] %vm670_vm4, %v1408_v6  ;;  %v1338_v6 = vcombine.high %v10334_v25, %v10334_v25 }
 0xff5   :  { %v1660_v7 = vpop.permute.xlu0 %1659 }
 0xff6   :  { %1681 = vst.msk [vmem:[#allocation2 + $0x14] sm:$0x1] %vm670_vm4, %v1660_v7  ;;  %v1366_v7 = vrot.slane %v1338_v6, %v10104_v30 }
 0xff8   :  { %v1394_v10 = vrot.slane %v1366_v7, %v11665_v39 }
 0xff9   :  { %v1912_v3 = vpop.permute.xlu0 %1911 }
 0xffa   :  { %1933 = vst.msk [vmem:[#allocation2 + $0x15] sm:$0x1] %vm670_vm4, %v1912_v3  ;;  %v1590_v3 = vcombine.high %v10343_v36, %v10343_v36 }
 0xffd   :  { %v2164_v49 = vpop.permute.xlu0 %2163 }
 0xffe   :  { %2185 = vst.msk [vmem:[#allocation2 + $0x16] sm:$0x1] %vm670_vm4, %v2164_v49  ;;  %v1618_v49 = vrot.slane %v1590_v3, %v10104_v30 }
0x1000   :  { %v1646_v25 = vrot.slane %v1618_v49, %v11665_v39 }
0x1001   :  { %v655_v2 = vpop.permute.xlu0 %654 }
0x1002   :  { %675 = vst.msk [vmem:[#allocation2 + $0x20] sm:$0x1] %vm670_vm4, %v655_v2  ;;  %v1842_v2 = vcombine.high %v10352_v17, %v10352_v17  ;;  %v613_v17 = vcombine.high %v609_v57, %v609_v57  ;;  %v10527_v57 = vld [vmem:[%s11632_s3 + $0x20] sm:$0xff]  }
0x1005   :  { %v908_v5 = vpop.permute.xlu0 %907 }
0x1006   :  { %927 = vst.msk [vmem:[#allocation2 + $0x21] sm:$0x1] %vm670_vm4, %v908_v5  ;;  %v1870_v5 = vrot.slane %v1842_v2, %v10104_v30 }
0x1008   :  { %v1898_v36 = vrot.slane %v1870_v5, %v11665_v39 }
0x1009   :  { %v1160_v16 = vpop.permute.xlu0 %1159 }
0x100a   :  { %1179 = vst.msk [vmem:[#allocation2 + $0x22] sm:$0x1] %vm670_vm4, %v1160_v16  ;;  %v2094_v16 = vcombine.high %v10361_v29, %v10361_v29 }
0x100d   :  { %v1412_v43 = vpop.permute.xlu0 %1411 }
0x100e   :  { %1431 = vst.msk [vmem:[#allocation2 + $0x23] sm:$0x1] %vm670_vm4, %v1412_v43  ;;  %v2122_v43 = vrot.slane %v2094_v16, %v10104_v30 }
0x1011   :  { %v1664_v63 = vpop.permute.xlu0 %1663 }
0x1012   :  { %1683 = vst.msk [vmem:[#allocation2 + $0x24] sm:$0x1] %vm670_vm4, %v1664_v63  ;;  %v2150_v63 = vrot.slane %v2122_v43, %v11665_v39 }
0x1015   :  { %v1916_v32 = vpop.permute.xlu0 %1915 }
0x1016   :  { %1935 = vst.msk [vmem:[#allocation2 + $0x25] sm:$0x1] %vm670_vm4, %v1916_v32  ;;  %v645_v32 = vrot.slane %v613_v17, %v11665_v39 }
0x1019   :  { %v2168_v38 = vpop.permute.xlu0 %2167 }
0x101a   :  { %2187 = vst.msk [vmem:[#allocation2 + $0x26] sm:$0x1] %vm670_vm4, %v2168_v38  ;;  %v866_v38 = vcombine.high %v862_v1, %v862_v1 }
0x101c   :  { %v898_v29 = vrot.slane %v866_v38, %v11665_v39 }
0x101d   :  { %v659_v41 = vpop.permute.xlu0 %658 }
0x101e   :  { %677 = vst.msk [vmem:[#allocation2 + $0x30] sm:$0x1] %vm670_vm4, %v659_v41  ;;  %v1118_v41 = vcombine.high %v1114_v4, %v1114_v4 }
0x1021   :  { %v912_v51 = vpop.permute.xlu0 %911 }
0x1022   :  { %929 = vst.msk [vmem:[#allocation2 + $0x31] sm:$0x1] %vm670_vm4, %v912_v51  ;;  %v1150_v51 = vrot.slane %v1118_v41, %v11665_v39 }
0x1025   :  { %v1164_v55 = vpop.permute.xlu0 %1163 }
0x1026   :  { %1181 = vst.msk [vmem:[#allocation2 + $0x32] sm:$0x1] %vm670_vm4, %v1164_v55  ;;  %v1370_v55 = vcombine.high %v1366_v7, %v1366_v7 }
0x1029   :  { %v1416_v42 = vpop.permute.xlu0 %1415 }
0x102a   :  { %1433 = vst.msk [vmem:[#allocation2 + $0x33] sm:$0x1] %vm670_vm4, %v1416_v42  ;;  %v1402_v42 = vrot.slane %v1370_v55, %v11665_v39 }
0x102d   :  { %v1668_v15 = vpop.permute.xlu0 %1667 }
0x102e   :  { %1685 = vst.msk [vmem:[#allocation2 + $0x34] sm:$0x1] %vm670_vm4, %v1668_v15  ;;  %v1622_v15 = vcombine.high %v1618_v49, %v1618_v49 }
0x1031   :  { %v1920_v0 = vpop.permute.xlu0 %1919 }
0x1032   :  { %1937 = vst.msk [vmem:[#allocation2 + $0x35] sm:$0x1] %vm670_vm4, %v1920_v0  ;;  %v1654_v0 = vrot.slane %v1622_v15, %v11665_v39 }
0x1035   :  { %v2172_v9 = vpop.permute.xlu0 %2171 }
0x1036   :  { %2189 = vst.msk [vmem:[#allocation2 + $0x36] sm:$0x1] %vm670_vm4, %v2172_v9  ;;  %v1874_v9 = vcombine.high %v1870_v5, %v1870_v5 }
0x109c   :  { %v2352_v62 = vpop.f32.mrb[28].mxu1 }
0x109d   :  { %v2353_v34 = vadd.f32 %v2352_v62, %v9715_v52  ;;  %v2354_v12 = vpop.f32.mrb[29].mxu1  ;;  %v1906_v62 = vrot.slane %v1874_v9, %v11665_v39 }
0x109e   :  { %v2355_v19 = vadd.f32 %v2354_v12, %v9719_v59  ;;  %v2356_v20 = vpop.f32.mrb[30].mxu1 }
0x109f   :  { %v2359_v24 = vsub.f32 0.0, %v2353_v34  ;;  %v2357_v13 = vpop.f32.mrb[31].mxu1  ;;  %v2126_v34 = vcombine.high %v2122_v43, %v2122_v43 }
0x10a0   :  { %v2360_v28 = vsub.f32 0.0, %v2355_v19 }
0x10a1   :  { %v2361_v35 = vmul.f32 1.442695, %v2359_v24  ;;  %v2158_v12 = vrot.slane %v2126_v34, %v11665_v39 }
0x10a2   :  { %v2363_v26 = vmul.f32 1.442695, %v2360_v28 }
0x10a3   :  { %9074 = vpow2.f32 %v2361_v35  ;;  %v8870_v35 = vld [vmem:[%s11632_s3] sm:$0xff]  }
0x10a4   :  { %9076 = vpow2.f32 %v2363_v26  ;;  %8187 = vmatprep.subr.bf16.mxu0 %v8870_v35 }
0x10a5   :  { %8188 = vmatpush3.bf16.msra.mxu0 %v8870_v35 }
0x10ad   :  { %v9075_v31 = vpop.eup %9074 }
0x10ae   :  { %v9077_v44 = vpop.eup %9076  ;;  %v2365_v45 = vadd.f32 1.0, %v9075_v31 }
0x10af   :  { %v2366_v40 = vadd.f32 1.0, %v9077_v44 }
0x10b1   :  { %9078 = vrcp.f32 %v2366_v40 }
0x10b2   :  { %9080 = vrcp.f32 %v2365_v45 }
0x10bb   :  { %v10417_v46 = vpop.eup %9078 }
0x10bc   :  { %v2371_v52 = vmul.f32 2.0, %v10417_v46  ;;  %v10420_v59 = vpop.eup %9080 }
0x10bd   :  { %v2373_v19 = vmul.f32 %v10420_v59, %v10242_v14  ;;  %v8871_v14 = vld [vmem:[%s11632_s3 + $0x8] sm:$0xff]  }
0x10be   :  { %v7702_v50 = vadd.f32 -1.0, %v2371_v52  ;;  %8189 = vmatprep.subr.bf16.mxu0 %v8871_v14 }
0x10bf   :  { %8190 = vmatpush3.bf16.msra.mxu0 %v8871_v14  ;;  %v8877_v14 = vld [vmem:[%s11632_s3 + $0x38] sm:$0xff]  }
0x10c0   :  { %v2374_v21 = vmul.f32 %v10420_v59, %v7702_v50  ;;  %v8872_v50 = vld [vmem:[%s11632_s3 + $0x10] sm:$0xff]  }
0x10c1   :  { %8191 = vmatprep.subr.bf16.mxu0 %v8872_v50 }
0x10c2   :  { %2376 = vrot.lane.b32.xlu1 %v2374_v21, %s9326_s7 }
0x10c3   :  { %8192 = vmatpush3.bf16.msra.mxu0 %v8872_v50 }
0x10c4   :  { %8193 = vmatprep.subr.bf16.mxu0 %v8873_v11 }
0x10c6   :  { %1157 = vrot.lane.b32.xlu1 %v1134_v53, %s9326_s7 }
0x10c7   :  { %8194 = vmatpush3.bf16.msra.mxu0 %v8873_v11  ;;  %v10607_v11 = vld [vmem:[#allocation7 + $0x2] ss:$0 sm:$0xff] }
0x10c8   :  { %8203 = vmatprep.subr.bf16.mxu0 %v10527_v57 }
0x10ca   :  { %1409 = vrot.lane.b32.xlu1 %v1386_v27, %s9326_s7 }
0x10ce   :  { %1661 = vrot.lane.b32.xlu1 %v1638_v18, %s9326_s7 }
0x10d2   :  { %1913 = vrot.lane.b32.xlu1 %v1890_v60, %s9326_s7 }
0x10d6   :  { %2165 = vrot.lane.b32.xlu1 %v2142_v8, %s9326_s7 }
0x10da   :  { %656 = vrot.lane.b32.xlu1 %v637_v23, %s9326_s7 }
0x10de   :  { %909 = vrot.lane.b32.xlu1 %v890_v61, %s9326_s7 }
0x10e2   :  { %1161 = vrot.lane.b32.xlu1 %v1142_v48, %s9326_s7 }
0x10e6   :  { %1413 = vrot.lane.b32.xlu1 %v1394_v10, %s9326_s7 }
0x10ea   :  { %1665 = vrot.lane.b32.xlu1 %v1646_v25, %s9326_s7 }
0x10ee   :  { %1917 = vrot.lane.b32.xlu1 %v1898_v36, %s9326_s7 }
0x10f2   :  { %2169 = vrot.lane.b32.xlu1 %v2150_v63, %s9326_s7 }
0x10f6   :  { %660 = vrot.lane.b32.xlu1 %v645_v32, %s9326_s7 }
0x10fa   :  { %913 = vrot.lane.b32.xlu1 %v898_v29, %s9326_s7 }
0x10fe   :  { %1165 = vrot.lane.b32.xlu1 %v1150_v51, %s9326_s7 }
0x1102   :  { %1417 = vrot.lane.b32.xlu1 %v1402_v42, %s9326_s7 }
0x1106   :  { %1669 = vrot.lane.b32.xlu1 %v1654_v0, %s9326_s7 }
0x110a   :  { %1921 = vrot.lane.b32.xlu1 %v1906_v62, %s9326_s7 }
0x110e   :  { %2173 = vrot.lane.b32.xlu1 %v2158_v12, %s9326_s7 }
0x1134   :  { %v2377_v20 = vpop.permute.xlu1 %2376 }
0x1135   :  { %v2379_v24 = vadd.f32 %v2377_v20, %v2373_v19  ;;  %v8875_v19 = vld [vmem:[%s11632_s3 + $0x28] sm:$0xff]  }
0x1137   :  { %9082 = vtanh.f32 %v2379_v24 }
0x1138   :  { %v1158_v13 = vpop.permute.xlu1 %1157 }
0x1139   :  { %1178 = vst.msk [vmem:[#allocation2 + $0x1a] sm:$0x1] %vm670_vm4, %v1158_v13 }
0x113c   :  { %v1410_v28 = vpop.permute.xlu1 %1409 }
0x113d   :  { %1430 = vst.msk [vmem:[#allocation2 + $0x1b] sm:$0x1] %vm670_vm4, %v1410_v28  ;;  %v8876_v28 = vld [vmem:[%s11632_s3 + $0x30] sm:$0xff]  }
0x1140   :  { %v1662_v26 = vpop.permute.xlu1 %1661 }
0x1141   :  { %v9083_v31 = vpop.eup %9082  ;;  %1682 = vst.msk [vmem:[#allocation2 + $0x1c] sm:$0x1] %vm670_vm4, %v1662_v26 }
0x1142   :  { %v2381_v44 = vmul.f32 %v9083_v31, %v10417_v46 }
0x1144   :  { %v1914_v40 = vpop.permute.xlu1 %1913  ;;  %v2390_v45 = vrot.slane %v2381_v44, %v10104_v30  ;;  %v2383_v52 = vcombine.high %v2381_v44, %v2381_v44  ;;  %v9328_v44 = vmov 0.0  }
0x1145   :  { %1934 = vst.msk [vmem:[#allocation2 + $0x1d] sm:$0x1] %vm670_vm4, %v1914_v40  ;;  %8219 = vmatprep.subr.bf16.mxu1 %v9328_v44  ;;  %8221 = vmatprep.mubr.msk.bf16.mxu1 %vm9329_vm5, %v9328_v44 }
0x1146   :  { %v2406_v59 = vrot.slane %v2390_v45, %v10104_v30  ;;  %v2398_v21 = vcombine.high %v2390_v45, %v2390_v45  ;;  %v2397_v33 = vrot.slane %v2383_v52, %v10104_v30 }
0x1148   :  { %v2166_v53 = vpop.permute.xlu1 %2165  ;;  %v2435_v46 = vrot.slane %v2406_v59, %v11665_v39  ;;  %v2420_v54 = vrot.slane %v2398_v21, %v10104_v30  ;;  %v2428_v27 = vcombine.high %v2406_v59, %v2406_v59  ;;  %v2399_v60 = vcombine.high %v2397_v33, %v2397_v33 }
0x1149   :  { %2186 = vst.msk [vmem:[#allocation2 + $0x1e] sm:$0x1] %vm670_vm4, %v2166_v53  ;;  %v2413_v8 = vrot.slane %v2397_v33, %v10104_v30 }
0x114a   :  { %2464 = vrot.lane.b32.xlu0 %v2435_v46, %s9326_s7  ;;  %v2439_v18 = vrot.slane %v2420_v54, %v11665_v39  ;;  %v2430_v37 = vcombine.high %v2420_v54, %v2420_v54  ;;  %v2443_v47 = vrot.slane %v2428_v27, %v11665_v39  ;;  %v2427_v23 = vrot.slane %v2399_v60, %v10104_v30 }
0x114b   :  { %v2451_v56 = vrot.slane %v2413_v8, %v11665_v39  ;;  %v2429_v61 = vcombine.high %v2413_v8, %v2413_v8 }
0x114c   :  { %v657_v22 = vpop.permute.xlu1 %656  ;;  %2466 = vrot.lane.b32.xlu1 %v2439_v18, %s9326_s7  ;;  %v2447_v58 = vrot.slane %v2430_v37, %v11665_v39  ;;  %v2455_v4 = vrot.slane %v2427_v23, %v11665_v39  ;;  %v2431_v6 = vcombine.high %v2427_v23, %v2427_v23 }
0x114d   :  { %676 = vst.msk [vmem:[#allocation2 + $0x28] sm:$0x1] %vm670_vm4, %v657_v22  ;;  %v2459_v30 = vrot.slane %v2429_v61, %v11665_v39 }
0x114e   :  { %2468 = vrot.lane.b32.xlu0 %v2443_v47, %s9326_s7  ;;  %v2463_v7 = vrot.slane %v2431_v6, %v11665_v39 }
0x1150   :  { %v910_v1 = vpop.permute.xlu1 %909  ;;  %2470 = vrot.lane.b32.xlu1 %v2447_v58, %s9326_s7 }
0x1151   :  { %928 = vst.msk [vmem:[#allocation2 + $0x29] sm:$0x1] %vm670_vm4, %v910_v1 }
0x1152   :  { %2472 = vrot.lane.b32.xlu0 %v2451_v56, %s9326_s7 }
0x1154   :  { %v1162_v48 = vpop.permute.xlu1 %1161  ;;  %2474 = vrot.lane.b32.xlu1 %v2455_v4, %s9326_s7 }
0x1155   :  { %1180 = vst.msk [vmem:[#allocation2 + $0x2a] sm:$0x1] %vm670_vm4, %v1162_v48 }
0x1156   :  { %2476 = vrot.lane.b32.xlu0 %v2459_v30, %s9326_s7 }
0x1158   :  { %v1414_v3 = vpop.permute.xlu1 %1413  ;;  %2478 = vrot.lane.b32.xlu1 %v2463_v7, %s9326_s7 }
0x1159   :  { %1432 = vst.msk [vmem:[#allocation2 + $0x2b] sm:$0x1] %vm670_vm4, %v1414_v3 }
0x115c   :  { %v1666_v10 = vpop.permute.xlu1 %1665 }
0x115d   :  { %1684 = vst.msk [vmem:[#allocation2 + $0x2c] sm:$0x1] %vm670_vm4, %v1666_v10 }
0x1160   :  { %v1918_v49 = vpop.permute.xlu1 %1917 }
0x1161   :  { %1936 = vst.msk [vmem:[#allocation2 + $0x2d] sm:$0x1] %vm670_vm4, %v1918_v49 }
0x1164   :  { %v2170_v2 = vpop.permute.xlu1 %2169 }
0x1165   :  { %2188 = vst.msk [vmem:[#allocation2 + $0x2e] sm:$0x1] %vm670_vm4, %v2170_v2 }
0x1168   :  { %v661_v25 = vpop.permute.xlu1 %660 }
0x1169   :  { %678 = vst.msk [vmem:[#allocation2 + $0x38] sm:$0x1] %vm670_vm4, %v661_v25 }
0x116c   :  { %v914_v5 = vpop.permute.xlu1 %913 }
0x116d   :  { %930 = vst.msk [vmem:[#allocation2 + $0x39] sm:$0x1] %vm670_vm4, %v914_v5 }
0x1170   :  { %v1166_v39 = vpop.permute.xlu1 %1165 }
0x1171   :  { %1182 = vst.msk [vmem:[#allocation2 + $0x3a] sm:$0x1] %vm670_vm4, %v1166_v39  ;;  %v8878_v39 = vld [vmem:[%s11633_s4] sm:$0xff]  }
0x1174   :  { %v1418_v16 = vpop.permute.xlu1 %1417 }
0x1175   :  { %1434 = vst.msk [vmem:[#allocation2 + $0x3b] sm:$0x1] %vm670_vm4, %v1418_v16 }
0x1178   :  { %v1670_v36 = vpop.permute.xlu1 %1669 }
0x1179   :  { %1686 = vst.msk [vmem:[#allocation2 + $0x3c] sm:$0x1] %vm670_vm4, %v1670_v36 }
0x117c   :  { %v1922_v43 = vpop.permute.xlu1 %1921 }
0x117d   :  { %1938 = vst.msk [vmem:[#allocation2 + $0x3d] sm:$0x1] %vm670_vm4, %v1922_v43 }
0x1180   :  { %v2174_v63 = vpop.permute.xlu1 %2173 }
0x1181   :  { %2190 = vst.msk [vmem:[#allocation2 + $0x3e] sm:$0x1] %vm670_vm4, %v2174_v63 }
0x11bc   :  { %v2465_v17 = vpop.permute.xlu0 %2464 }
0x11bd   :  { %2488 = vst.msk [vmem:[#allocation2 + $0x7] sm:$0x1] %vm670_vm4, %v2465_v17 }
0x11be   :  { %v2467_v32 = vpop.permute.xlu1 %2466 }
0x11bf   :  { %2489 = vst.msk [vmem:[#allocation2 + $0xf] sm:$0x1] %vm670_vm4, %v2467_v32 }
0x11c0   :  { %v2469_v38 = vpop.permute.xlu0 %2468 }
0x11c1   :  { %2490 = vst.msk [vmem:[#allocation2 + $0x17] sm:$0x1] %vm670_vm4, %v2469_v38 }
0x11c2   :  { %v2471_v29 = vpop.permute.xlu1 %2470 }
0x11c3   :  { %2491 = vst.msk [vmem:[#allocation2 + $0x1f] sm:$0x1] %vm670_vm4, %v2471_v29  ;;  %v8879_v29 = vld [vmem:[%s11633_s4 + $0x8] sm:$0xff]  }
0x11c4   :  { %v2473_v41 = vpop.permute.xlu0 %2472  ;;  %v2496_v51 = vld [vmem:[#allocation2] sm:$0xff] }
0x11c5   :  { %2492 = vst.msk [vmem:[#allocation2 + $0x27] sm:$0x1] %vm670_vm4, %v2473_v41 }
0x11c6   :  { %v2497_v55 = vld [vmem:[#allocation2 + $0x8] sm:$0xff]  ;;  %v2475_v42 = vpop.permute.xlu1 %2474 }
0x11c7   :  { %v10560_v15 = vpack.c.bf16 %v2497_v55, %v2496_v51  ;;  %2493 = vst.msk [vmem:[#allocation2 + $0x2f] sm:$0x1] %vm670_vm4, %v2475_v42  ;;  %v8880_v55 = vld [vmem:[%s11633_s4 + $0x10] sm:$0xff]  }
0x11c8   :  { %v2477_v0 = vpop.permute.xlu0 %2476  ;;  %v2498_v9 = vld [vmem:[#allocation2 + $0x10] sm:$0xff] }
0x11c9   :  { %2494 = vst.msk [vmem:[#allocation2 + $0x37] sm:$0x1] %vm670_vm4, %v2477_v0  ;;  %8195 = vmatprep.mubr.msk.bf16.mxu0 %vm283_vm2, %v10560_v15 }
0x11ca   :  { %v2499_v62 = vld [vmem:[#allocation2 + $0x18] sm:$0xff]  ;;  %v2479_v34 = vpop.permute.xlu1 %2478 }
0x11cb   :  { %v10566_v12 = vpack.c.bf16 %v2499_v62, %v2498_v9  ;;  %2495 = vst.msk [vmem:[#allocation2 + $0x3f] sm:$0x1] %vm670_vm4, %v2479_v34  ;;  %v8881_v9 = vld [vmem:[%s11633_s4 + $0x18] sm:$0xff]  }
0x11cc   :  { %v2500_v20 = vld [vmem:[#allocation2 + $0x20] sm:$0xff] }
0x11cd   :  { %8196 = vmatmul.mubr.msk.bf16.vlgmr.msra.gmra.mrb[44].mxu0 %vm283_vm2, %v10566_v12 }
0x11ce   :  { %v2501_v24 = vld [vmem:[#allocation2 + $0x28] sm:$0xff]  ;;  %8204 = vmatpush3.bf16.msra.mxu0 %v10527_v57 }
0x11cf   :  { %v10575_v13 = vpack.c.bf16 %v2501_v24, %v2500_v20  ;;  %8205 = vmatprep.subr.bf16.mxu0 %v8875_v19 }
0x11d0   :  { %v2502_v35 = vld [vmem:[#allocation2 + $0x30] sm:$0xff] }
0x11d1   :  { %8199 = vmatprep.mubr.msk.bf16.mxu0 %vm283_vm2, %v10575_v13 }
0x11d2   :  { %v2503_v26 = vld [vmem:[#allocation2 + $0x38] sm:$0xff]  ;;  %8206 = vmatpush3.bf16.msra.mxu0 %v8875_v19 }
0x11d3   :  { %v10582_v31 = vpack.c.bf16 %v2503_v26, %v2502_v35  ;;  %8207 = vmatprep.subr.bf16.mxu0 %v8876_v28 }
0x11d5   :  { %8200 = vmatmul.mubr.msk.bf16.gmra.mrb[48].mxu0 %vm283_vm2, %v10582_v31 }
0x11d6   :  { %8208 = vmatpush3.bf16.msra.mxu0 %v8876_v28  ;;  %8211 = vmatprep.mubr.msk.bf16.mxu0 %vm283_vm2, %v10560_v15 }
0x11d7   :  { %8209 = vmatprep.subr.bf16.mxu0 %v8877_v14 }
0x11da   :  { %8210 = vmatpush3.bf16.msra.mxu0 %v8877_v14 }
0x11db   :  { %8231 = vmatprep.subr.bf16.mxu0 %v9328_v44 }
0x11dd   :  { %8212 = vmatmul.mubr.msk.bf16.vlgmr.msra.gmra.mrb[52].mxu0 %vm283_vm2, %v10566_v12 }
0x11de   :  { %8215 = vmatprep.mubr.msk.bf16.mxu0 %vm283_vm2, %v10575_v13 }
0x11e5   :  { %8216 = vmatmul.mubr.msk.bf16.gmra.mrb[56].mxu0 %vm283_vm2, %v10582_v31 }
0x11e6   :  { %8233 = vmatprep.mubr.msk.bf16.mxu0 %vm9329_vm5, %v9328_v44 }
0x12a0   :  { %v8197_v40 = vpop.f32.mrb[44].mxu0 }
0x12a1   :  { %v2587_v45 = vpop.f32.mrb[45].mxu0  ;;  %v2596_v8 = vadd.f32 %v8197_v40, %v10607_v11 }
0x12a2   :  { %v8198_v52 = vpop.f32.mrb[46].mxu0  ;;  %v2588_v57 = vadd.f32 %v2587_v45, %v10607_v11 }
0x12a3   :  { %v2590_v50 = vpop.f32.mrb[47].mxu0  ;;  %v2620_v1 = vpack.c.bf16 %v2596_v8, %v2596_v8  ;;  %v2599_v43 = vadd.f32 %v8198_v52, %v10607_v11 }
0x12a4   :  { %v2618_v61 = vpack.c.bf16 %v2588_v57, %v2588_v57  ;;  %v2591_v3 = vadd.f32 %v2590_v50, %v10607_v11 }
0x12a5   :  { %v2621_v32 = vpack.c.bf16 %v2599_v43, %v2599_v43 }
0x12a6   :  { %v2619_v25 = vpack.c.bf16 %v2591_v3, %v2591_v3 }
0x12a8   :  { %v8201_v59 = vpop.f32.mrb[48].mxu0 }
0x12a9   :  { %v2603_v21 = vpop.f32.mrb[49].mxu0  ;;  %v2612_v63 = vadd.f32 %v8201_v59, %v10607_v11 }
0x12aa   :  { %v10603_v33 = vpop.f32.mrb[50].mxu0  ;;  %v2604_v10 = vadd.f32 %v2603_v21, %v10607_v11 }
0x12ab   :  { %v10605_v53 = vpop.f32.mrb[51].mxu0  ;;  %v2624_v38 = vpack.c.bf16 %v2612_v63, %v2612_v63  ;;  %v2615_v34 = vadd.f32 %v10603_v33, %v10607_v11 }
0x12ac   :  { %v2622_v5 = vpack.c.bf16 %v2604_v10, %v2604_v10  ;;  %v2607_v51 = vadd.f32 %v10605_v53, %v10607_v11 }
0x12ad   :  { %v2625_v19 = vpack.c.bf16 %v2615_v34, %v2615_v34 }
0x12ae   :  { %v2623_v0 = vpack.c.bf16 %v2607_v51, %v2607_v51 }
0x12b0   :  { %v8213_v46 = vpop.f32.mrb[52].mxu0 }
0x12b1   :  { %v2726_v54 = vpack.c.bf16 %v8213_v46, %v8213_v46  ;;  %v2693_v27 = vpop.f32.mrb[53].mxu0 }
0x12b2   :  { %v2724_v18 = vpack.c.bf16 %v2693_v27, %v2693_v27  ;;  %v8214_v37 = vpop.f32.mrb[54].mxu0 }
0x12b3   :  { %v2829_v60 = vsel %vm2732_vm6, %v2726_v54, 0  ;;  %v2696_v22 = vpop.f32.mrb[55].mxu0  ;;  %v2727_v49 = vpack.c.bf16 %v8214_v37, %v8214_v37 }
0x12b4   :  { %v2737_v47 = vsel %vm2732_vm6, %v2724_v18, 0  ;;  %8232 = vmatpush3.bf16.xpose.msra.mxu0 %v2829_v60  ;;  %v2725_v58 = vpack.c.bf16 %v2696_v22, %v2696_v22 }
0x12b5   :  { %8220 = vmatpush3.bf16.xpose.msra.mxu1 %v2737_v47  ;;  %8243 = vmatprep.subr.bf16.mxu0 %v9328_v44  ;;  %v2875_v16 = vsel %vm2732_vm6, %v2727_v49, 0 }
0x12b6   :  { %8225 = vmatprep.subr.bf16.mxu1 %v9328_v44  ;;  %v2783_v30 = vsel %vm2732_vm6, %v2725_v58, 0 }
0x12b8   :  { %v8217_v23 = vpop.f32.mrb[56].mxu0 }
0x12b9   :  { %v2709_v56 = vpop.f32.mrb[57].mxu0  ;;  %v2730_v2 = vpack.c.bf16 %v8217_v23, %v8217_v23 }
0x12ba   :  { %v2728_v4 = vpack.c.bf16 %v2709_v56, %v2709_v56  ;;  %v8218_v6 = vpop.f32.mrb[58].mxu0 }
0x12bb   :  { %v2712_v48 = vpop.f32.mrb[59].mxu0  ;;  %8234 = vmatmul.mubr.msk.bf16.vlgmr.msra.gmra.mrb[60].mxu0 %vm2732_vm6, %v2620_v1  ;;  %v3013_v36 = vsel %vm2732_vm6, %v2730_v2, 0  ;;  %v2731_v42 = vpack.c.bf16 %v8218_v6, %v8218_v6 }
0x12bc   :  { %v2921_v7 = vsel %vm2732_vm6, %v2728_v4, 0  ;;  %8222 = vmatmul.mubr.msk.bf16.vlgmr.msra.gmra.mrb[32].mxu1 %vm2732_vm6, %v2618_v61  ;;  %8245 = vmatprep.mubr.msk.bf16.mxu0 %vm9329_vm5, %v9328_v44  ;;  %v2729_v17 = vpack.c.bf16 %v2712_v48, %v2712_v48 }
0x12bd   :  { %8226 = vmatpush3.bf16.xpose.msra.mxu1 %v2783_v30  ;;  %8244 = vmatpush3.bf16.xpose.msra.mxu0 %v2921_v7  ;;  %v3059_v62 = vsel %vm2732_vm6, %v2731_v42, 0 }
0x12be   :  { %8227 = vmatprep.mubr.msk.bf16.mxu1 %vm9329_vm5, %v9328_v44  ;;  %8237 = vmatprep.subr.bf16.mxu1 %v9328_v44  ;;  %v2967_v41 = vsel %vm2732_vm6, %v2729_v17, 0 }
0x12bf   :  { %8255 = vmatprep.subr.bf16.mxu0 %v9328_v44 }
0x12c4   :  { %8228 = vmatmul.mubr.msk.bf16.vlgmr.msra.gmra.mrb[36].mxu1 %vm2732_vm6, %v2619_v25  ;;  %8246 = vmatmul.mubr.msk.bf16.vlgmr.msra.gmra.mrb[64].mxu0 %vm2732_vm6, %v2622_v5 }
0x12c5   :  { %8238 = vmatpush3.bf16.xpose.msra.mxu1 %v2875_v16  ;;  %8256 = vmatpush3.bf16.xpose.msra.mxu0 %v3013_v36 }
0x12c6   :  { %8239 = vmatprep.mubr.msk.bf16.mxu1 %vm9329_vm5, %v9328_v44  ;;  %8257 = vmatprep.mubr.msk.bf16.mxu0 %vm9329_vm5, %v9328_v44 }
0x12c7   :  { %8249 = vmatprep.subr.bf16.mxu1 %v9328_v44  ;;  %8267 = vmatprep.subr.bf16.mxu0 %v8878_v39 }
0x12cc   :  { %8240 = vmatmul.mubr.msk.bf16.vlgmr.msra.gmra.mrb[40].mxu1 %vm2732_vm6, %v2621_v32  ;;  %8258 = vmatmul.mubr.msk.bf16.vlgmr.msra.gmra.mrb[68].mxu0 %vm2732_vm6, %v2624_v38 }
0x12cd   :  { %8250 = vmatpush3.bf16.xpose.msra.mxu1 %v2967_v41  ;;  %8268 = vmatpush3.bf16.msra.mxu0 %v8878_v39 }
0x12ce   :  { %8275 = vmatprep.mubr.msk.bf16.mxu0 %vm283_vm2, %v10560_v15  ;;  %8269 = vmatprep.subr.bf16.mxu0 %v8879_v29 }
0x12cf   :  { %8251 = vmatprep.mubr.msk.bf16.mxu1 %vm9329_vm5, %v9328_v44  ;;  %8261 = vmatprep.subr.bf16.mxu1 %v9328_v44 }
0x12d1   :  { %8270 = vmatpush3.bf16.msra.mxu0 %v8879_v29 }
0x12d2   :  { %8271 = vmatprep.subr.bf16.mxu0 %v8880_v55 }
0x12d4   :  { %8252 = vmatmul.mubr.msk.bf16.vlgmr.msra.gmra.mrb[44].mxu1 %vm2732_vm6, %v2623_v0 }
0x12d5   :  { %8262 = vmatpush3.bf16.xpose.msra.mxu1 %v3059_v62  ;;  %8272 = vmatpush3.bf16.msra.mxu0 %v8880_v55 }
0x12d6   :  { %8273 = vmatprep.subr.bf16.mxu0 %v8881_v9  ;;  %8263 = vmatprep.mubr.msk.bf16.mxu1 %vm9329_vm5, %v9328_v44 }
0x12d7   :  { %8283 = vmatprep.subr.bf16.mxu1 %v9328_v44 }
0x12d9   :  { %8274 = vmatpush3.bf16.msra.mxu0 %v8881_v9 }
0x12da   :  { %8301 = vmatprep.subr.bf16.mxu0 %v9328_v44 }
0x12dc   :  { %8264 = vmatmul.mubr.msk.bf16.vlgmr.msra.gmra.mrb[48].mxu1 %vm2732_vm6, %v2625_v19  ;;  %8276 = vmatmul.mubr.msk.bf16.vlgmr.msra.gmra.mrb[72].mxu0 %vm283_vm2, %v10566_v12 }
0x12dd   :  { %8279 = vmatprep.mubr.msk.bf16.mxu0 %vm283_vm2, %v10575_v13  ;;  %8285 = vmatprep.mubr.msk.bf16.mxu1 %vm9329_vm5, %v9328_v44 }
0x12e4   :  { %8280 = vmatmul.mubr.msk.bf16.gmra.mrb[76].mxu0 %vm283_vm2, %v10582_v31 }
0x12e5   :  { %8303 = vmatprep.mubr.msk.bf16.mxu0 %vm9329_vm5, %v9328_v44 }
0x138e   :  { %v10679_v20 = vpop.f32.mrb[60].mxu0 }
0x138f   :  { %v10681_v24 = vpop.f32.mrb[32].mxu1  ;;  %v8235_v28 = vpop.f32.mrb[61].mxu0  ;;  %v3108_v1 = vsel %vm3101_vm7, %v10679_v20, -inf }
0x1390   :  { %v8223_v35 = vpop.f32.mrb[33].mxu1  ;;  %v2868_v26 = vpop.f32.mrb[62].mxu0  ;;  %v3102_v14 = vsel %vm3101_vm7, %v10681_v24, -inf }
0x1391   :  { %3103 = vmax.xlane.f32.xlu0 %v3102_v14  ;;  %v2776_v40 = vpop.f32.mrb[34].mxu1  ;;  %v8236_v45 = vpop.f32.mrb[63].mxu0 }
0x1392   :  { %v8224_v52 = vpop.f32.mrb[35].mxu1 }
0x1397   :  { %v2819_v50 = vpop.f32.mrb[36].mxu1  ;;  %v10685_v59 = vpop.f32.mrb[64].mxu0 }
0x1398   :  { %v8229_v21 = vpop.f32.mrb[37].mxu1  ;;  %v8247_v33 = vpop.f32.mrb[65].mxu0  ;;  %v3105_v53 = vsel %vm3101_vm7, %v2819_v50, -inf  ;;  %v3114_v6 = vsel %vm3101_vm7, %v10685_v59, -inf }
0x1399   :  { %3106 = vmax.xlane.f32.xlu1 %v3105_v53  ;;  %v2822_v46 = vpop.f32.mrb[38].mxu1  ;;  %v2960_v54 = vpop.f32.mrb[66].mxu0 }
0x139a   :  { %v8230_v27 = vpop.f32.mrb[39].mxu1  ;;  %v8248_v11 = vpop.f32.mrb[67].mxu0 }
0x139f   :  { %v2911_v18 = vpop.f32.mrb[40].mxu1  ;;  %v10688_v37 = vpop.f32.mrb[68].mxu0 }
0x13a0   :  { %v8241_v60 = vpop.f32.mrb[41].mxu1  ;;  %v8259_v22 = vpop.f32.mrb[69].mxu0  ;;  %v3111_v47 = vsel %vm3101_vm7, %v2911_v18, -inf  ;;  %v3120_v7 = vsel %vm3101_vm7, %v10688_v37, -inf }
0x13a1   :  { %3112 = vmax.xlane.f32.xlu0 %v3111_v47  ;;  %v2914_v8 = vpop.f32.mrb[42].mxu1  ;;  %v3052_v57 = vpop.f32.mrb[70].mxu0 }
0x13a2   :  { %v8242_v58 = vpop.f32.mrb[43].mxu1  ;;  %v8260_v23 = vpop.f32.mrb[71].mxu0 }
0x13a5   :  { %3109 = vmax.xlane.f32.xlu0 %v3108_v1 }
0x13a7   :  { %v3003_v56 = vpop.f32.mrb[44].mxu1 }
0x13a8   :  { %v8253_v61 = vpop.f32.mrb[45].mxu1  ;;  %v3117_v4 = vsel %vm3101_vm7, %v3003_v56, -inf }
0x13a9   :  { %3118 = vmax.xlane.f32.xlu1 %v3117_v4  ;;  %v3006_v48 = vpop.f32.mrb[46].mxu1  ;;  %3115 = vmax.xlane.f32.xlu0 %v3114_v6 }
0x13aa   :  { %v8254_v30 = vpop.f32.mrb[47].mxu1 }
0x13ad   :  { %3121 = vmax.xlane.f32.xlu0 %v3120_v7 }
0x13af   :  { %v10698_v3 = vpop.f32.mrb[48].mxu1  ;;  %v10700_v10 = vpop.f32.mrb[72].mxu0 }
0x13b0   :  { %v8265_v49 = vpop.f32.mrb[49].mxu1  ;;  %v3329_v2 = vpop.f32.mrb[73].mxu0  ;;  %v3123_v25 = vsel %vm3101_vm7, %v10698_v3, -inf }
0x13b1   :  { %v3360_v5 = vpack.c.bf16 %v3329_v2, %v3329_v2  ;;  %3124 = vmax.xlane.f32.xlu1 %v3123_v25  ;;  %v3098_v39 = vpop.f32.mrb[50].mxu1  ;;  %v8278_v16 = vpop.f32.mrb[74].mxu0 }
0x13b2   :  { %v3363_v36 = vpack.c.bf16 %v8278_v16, %v8278_v16  ;;  %v8266_v43 = vpop.f32.mrb[51].mxu1  ;;  %v10704_v63 = vpop.f32.mrb[75].mxu0 }
0x13b3   :  { %v3373_v17 = vsel %vm3371_vm8, %v3360_v5, 0 }
0x13b4   :  { %v3511_v32 = vsel %vm3371_vm8, %v3363_v36, 0  ;;  %8284 = vmatpush3.bf16.msra.mxu1 %v3373_v17 }
0x13b5   :  { %8302 = vmatpush3.bf16.msra.mxu0 %v3511_v32  ;;  %8289 = vmatprep.subr.bf16.mxu1 %v9328_v44 }
0x13b6   :  { %8313 = vmatprep.subr.bf16.mxu0 %v9328_v44 }
0x13b7   :  { %v10710_v38 = vpop.f32.mrb[76].mxu0 }
0x13b8   :  { %v10712_v29 = vpop.f32.mrb[77].mxu0 }
0x13b9   :  { %v10714_v41 = vpop.f32.mrb[78].mxu0 }
0x13ba   :  { %v10716_v51 = vpop.f32.mrb[79].mxu0 }
0x141e   :  { %v3104_v55 = vpop.xlane.xlu0 %3103 }
0x141f   :  { %v3126_v42 = vsub.f32 %v10681_v24, %v3104_v55 }
0x1421   :  { %v3134_v0 = vmul.f32 1.442695, %v3126_v42 }
0x1423   :  { %9084 = vpow2.f32 %v3134_v0 }
0x1426   :  { %v3107_v9 = vpop.xlane.xlu1 %3106 }
0x1427   :  { %v3127_v62 = vsub.f32 %v2819_v50, %v3107_v9 }
0x1429   :  { %v3136_v34 = vmul.f32 1.442695, %v3127_v62 }
0x142b   :  { %9086 = vpow2.f32 %v3136_v34 }
0x142d   :  { %v9085_v19 = vpop.eup %9084 }
0x142e   :  { %v3113_v28 = vpop.xlane.xlu0 %3112  ;;  %v3150_v35 = vsel %vm3101_vm7, %v9085_v19, 0.0 }
0x142f   :  { %v3129_v26 = vsub.f32 %v2911_v18, %v3113_v28  ;;  %3151 = vadd.xlane.f32.xlu1 %v3150_v35  ;;  %v3361_v35 = vpack.c.bf16 %v10704_v63, %v10704_v63 }
0x1431   :  { %v3140_v14 = vmul.f32 1.442695, %v3129_v26 }
0x1432   :  { %v3110_v40 = vpop.xlane.xlu0 %3109 }
0x1433   :  { %9088 = vpow2.f32 %v3140_v14  ;;  %v3128_v45 = vsub.f32 %v10679_v20, %v3110_v40 }
0x1435   :  { %v9087_v52 = vpop.eup %9086  ;;  %v3138_v21 = vmul.f32 1.442695, %v3128_v45 }
0x1436   :  { %v3119_v24 = vpop.xlane.xlu1 %3118  ;;  %v3116_v33 = vpop.xlane.xlu0 %3115  ;;  %v3153_v53 = vsel %vm3101_vm7, %v9087_v52, 0.0 }
0x1437   :  { %9090 = vpow2.f32 %v3138_v21  ;;  %v3131_v50 = vsub.f32 %v3003_v56, %v3119_v24  ;;  %v3130_v46 = vsub.f32 %v10685_v59, %v3116_v33  ;;  %3154 = vadd.xlane.f32.xlu0 %v3153_v53  ;;  %v3419_v53 = vsel %vm3371_vm8, %v3361_v35, 0 }
0x1439   :  { %v3144_v54 = vmul.f32 1.442695, %v3131_v50  ;;  %v3142_v27 = vmul.f32 1.442695, %v3130_v46 }
0x143a   :  { %v3122_v11 = vpop.xlane.xlu0 %3121 }
0x143b   :  { %9092 = vpow2.f32 %v3144_v54  ;;  %v3132_v18 = vsub.f32 %v10688_v37, %v3122_v11 }
0x143c   :  { %9094 = vpow2.f32 %v3142_v27 }
0x143d   :  { %v9089_v60 = vpop.eup %9088  ;;  %v3146_v20 = vmul.f32 1.442695, %v3132_v18  ;;  %v3362_v18 = vpack.c.bf16 %v10700_v10, %v10700_v10 }
0x143e   :  { %v3125_v22 = vpop.xlane.xlu1 %3124  ;;  %v3159_v47 = vsel %vm3101_vm7, %v9089_v60, 0.0 }
0x143f   :  { %9096 = vpow2.f32 %v3146_v20  ;;  %v3133_v8 = vsub.f32 %v10698_v3, %v3125_v22  ;;  %3160 = vadd.xlane.f32.xlu1 %v3159_v47 }
0x1441   :  { %v9091_v57 = vpop.eup %9090  ;;  %v3148_v58 = vmul.f32 1.442695, %v3133_v8 }
0x1442   :  { %v3156_v59 = vsel %vm3101_vm7, %v9091_v57, 0.0 }
0x1443   :  { %9098 = vpow2.f32 %v3148_v58  ;;  %3157 = vadd.xlane.f32.xlu0 %v3156_v59 }
0x1445   :  { %v10727_v23 = vpop.eup %9092 }
0x1446   :  { %v10729_v1 = vpop.eup %9094  ;;  %v3165_v37 = vsel %vm3101_vm7, %v10727_v23, 0.0 }
0x1447   :  { %3166 = vadd.xlane.f32.xlu1 %v3165_v37  ;;  %v3162_v56 = vsel %vm3101_vm7, %v10729_v1, 0.0 }
0x1448   :  { %3163 = vadd.xlane.f32.xlu0 %v3162_v56 }
0x1449   :  { %v10735_v61 = vpop.eup %9096 }
0x144a   :  { %v3168_v4 = vsel %vm3101_vm7, %v10735_v61, 0.0 }
0x144c   :  { %3169 = vadd.xlane.f32.xlu0 %v3168_v4 }
0x144d   :  { %v10739_v6 = vpop.eup %9098 }
0x144e   :  { %v3171_v48 = vsel %vm3101_vm7, %v10739_v6, 0.0 }
0x144f   :  { %3172 = vadd.xlane.f32.xlu1 %v3171_v48  ;;  %v3465_v48 = vsel %vm3371_vm8, %v3362_v18, 0 }
0x14bc   :  { %v3152_v30 = vpop.xlane.xlu1 %3151 }
0x14bd   :  { %9100 = vrcp.f32 %v3152_v30 }
0x14c4   :  { %v3155_v7 = vpop.xlane.xlu0 %3154 }
0x14c5   :  { %9102 = vrcp.f32 %v3155_v7 }
0x14c7   :  { %v9101_v3 = vpop.eup %9100 }
0x14c8   :  { %v3175_v49 = vmul.f32 %v9101_v3, %v9085_v19 }
0x14ca   :  { %v3190_v2 = vsel %vm3101_vm7, %v3175_v49, 0.0 }
0x14cb   :  { %v3191_v25 = vrot.slane %v3190_v2, 4 }
0x14cc   :  { %v3161_v5 = vpop.xlane.xlu1 %3160 }
0x14cd   :  { %v3192_v39 = vadd.f32 %v3191_v25, %v3190_v2  ;;  %9104 = vrcp.f32 %v3161_v5 }
0x14cf   :  { %v9103_v16 = vpop.eup %9102  ;;  %v3193_v36 = vrot.slane %v3192_v39, 2 }
0x14d0   :  { %v3177_v43 = vmul.f32 %v9103_v16, %v9087_v52  ;;  %v3158_v17 = vpop.xlane.xlu0 %3157  ;;  %v3365_v16 = vpack.c.bf16 %v10716_v51, %v10716_v51 }
0x14d1   :  { %9106 = vrcp.f32 %v3158_v17  ;;  %v3194_v32 = vadd.f32 %v3193_v36, %v3192_v39 }
0x14d2   :  { %v3197_v55 = vsel %vm3101_vm7, %v3177_v43, 0.0 }
0x14d3   :  { %v3198_v42 = vrot.slane %v3197_v55, 4  ;;  %v3195_v0 = vrot.slane %v3194_v32, 1 }
0x14d4   :  { %v3167_v9 = vpop.xlane.xlu1 %3166 }
0x14d5   :  { %v3199_v62 = vadd.f32 %v3198_v42, %v3197_v55  ;;  %9108 = vrcp.f32 %v3167_v9  ;;  %v3164_v34 = vpop.xlane.xlu0 %3163  ;;  %v3196_v19 = vadd.f32 %v3195_v0, %v3194_v32 }
0x14d6   :  { %9110 = vrcp.f32 %v3164_v34 }
0x14d7   :  { %v9105_v28 = vpop.eup %9104  ;;  %v3200_v26 = vrot.slane %v3199_v62, 2  ;;  %v3247_v14 = vmul.f32 0.125, %v3196_v19 }
0x14d8   :  { %v3181_v40 = vmul.f32 %v9105_v28, %v9089_v60  ;;  %v3364_v28 = vpack.c.bf16 %v10712_v29, %v10712_v29 }
0x14d9   :  { %v3170_v45 = vpop.xlane.xlu0 %3169  ;;  %v3255_v52 = vpack.c.bf16 %v3247_v14, %v3247_v14  ;;  %v3201_v21 = vadd.f32 %v3200_v26, %v3199_v62  ;;  %v3603_v14 = vsel %vm3371_vm8, %v3365_v16, 0 }
0x14da   :  { %v3211_v24 = vsel %vm3101_vm7, %v3181_v40, 0.0  ;;  %9112 = vrcp.f32 %v3170_v45 }
0x14db   :  { %v9107_v33 = vpop.eup %9106  ;;  %v3212_v50 = vrot.slane %v3211_v24, 4  ;;  %8286 = vmatmul.mubr.msk.bf16.vlgmr.msra.gmra.mrb[52].mxu1 %vm3101_vm7, %v3255_v52  ;;  %v3202_v46 = vrot.slane %v3201_v21, 1 }
0x14dc   :  { %v3179_v54 = vmul.f32 %v9107_v33, %v9091_v57  ;;  %8290 = vmatpush3.bf16.msra.mxu1 %v3419_v53  ;;  %v3173_v27 = vpop.xlane.xlu1 %3172  ;;  %8291 = vmatprep.mubr.msk.bf16.mxu1 %vm9329_vm5, %v9328_v44 }
0x14dd   :  { %v3213_v63 = vadd.f32 %v3212_v50, %v3211_v24  ;;  %9114 = vrcp.f32 %v3173_v27  ;;  %8295 = vmatprep.subr.bf16.mxu1 %v9328_v44  ;;  %v3203_v11 = vadd.f32 %v3202_v46, %v3201_v21  ;;  %v3557_v46 = vsel %vm3371_vm8, %v3364_v28, 0 }
0x14de   :  { %v3204_v60 = vsel %vm3101_vm7, %v3179_v54, 0.0  ;;  %v3367_v54 = vpack.c.bf16 %v10714_v41, %v10714_v41  ;;  %v3366_v41 = vpack.c.bf16 %v10710_v38, %v10710_v38 }
0x14df   :  { %v9109_v20 = vpop.eup %9108  ;;  %v3214_v22 = vrot.slane %v3213_v63, 2  ;;  %v3205_v47 = vrot.slane %v3204_v60, 4  ;;  %v3248_v8 = vmul.f32 0.125, %v3203_v11 }
0x14e0   :  { %v9111_v57 = vpop.eup %9110  ;;  %v3185_v58 = vmul.f32 %v9109_v20, %v10727_v23 }
0x14e1   :  { %v3215_v59 = vadd.f32 %v3214_v22, %v3213_v63  ;;  %v3206_v37 = vadd.f32 %v3205_v47, %v3204_v60  ;;  %v3183_v56 = vmul.f32 %v9111_v57, %v10729_v1  ;;  %v3256_v4 = vpack.c.bf16 %v3248_v8, %v3248_v8  ;;  %v8882_v60 = vld [vmem:[%s11632_s3 + $0x60] sm:$0xff]  }
0x14e2   :  { %v3225_v30 = vsel %vm3101_vm7, %v3185_v58, 0.0  ;;  %v3695_v47 = vsel %vm3371_vm8, %v3367_v54, 0 }
0x14e3   :  { %v3216_v7 = vrot.slane %v3215_v59, 1  ;;  %v3207_v10 = vrot.slane %v3206_v37, 2  ;;  %v3226_v3 = vrot.slane %v3225_v30, 4  ;;  %v3218_v49 = vsel %vm3101_vm7, %v3183_v56, 0.0  ;;  %8292 = vmatmul.mubr.msk.bf16.vlgmr.msra.gmra.mrb[56].mxu1 %vm3101_vm7, %v3256_v4 }
0x14e4   :  { %v9113_v2 = vpop.eup %9112  ;;  %v3219_v25 = vrot.slane %v3218_v49, 4  ;;  %8296 = vmatpush3.bf16.msra.mxu1 %v3465_v48  ;;  %8297 = vmatprep.mubr.msk.bf16.mxu1 %vm9329_vm5, %v9328_v44  ;;  %v3649_v56 = vsel %vm3371_vm8, %v3366_v41, 0  ;;  %v8884_v48 = vld [vmem:[%s11632_s3 + $0x68] sm:$0xff]  }
0x14e5   :  { %v3227_v23 = vadd.f32 %v3226_v3, %v3225_v30  ;;  %v3187_v1 = vmul.f32 %v9113_v2, %v10735_v61  ;;  %v3217_v5 = vadd.f32 %v3216_v7, %v3215_v59  ;;  %8307 = vmatprep.subr.bf16.mxu1 %v9328_v44  ;;  %v3208_v39 = vadd.f32 %v3207_v10, %v3206_v37  ;;  %v8883_v59 = vld [vmem:[%s11632_s3 + $0x40] sm:$0xff]   ;;  %v8885_v10 = vld [vmem:[%s11632_s3 + $0x48] sm:$0xff]   ;;  %v8886_v3 = vld [vmem:[%s11632_s3 + $0x70] sm:$0xff]  }
0x14e6   :  { %v3220_v36 = vadd.f32 %v3219_v25, %v3218_v49  ;;  %v8887_v49 = vld [vmem:[%s11632_s3 + $0x50] sm:$0xff]   ;;  %v8888_v2 = vld [vmem:[%s11632_s3 + $0x78] sm:$0xff]  }
0x14e7   :  { %v9115_v43 = vpop.eup %9114  ;;  %v3228_v17 = vrot.slane %v3227_v23, 2  ;;  %v3232_v32 = vsel %vm3101_vm7, %v3187_v1, 0.0  ;;  %v3250_v55 = vmul.f32 0.125, %v3217_v5  ;;  %v3209_v42 = vrot.slane %v3208_v39, 1  ;;  %v8889_v25 = vld [vmem:[%s11632_s3 + $0x58] sm:$0xff]  }
0x14e8   :  { %v3221_v0 = vrot.slane %v3220_v36, 2  ;;  %v3233_v9 = vrot.slane %v3232_v32, 4  ;;  %v3189_v62 = vmul.f32 %v9115_v43, %v10739_v6 }
0x14e9   :  { %v3258_v34 = vpack.c.bf16 %v3250_v55, %v3250_v55  ;;  %v3210_v61 = vadd.f32 %v3209_v42, %v3208_v39  ;;  %v3229_v19 = vadd.f32 %v3228_v17, %v3227_v23 }
0x14ea   :  { %v3234_v35 = vadd.f32 %v3233_v9, %v3232_v32  ;;  %v3239_v51 = vsel %vm3101_vm7, %v3189_v62, 0.0  ;;  %v3222_v26 = vadd.f32 %v3221_v0, %v3220_v36 }
0x14eb   :  { %v3240_v40 = vrot.slane %v3239_v51, 4  ;;  %8304 = vmatmul.mubr.msk.bf16.vlgmr.msra.gmra.mrb[80].mxu0 %vm3101_vm7, %v3258_v34  ;;  %v3249_v45 = vmul.f32 0.125, %v3210_v61  ;;  %v3230_v52 = vrot.slane %v3229_v19, 1 }
0x14ec   :  { %v3235_v21 = vrot.slane %v3234_v35, 2  ;;  %8314 = vmatpush3.bf16.msra.mxu0 %v3603_v14  ;;  %8315 = vmatprep.mubr.msk.bf16.mxu0 %vm9329_vm5, %v9328_v44  ;;  %v3223_v6 = vrot.slane %v3222_v26, 1 }
0x14ed   :  { %v3241_v24 = vadd.f32 %v3240_v40, %v3239_v51  ;;  %v3257_v33 = vpack.c.bf16 %v3249_v45, %v3249_v45  ;;  %8325 = vmatprep.subr.bf16.mxu0 %v9328_v44  ;;  %v3231_v29 = vadd.f32 %v3230_v52, %v3229_v19 }
0x14ee   :  { %v3224_v53 = vadd.f32 %v3223_v6, %v3222_v26  ;;  %v3236_v50 = vadd.f32 %v3235_v21, %v3234_v35 }
0x14ef   :  { %v3242_v27 = vrot.slane %v3241_v24, 2  ;;  %8298 = vmatmul.mubr.msk.bf16.vlgmr.msra.gmra.mrb[60].mxu1 %vm3101_vm7, %v3257_v33  ;;  %v3252_v63 = vmul.f32 0.125, %v3231_v29 }
0x14f0   :  { %8308 = vmatpush3.bf16.msra.mxu1 %v3557_v46  ;;  %8309 = vmatprep.mubr.msk.bf16.mxu1 %vm9329_vm5, %v9328_v44  ;;  %v3251_v18 = vmul.f32 0.125, %v3224_v53  ;;  %v3237_v22 = vrot.slane %v3236_v50, 1 }
0x14f1   :  { %v3260_v11 = vpack.c.bf16 %v3252_v63, %v3252_v63  ;;  %8319 = vmatprep.subr.bf16.mxu1 %v9328_v44  ;;  %v3243_v20 = vadd.f32 %v3242_v27, %v3241_v24 }
0x14f2   :  { %v3259_v57 = vpack.c.bf16 %v3251_v18, %v3251_v18  ;;  %v3238_v37 = vadd.f32 %v3237_v22, %v3236_v50  ;;  %v10859_v18 = vld [vmem:[#allocation7 + $0x3] ss:$0 sm:$0xff] }
0x14f3   :  { %8316 = vmatmul.mubr.msk.bf16.vlgmr.msra.gmra.mrb[84].mxu0 %vm3101_vm7, %v3260_v11  ;;  %v3244_v8 = vrot.slane %v3243_v20, 1 }
0x14f4   :  { %8326 = vmatpush3.bf16.msra.mxu0 %v3695_v47  ;;  %8327 = vmatprep.mubr.msk.bf16.mxu0 %vm9329_vm5, %v9328_v44  ;;  %v3253_v30 = vmul.f32 0.125, %v3238_v37 }
0x14f5   :  { %8347 = vmatprep.subr.bf16.mxu0 %v8882_v60  ;;  %v3245_v58 = vadd.f32 %v3244_v8, %v3243_v20 }
0x14f6   :  { %v3261_v7 = vpack.c.bf16 %v3253_v30, %v3253_v30 }
0x14f7   :  { %8310 = vmatmul.mubr.msk.bf16.vlgmr.msra.gmra.mrb[64].mxu1 %vm3101_vm7, %v3259_v57  ;;  %v3254_v38 = vmul.f32 0.125, %v3245_v58 }
0x14f8   :  { %8320 = vmatpush3.bf16.msra.mxu1 %v3649_v56  ;;  %8321 = vmatprep.mubr.msk.bf16.mxu1 %vm9329_vm5, %v9328_v44 }
0x14f9   :  { %v3262_v4 = vpack.c.bf16 %v3254_v38, %v3254_v38  ;;  %8331 = vmatprep.subr.bf16.mxu1 %v8883_v59 }
0x14fb   :  { %8328 = vmatmul.mubr.msk.bf16.vlgmr.msra.gmra.mrb[88].mxu0 %vm3101_vm7, %v3262_v4 }
0x14fc   :  { %8348 = vmatpush3.bf16.msra.mxu0 %v8882_v60  ;;  %8355 = vmatprep.mubr.msk.bf16.mxu0 %vm283_vm2, %v10560_v15 }
0x14fd   :  { %8349 = vmatprep.subr.bf16.mxu0 %v8884_v48 }
0x14ff   :  { %8322 = vmatmul.mubr.msk.bf16.vlgmr.msra.gmra.mrb[68].mxu1 %vm3101_vm7, %v3261_v7 }
0x1500   :  { %8332 = vmatpush3.bf16.msra.mxu1 %v8883_v59  ;;  %8350 = vmatpush3.bf16.msra.mxu0 %v8884_v48 }
0x1501   :  { %8339 = vmatprep.mubr.msk.bf16.mxu1 %vm283_vm2, %v10560_v15  ;;  %8333 = vmatprep.subr.bf16.mxu1 %v8885_v10 }
0x1502   :  { %8351 = vmatprep.subr.bf16.mxu0 %v8886_v3 }
0x1504   :  { %8334 = vmatpush3.bf16.msra.mxu1 %v8885_v10  ;;  %8352 = vmatpush3.bf16.msra.mxu0 %v8886_v3 }
0x1505   :  { %8335 = vmatprep.subr.bf16.mxu1 %v8887_v49  ;;  %8353 = vmatprep.subr.bf16.mxu0 %v8888_v2 }
0x1508   :  { %8336 = vmatpush3.bf16.msra.mxu1 %v8887_v49  ;;  %8354 = vmatpush3.bf16.msra.mxu0 %v8888_v2 }
0x1509   :  { %8337 = vmatprep.subr.bf16.mxu1 %v8889_v25  ;;  %8369 = vmatprep.subr.bf16.mxu0 %v9328_v44 }
0x150b   :  { %8356 = vmatmul.mubr.msk.bf16.vlgmr.msra.gmra.mrb[92].mxu0 %vm283_vm2, %v10566_v12 }
0x150c   :  { %8338 = vmatpush3.bf16.msra.mxu1 %v8889_v25  ;;  %8359 = vmatprep.mubr.msk.bf16.mxu0 %vm283_vm2, %v10575_v13 }
0x150d   :  { %8363 = vmatprep.subr.bf16.mxu1 %v9328_v44 }
0x150f   :  { %8340 = vmatmul.mubr.msk.bf16.vlgmr.msra.gmra.mrb[72].mxu1 %vm283_vm2, %v10566_v12 }
0x1510   :  { %8343 = vmatprep.mubr.msk.bf16.mxu1 %vm283_vm2, %v10575_v13 }
0x1513   :  { %8360 = vmatmul.mubr.msk.bf16.gmra.mrb[96].mxu0 %vm283_vm2, %v10582_v31 }
0x1514   :  { %8371 = vmatprep.mubr.msk.bf16.mxu0 %vm9329_vm5, %v9328_v44 }
0x1517   :  { %8344 = vmatmul.mubr.msk.bf16.gmra.mrb[76].mxu1 %vm283_vm2, %v10582_v31 }
0x1518   :  { %8365 = vmatprep.mubr.msk.bf16.mxu1 %vm9329_vm5, %v9328_v44 }
0x15ae   :  { %v10843_v23 = vpop.f32.mrb[52].mxu1 }
0x15af   :  { %v8287_v1 = vpop.f32.mrb[53].mxu1 }
0x15b0   :  { %v3412_v5 = vpop.f32.mrb[54].mxu1 }
0x15b1   :  { %v8288_v39 = vpop.f32.mrb[55].mxu1 }
0x15b6   :  { %v10845_v16 = vpop.f32.mrb[56].mxu1 }
0x15b7   :  { %v8293_v36 = vpop.f32.mrb[57].mxu1 }
0x15b8   :  { %v3458_v43 = vpop.f32.mrb[58].mxu1 }
0x15b9   :  { %v8294_v17 = vpop.f32.mrb[59].mxu1 }
0x15be   :  { %v10847_v32 = vpop.f32.mrb[80].mxu0 }
0x15bf   :  { %v8305_v55 = vpop.f32.mrb[81].mxu0 }
0x15c0   :  { %v3550_v42 = vpop.f32.mrb[82].mxu0 }
0x15c1   :  { %v8306_v0 = vpop.f32.mrb[83].mxu0 }
0x15c2   :  { %v10849_v9 = vpop.f32.mrb[60].mxu1 }
0x15c3   :  { %v8299_v62 = vpop.f32.mrb[61].mxu1 }
0x15c4   :  { %v3504_v34 = vpop.f32.mrb[62].mxu1 }
0x15c5   :  { %v8300_v61 = vpop.f32.mrb[63].mxu1 }
0x15c6   :  { %v10851_v19 = vpop.f32.mrb[84].mxu0 }
0x15c7   :  { %v8317_v28 = vpop.f32.mrb[85].mxu0 }
0x15c8   :  { %v3642_v35 = vpop.f32.mrb[86].mxu0 }
0x15c9   :  { %v8318_v51 = vpop.f32.mrb[87].mxu0 }
0x15ca   :  { %v10853_v26 = vpop.f32.mrb[64].mxu1 }
0x15cb   :  { %v8311_v14 = vpop.f32.mrb[65].mxu1 }
0x15cc   :  { %v3596_v40 = vpop.f32.mrb[66].mxu1  ;;  %v8890_v14 = vld [vmem:[%s11633_s4 + $0x20] sm:$0xff]  }
0x15cd   :  { %v8312_v45 = vpop.f32.mrb[67].mxu1 }
0x15ce   :  { %v10855_v52 = vpop.f32.mrb[88].mxu0 }
0x15cf   :  { %v8329_v21 = vpop.f32.mrb[89].mxu0 }
0x15d0   :  { %v3734_v6 = vpop.f32.mrb[90].mxu0 }
0x15d1   :  { %v8330_v24 = vpop.f32.mrb[91].mxu0 }
0x15d2   :  { %v10857_v33 = vpop.f32.mrb[68].mxu1 }
0x15d3   :  { %v8323_v29 = vpop.f32.mrb[69].mxu1 }
0x15d4   :  { %v3688_v53 = vpop.f32.mrb[70].mxu1 }
0x15d5   :  { %v8324_v50 = vpop.f32.mrb[71].mxu1  ;;  %v8891_v53 = vld [vmem:[%s11633_s4 + $0x28] sm:$0xff]  }
0x15de   :  { %v8357_v46 = vpop.f32.mrb[92].mxu0 }
0x15df   :  { %v3919_v54 = vpop.f32.mrb[93].mxu0  ;;  %v3952_v59 = vpack.c.bf16 %v8357_v46, %v8357_v46  ;;  %v8892_v46 = vld [vmem:[%s11633_s4 + $0x30] sm:$0xff]  }
0x15e0   :  { %v3950_v27 = vpack.c.bf16 %v3919_v54, %v3919_v54  ;;  %v8358_v63 = vpop.f32.mrb[94].mxu0  ;;  %v8893_v54 = vld [vmem:[%s11633_s4 + $0x38] sm:$0xff]  }
0x15e1   :  { %v3922_v11 = vpop.f32.mrb[95].mxu0  ;;  %v3953_v4 = vpack.c.bf16 %v8358_v63, %v8358_v63  ;;  %v4054_v10 = vsel %vm2732_vm6, %v3952_v59, 0 }
0x15e2   :  { %v3962_v60 = vsel %vm2732_vm6, %v3950_v27, 0  ;;  %v3951_v20 = vpack.c.bf16 %v3922_v11, %v3922_v11  ;;  %v8341_v22 = vpop.f32.mrb[72].mxu1 }
0x15e3   :  { %v3813_v41 = vpop.f32.mrb[73].mxu1  ;;  %8364 = vmatpush3.bf16.xpose.msra.mxu1 %v3962_v60  ;;  %v4100_v25 = vsel %vm2732_vm6, %v3953_v4, 0  ;;  %v3822_v1 = vadd.f32 %v8341_v22, %v10859_v18 }
0x15e4   :  { %v4008_v47 = vsel %vm2732_vm6, %v3951_v20, 0  ;;  %v3814_v8 = vadd.f32 %v3813_v41, %v10859_v18  ;;  %v8342_v57 = vpop.f32.mrb[74].mxu1  ;;  %8375 = vmatprep.subr.bf16.mxu1 %v9328_v44 }
0x15e5   :  { %v3816_v58 = vpop.f32.mrb[75].mxu1  ;;  %8370 = vmatpush3.bf16.xpose.msra.mxu0 %v4008_v47  ;;  %v3825_v36 = vadd.f32 %v8342_v57, %v10859_v18  ;;  %v3846_v17 = vpack.c.bf16 %v3822_v1, %v3822_v1 }
0x15e6   :  { %v3817_v37 = vadd.f32 %v3816_v58, %v10859_v18  ;;  %v8361_v56 = vpop.f32.mrb[96].mxu0  ;;  %8381 = vmatprep.subr.bf16.mxu0 %v9328_v44  ;;  %v3844_v48 = vpack.c.bf16 %v3814_v8, %v3814_v8 }
0x15e7   :  { %v3935_v38 = vpop.f32.mrb[97].mxu0  ;;  %v3847_v42 = vpack.c.bf16 %v3825_v36, %v3825_v36  ;;  %v3956_v61 = vpack.c.bf16 %v8361_v56, %v8361_v56 }
0x15e8   :  { %v8362_v30 = vpop.f32.mrb[98].mxu0  ;;  %v3845_v3 = vpack.c.bf16 %v3817_v37, %v3817_v37  ;;  %v3954_v43 = vpack.c.bf16 %v3935_v38, %v3935_v38 }
0x15e9   :  { %v3938_v7 = vpop.f32.mrb[99].mxu0  ;;  %v3957_v35 = vpack.c.bf16 %v8362_v30, %v8362_v30  ;;  %v4238_v40 = vsel %vm2732_vm6, %v3956_v61, 0 }
0x15ea   :  { %v8345_v49 = vpop.f32.mrb[76].mxu1  ;;  %8366 = vmatmul.mubr.msk.bf16.vlgmr.msra.gmra.mrb[80].mxu1 %vm2732_vm6, %v3844_v48  ;;  %v3955_v55 = vpack.c.bf16 %v3938_v7, %v3938_v7  ;;  %v4146_v0 = vsel %vm2732_vm6, %v3954_v43, 0 }
0x15eb   :  { %v3829_v2 = vpop.f32.mrb[77].mxu1  ;;  %8376 = vmatpush3.bf16.xpose.msra.mxu1 %v4054_v10  ;;  %8377 = vmatprep.mubr.msk.bf16.mxu1 %vm9329_vm5, %v9328_v44  ;;  %v4284_v21 = vsel %vm2732_vm6, %v3957_v35, 0  ;;  %v3838_v6 = vadd.f32 %v8345_v49, %v10859_v18 }
0x15ec   :  { %v8346_v5 = vpop.f32.mrb[78].mxu1  ;;  %8372 = vmatmul.mubr.msk.bf16.vlgmr.msra.gmra.mrb[100].mxu0 %vm2732_vm6, %v3845_v3  ;;  %8387 = vmatprep.subr.bf16.mxu1 %v9328_v44  ;;  %v4192_v62 = vsel %vm2732_vm6, %v3955_v55, 0  ;;  %v3830_v34 = vadd.f32 %v3829_v2, %v10859_v18 }
0x15ed   :  { %v3832_v39 = vpop.f32.mrb[79].mxu1  ;;  %8382 = vmatpush3.bf16.xpose.msra.mxu0 %v4100_v25  ;;  %8383 = vmatprep.mubr.msk.bf16.mxu0 %vm9329_vm5, %v9328_v44  ;;  %v3841_v24 = vadd.f32 %v8346_v5, %v10859_v18  ;;  %v3850_v29 = vpack.c.bf16 %v3838_v6, %v3838_v6 }
0x15ee   :  { %8393 = vmatprep.subr.bf16.mxu0 %v9328_v44  ;;  %v3833_v28 = vadd.f32 %v3832_v39, %v10859_v18  ;;  %v3848_v51 = vpack.c.bf16 %v3830_v34, %v3830_v34 }
0x15ef   :  { %v3851_v50 = vpack.c.bf16 %v3841_v24, %v3841_v24 }
0x15f0   :  { %v3849_v45 = vpack.c.bf16 %v3833_v28, %v3833_v28 }
0x15f2   :  { %8378 = vmatmul.mubr.msk.bf16.vlgmr.msra.gmra.mrb[84].mxu1 %vm2732_vm6, %v3846_v17 }
0x15f3   :  { %8388 = vmatpush3.bf16.xpose.msra.mxu1 %v4146_v0  ;;  %8389 = vmatprep.mubr.msk.bf16.mxu1 %vm9329_vm5, %v9328_v44 }
0x15f4   :  { %8384 = vmatmul.mubr.msk.bf16.vlgmr.msra.gmra.mrb[104].mxu0 %vm2732_vm6, %v3847_v42  ;;  %8399 = vmatprep.subr.bf16.mxu1 %v9328_v44 }
0x15f5   :  { %8394 = vmatpush3.bf16.xpose.msra.mxu0 %v4192_v62  ;;  %8395 = vmatprep.mubr.msk.bf16.mxu0 %vm9329_vm5, %v9328_v44 }
0x15f6   :  { %8405 = vmatprep.subr.bf16.mxu0 %v9328_v44 }
0x15fa   :  { %8390 = vmatmul.mubr.msk.bf16.vlgmr.msra.gmra.mrb[88].mxu1 %vm2732_vm6, %v3848_v51 }
0x15fb   :  { %8400 = vmatpush3.bf16.xpose.msra.mxu1 %v4238_v40  ;;  %8401 = vmatprep.mubr.msk.bf16.mxu1 %vm9329_vm5, %v9328_v44 }
0x15fc   :  { %8396 = vmatmul.mubr.msk.bf16.vlgmr.msra.gmra.mrb[108].mxu0 %vm2732_vm6, %v3849_v45  ;;  %8411 = vmatprep.subr.bf16.mxu1 %v8890_v14 }
0x15fd   :  { %8406 = vmatpush3.bf16.xpose.msra.mxu0 %v4284_v21  ;;  %8407 = vmatprep.mubr.msk.bf16.mxu0 %vm9329_vm5, %v9328_v44 }
0x15fe   :  { %8427 = vmatprep.subr.bf16.mxu0 %v9328_v44 }
0x1602   :  { %8402 = vmatmul.mubr.msk.bf16.vlgmr.msra.gmra.mrb[92].mxu1 %vm2732_vm6, %v3850_v29 }
0x1603   :  { %8412 = vmatpush3.bf16.msra.mxu1 %v8890_v14  ;;  %8419 = vmatprep.mubr.msk.bf16.mxu1 %vm283_vm2, %v10560_v15 }
0x1604   :  { %8408 = vmatmul.mubr.msk.bf16.vlgmr.msra.gmra.mrb[112].mxu0 %vm2732_vm6, %v3851_v50  ;;  %8413 = vmatprep.subr.bf16.mxu1 %v8891_v53 }
0x1605   :  { %8429 = vmatprep.mubr.msk.bf16.mxu0 %vm9329_vm5, %v9328_v44 }
0x1607   :  { %8414 = vmatpush3.bf16.msra.mxu1 %v8891_v53 }
0x1608   :  { %8415 = vmatprep.subr.bf16.mxu1 %v8892_v46 }
0x160b   :  { %8416 = vmatpush3.bf16.msra.mxu1 %v8892_v46 }
0x160c   :  { %8417 = vmatprep.subr.bf16.mxu1 %v8893_v54 }
0x160f   :  { %8418 = vmatpush3.bf16.msra.mxu1 %v8893_v54 }
0x1610   :  { %8445 = vmatprep.subr.bf16.mxu1 %v9328_v44 }
0x1612   :  { %8420 = vmatmul.mubr.msk.bf16.vlgmr.msra.gmra.mrb[96].mxu1 %vm283_vm2, %v10566_v12 }
0x1613   :  { %8423 = vmatprep.mubr.msk.bf16.mxu1 %vm283_vm2, %v10575_v13 }
0x161a   :  { %8424 = vmatmul.mubr.msk.bf16.gmra.mrb[100].mxu1 %vm283_vm2, %v10582_v31 }
0x161b   :  { %8447 = vmatprep.mubr.msk.bf16.mxu1 %vm9329_vm5, %v9328_v44 }
0x16bd   :  { %v10929_v27 = vpop.f32.mrb[80].mxu1 }
0x16be   :  { %v8367_v63 = vpop.f32.mrb[81].mxu1  ;;  %v4326_v11 = vsel %vm3101_vm7, %v10929_v27, -inf }
0x16bf   :  { %4327 = vmax.xlane.f32.xlu1 %v4326_v11  ;;  %v4001_v18 = vpop.f32.mrb[82].mxu1  ;;  %v10933_v60 = vpop.f32.mrb[100].mxu0 }
0x16c0   :  { %v8368_v20 = vpop.f32.mrb[83].mxu1  ;;  %v8373_v22 = vpop.f32.mrb[101].mxu0  ;;  %v4329_v41 = vsel %vm3101_vm7, %v10933_v60, -inf }
0x16c1   :  { %4330 = vmax.xlane.f32.xlu0 %v4329_v41  ;;  %v4047_v47 = vpop.f32.mrb[102].mxu0 }
0x16c2   :  { %v8374_v8 = vpop.f32.mrb[103].mxu0 }
0x16c5   :  { %v10937_v57 = vpop.f32.mrb[84].mxu1 }
0x16c6   :  { %v8379_v58 = vpop.f32.mrb[85].mxu1  ;;  %v4332_v59 = vsel %vm3101_vm7, %v10937_v57, -inf }
0x16c7   :  { %v4093_v37 = vpop.f32.mrb[86].mxu1  ;;  %4333 = vmax.xlane.f32.xlu0 %v4332_v59  ;;  %v4136_v56 = vpop.f32.mrb[104].mxu0 }
0x16c8   :  { %v8380_v38 = vpop.f32.mrb[87].mxu1  ;;  %v8385_v4 = vpop.f32.mrb[105].mxu0  ;;  %v4335_v48 = vsel %vm3101_vm7, %v4136_v56, -inf }
0x16c9   :  { %4336 = vmax.xlane.f32.xlu1 %v4335_v48  ;;  %v4139_v30 = vpop.f32.mrb[106].mxu0 }
0x16ca   :  { %v8386_v7 = vpop.f32.mrb[107].mxu0 }
0x16cd   :  { %v10942_v10 = vpop.f32.mrb[88].mxu1 }
0x16ce   :  { %v8391_v3 = vpop.f32.mrb[89].mxu1  ;;  %v4338_v49 = vsel %vm3101_vm7, %v10942_v10, -inf }
0x16cf   :  { %v4185_v2 = vpop.f32.mrb[90].mxu1  ;;  %4339 = vmax.xlane.f32.xlu0 %v4338_v49  ;;  %v10946_v25 = vpop.f32.mrb[108].mxu0 }
0x16d0   :  { %v8392_v1 = vpop.f32.mrb[91].mxu1  ;;  %v8397_v5 = vpop.f32.mrb[109].mxu0  ;;  %v4341_v39 = vsel %vm3101_vm7, %v10946_v25, -inf }
0x16d1   :  { %4342 = vmax.xlane.f32.xlu1 %v4341_v39  ;;  %v4231_v36 = vpop.f32.mrb[110].mxu0 }
0x16d2   :  { %v8398_v43 = vpop.f32.mrb[111].mxu0 }
0x16d5   :  { %v10950_v17 = vpop.f32.mrb[92].mxu1 }
0x16d6   :  { %v8403_v55 = vpop.f32.mrb[93].mxu1  ;;  %v4344_v42 = vsel %vm3101_vm7, %v10950_v17, -inf }
0x16d7   :  { %v4277_v0 = vpop.f32.mrb[94].mxu1  ;;  %4345 = vmax.xlane.f32.xlu0 %v4344_v42  ;;  %v10954_v62 = vpop.f32.mrb[112].mxu0 }
0x16d8   :  { %v8404_v34 = vpop.f32.mrb[95].mxu1  ;;  %v8409_v61 = vpop.f32.mrb[113].mxu0  ;;  %v4347_v28 = vsel %vm3101_vm7, %v10954_v62, -inf }
0x16d9   :  { %4348 = vmax.xlane.f32.xlu1 %v4347_v28  ;;  %v4323_v35 = vpop.f32.mrb[114].mxu0 }
0x16da   :  { %v8410_v51 = vpop.f32.mrb[115].mxu0 }
0x16e5   :  { %v10958_v14 = vpop.f32.mrb[96].mxu1 }
0x16e6   :  { %v4553_v40 = vpop.f32.mrb[97].mxu1 }
0x16e7   :  { %v4584_v45 = vpack.c.bf16 %v4553_v40, %v4553_v40  ;;  %v8422_v21 = vpop.f32.mrb[98].mxu1 }
0x16e8   :  { %v4587_v6 = vpack.c.bf16 %v8422_v21, %v8422_v21  ;;  %v10960_v24 = vpop.f32.mrb[99].mxu1 }
0x16e9   :  { %v4596_v29 = vsel %vm3371_vm8, %v4584_v45, 0 }
0x16ea   :  { %v4734_v53 = vsel %vm3371_vm8, %v4587_v6, 0  ;;  %8428 = vmatpush3.bf16.msra.mxu0 %v4596_v29 }
0x16eb   :  { %8446 = vmatpush3.bf16.msra.mxu1 %v4734_v53  ;;  %8433 = vmatprep.subr.bf16.mxu0 %v9328_v44 }
0x16ec   :  { %8457 = vmatprep.subr.bf16.mxu1 %v9328_v44 }
0x16ed   :  { %v10966_v50 = vpop.f32.mrb[100].mxu1 }
0x16ee   :  { %v10968_v46 = vpop.f32.mrb[101].mxu1 }
0x16ef   :  { %v10970_v54 = vpop.f32.mrb[102].mxu1 }
0x16f0   :  { %v10972_v63 = vpop.f32.mrb[103].mxu1 }
0x174c   :  { %v4328_v11 = vpop.xlane.xlu1 %4327 }
0x174d   :  { %v4350_v18 = vsub.f32 %v10929_v27, %v4328_v11 }
0x174e   :  { %v4331_v20 = vpop.xlane.xlu0 %4330 }
0x174f   :  { %v4358_v22 = vmul.f32 1.442695, %v4350_v18  ;;  %v4351_v41 = vsub.f32 %v10933_v60, %v4331_v20 }
0x1751   :  { %9116 = vpow2.f32 %v4358_v22  ;;  %v4360_v47 = vmul.f32 1.442695, %v4351_v41 }
0x1753   :  { %9118 = vpow2.f32 %v4360_v47 }
0x1754   :  { %v4334_v8 = vpop.xlane.xlu0 %4333 }
0x1755   :  { %v4352_v58 = vsub.f32 %v10937_v57, %v4334_v8 }
0x1756   :  { %v4337_v59 = vpop.xlane.xlu1 %4336 }
0x1757   :  { %v4362_v37 = vmul.f32 1.442695, %v4352_v58  ;;  %v4353_v38 = vsub.f32 %v4136_v56, %v4337_v59 }
0x1759   :  { %9120 = vpow2.f32 %v4362_v37  ;;  %v4364_v4 = vmul.f32 1.442695, %v4353_v38 }
0x175b   :  { %v9117_v48 = vpop.eup %9116  ;;  %9122 = vpow2.f32 %v4364_v4 }
0x175c   :  { %v4340_v30 = vpop.xlane.xlu0 %4339  ;;  %v4374_v27 = vsel %vm3101_vm7, %v9117_v48, 0.0 }
0x175d   :  { %v9119_v7 = vpop.eup %9118  ;;  %v4354_v3 = vsub.f32 %v10942_v10, %v4340_v30  ;;  %4375 = vadd.xlane.f32.xlu1 %v4374_v27 }
0x175e   :  { %v4343_v60 = vpop.xlane.xlu1 %4342  ;;  %v4377_v49 = vsel %vm3101_vm7, %v9119_v7, 0.0 }
0x175f   :  { %v4366_v2 = vmul.f32 1.442695, %v4354_v3  ;;  %v4355_v57 = vsub.f32 %v10946_v25, %v4343_v60  ;;  %4378 = vadd.xlane.f32.xlu0 %v4377_v49 }
0x1761   :  { %9124 = vpow2.f32 %v4366_v2  ;;  %v4368_v56 = vmul.f32 1.442695, %v4355_v57 }
0x1763   :  { %v9121_v1 = vpop.eup %9120  ;;  %9126 = vpow2.f32 %v4368_v56 }
0x1764   :  { %v4346_v5 = vpop.xlane.xlu0 %4345  ;;  %v4380_v39 = vsel %vm3101_vm7, %v9121_v1, 0.0 }
0x1765   :  { %v9123_v36 = vpop.eup %9122  ;;  %v4356_v43 = vsub.f32 %v10950_v17, %v4346_v5  ;;  %4381 = vadd.xlane.f32.xlu0 %v4380_v39 }
0x1766   :  { %v4349_v10 = vpop.xlane.xlu1 %4348  ;;  %v4383_v55 = vsel %vm3101_vm7, %v9123_v36, 0.0 }
0x1767   :  { %v4370_v42 = vmul.f32 1.442695, %v4356_v43  ;;  %v4357_v0 = vsub.f32 %v10954_v62, %v4349_v10  ;;  %4384 = vadd.xlane.f32.xlu1 %v4383_v55 }
0x1769   :  { %9128 = vpow2.f32 %v4370_v42  ;;  %v4372_v25 = vmul.f32 1.442695, %v4357_v0  ;;  %v4585_v42 = vpack.c.bf16 %v10960_v24, %v10960_v24 }
0x176b   :  { %v9125_v34 = vpop.eup %9124  ;;  %9130 = vpow2.f32 %v4372_v25 }
0x176c   :  { %v4386_v61 = vsel %vm3101_vm7, %v9125_v34, 0.0 }
0x176d   :  { %v10986_v28 = vpop.eup %9126  ;;  %4387 = vadd.xlane.f32.xlu0 %v4386_v61 }
0x176e   :  { %v4389_v17 = vsel %vm3101_vm7, %v10986_v28, 0.0 }
0x176f   :  { %4390 = vadd.xlane.f32.xlu1 %v4389_v17 }
0x1773   :  { %v10990_v35 = vpop.eup %9128 }
0x1774   :  { %v4392_v51 = vsel %vm3101_vm7, %v10990_v35, 0.0 }
0x1775   :  { %v10994_v62 = vpop.eup %9130  ;;  %4393 = vadd.xlane.f32.xlu0 %v4392_v51 }
0x1776   :  { %v4395_v40 = vsel %vm3101_vm7, %v10994_v62, 0.0 }
0x1777   :  { %4396 = vadd.xlane.f32.xlu1 %v4395_v40 }
0x17ea   :  { %v4376_v45 = vpop.xlane.xlu1 %4375 }
0x17eb   :  { %9132 = vrcp.f32 %v4376_v45 }
0x17ec   :  { %v4379_v21 = vpop.xlane.xlu0 %4378 }
0x17ed   :  { %9134 = vrcp.f32 %v4379_v21 }
0x17f2   :  { %v4382_v6 = vpop.xlane.xlu0 %4381 }
0x17f3   :  { %9136 = vrcp.f32 %v4382_v6 }
0x17f4   :  { %v4385_v29 = vpop.xlane.xlu1 %4384 }
0x17f5   :  { %v9133_v53 = vpop.eup %9132  ;;  %9138 = vrcp.f32 %v4385_v29 }
0x17f6   :  { %v4399_v11 = vmul.f32 %v9133_v53, %v9117_v48 }
0x17f7   :  { %v9135_v18 = vpop.eup %9134 }
0x17f8   :  { %v4414_v20 = vsel %vm3101_vm7, %v4399_v11, 0.0  ;;  %v4401_v22 = vmul.f32 %v9135_v18, %v9119_v7  ;;  %v4642_v18 = vsel %vm3371_vm8, %v4585_v42, 0 }
0x17f9   :  { %v4415_v41 = vrot.slane %v4414_v20, 4 }
0x17fa   :  { %v4421_v47 = vsel %vm3101_vm7, %v4401_v22, 0.0  ;;  %v4388_v8 = vpop.xlane.xlu0 %4387 }
0x17fb   :  { %v4416_v58 = vadd.f32 %v4415_v41, %v4414_v20  ;;  %v4422_v59 = vrot.slane %v4421_v47, 4  ;;  %9140 = vrcp.f32 %v4388_v8 }
0x17fc   :  { %v4391_v37 = vpop.xlane.xlu1 %4390 }
0x17fd   :  { %v9137_v38 = vpop.eup %9136  ;;  %v4417_v4 = vrot.slane %v4416_v58, 2  ;;  %v4423_v30 = vadd.f32 %v4422_v59, %v4421_v47  ;;  %9142 = vrcp.f32 %v4391_v37  ;;  %v4586_v59 = vpack.c.bf16 %v10958_v14, %v10958_v14 }
0x17fe   :  { %v4403_v27 = vmul.f32 %v9137_v38, %v9121_v1 }
0x17ff   :  { %v9139_v3 = vpop.eup %9138  ;;  %v4424_v60 = vrot.slane %v4423_v30, 2  ;;  %v4418_v48 = vadd.f32 %v4417_v4, %v4416_v58  ;;  %v4688_v14 = vsel %vm3371_vm8, %v4586_v59, 0 }
0x1800   :  { %v4428_v49 = vsel %vm3101_vm7, %v4403_v27, 0.0  ;;  %v4405_v2 = vmul.f32 %v9139_v3, %v9123_v36 }
0x1801   :  { %v4429_v7 = vrot.slane %v4428_v49, 4  ;;  %v4419_v57 = vrot.slane %v4418_v48, 1  ;;  %v4425_v56 = vadd.f32 %v4424_v60, %v4423_v30  ;;  %v4589_v30 = vpack.c.bf16 %v10972_v63, %v10972_v63 }
0x1802   :  { %v4435_v5 = vsel %vm3101_vm7, %v4405_v2, 0.0  ;;  %v4394_v39 = vpop.xlane.xlu0 %4393 }
0x1803   :  { %v4430_v43 = vadd.f32 %v4429_v7, %v4428_v49  ;;  %v4436_v10 = vrot.slane %v4435_v5, 4  ;;  %9144 = vrcp.f32 %v4394_v39  ;;  %v4420_v55 = vadd.f32 %v4419_v57, %v4418_v48 }
0x1804   :  { %v4397_v1 = vpop.xlane.xlu1 %4396  ;;  %v4426_v0 = vrot.slane %v4425_v56, 1  ;;  %v4826_v63 = vsel %vm3371_vm8, %v4589_v30, 0  ;;  %v8898_v30 = vld [vmem:[%s11632_s3 + $0x88] sm:$0xff]  }
0x1805   :  { %v9141_v25 = vpop.eup %9140  ;;  %v4431_v61 = vrot.slane %v4430_v43, 2  ;;  %v4437_v17 = vadd.f32 %v4436_v10, %v4435_v5  ;;  %9146 = vrcp.f32 %v4397_v1  ;;  %v4470_v36 = vmul.f32 0.125, %v4420_v55 }
0x1806   :  { %v4407_v51 = vmul.f32 %v9141_v25, %v9125_v34  ;;  %v4427_v6 = vadd.f32 %v4426_v0, %v4425_v56  ;;  %v4588_v0 = vpack.c.bf16 %v10968_v46, %v10968_v46  ;;  %v8894_v46 = vld [vmem:[%s11632_s3 + $0xa0] sm:$0xff]  }
0x1807   :  { %v9143_v40 = vpop.eup %9142  ;;  %v4438_v45 = vrot.slane %v4437_v17, 2  ;;  %v4478_v21 = vpack.c.bf16 %v4470_v36, %v4470_v36  ;;  %v4432_v29 = vadd.f32 %v4431_v61, %v4430_v43  ;;  %v4591_v36 = vpack.c.bf16 %v10970_v54, %v10970_v54 }
0x1808   :  { %v4442_v53 = vsel %vm3101_vm7, %v4407_v51, 0.0  ;;  %v4409_v11 = vmul.f32 %v9143_v40, %v10986_v28  ;;  %v4471_v58 = vmul.f32 0.125, %v4427_v6 }
0x1809   :  { %v4439_v24 = vadd.f32 %v4438_v45, %v4437_v17  ;;  %v4443_v20 = vrot.slane %v4442_v53, 4  ;;  %8430 = vmatmul.mubr.msk.bf16.vlgmr.msra.gmra.mrb[116].mxu0 %vm3101_vm7, %v4478_v21  ;;  %v4433_v34 = vrot.slane %v4432_v29, 1  ;;  %v4918_v54 = vsel %vm3371_vm8, %v4591_v36, 0 }
0x180a   :  { %v4449_v22 = vsel %vm3101_vm7, %v4409_v11, 0.0  ;;  %8434 = vmatpush3.bf16.msra.mxu0 %v4642_v18  ;;  %8435 = vmatprep.mubr.msk.bf16.mxu0 %vm9329_vm5, %v9328_v44  ;;  %v4479_v49 = vpack.c.bf16 %v4471_v58, %v4471_v58 }
0x180b   :  { %v4440_v41 = vrot.slane %v4439_v24, 1  ;;  %v4444_v47 = vadd.f32 %v4443_v20, %v4442_v53  ;;  %v4450_v8 = vrot.slane %v4449_v22, 4  ;;  %8439 = vmatprep.subr.bf16.mxu0 %v9328_v44  ;;  %v4434_v3 = vadd.f32 %v4433_v34, %v4432_v29 }
0x180c   :  { %v4780_v29 = vsel %vm3371_vm8, %v4588_v0, 0 }
0x180d   :  { %v9145_v28 = vpop.eup %9144  ;;  %v4445_v37 = vrot.slane %v4444_v47, 2  ;;  %v4451_v38 = vadd.f32 %v4450_v8, %v4449_v22  ;;  %v4441_v4 = vadd.f32 %v4440_v41, %v4439_v24  ;;  %v4472_v10 = vmul.f32 0.125, %v4434_v3  ;;  %v8896_v8 = vld [vmem:[%s11632_s3 + $0x80] sm:$0xff]   ;;  %v8900_v3 = vld [vmem:[%s11632_s3 + $0x90] sm:$0xff]  }
0x180e   :  { %v4411_v27 = vmul.f32 %v9145_v28, %v10990_v35  ;;  %v4590_v22 = vpack.c.bf16 %v10966_v50, %v10966_v50 }
0x180f   :  { %v9147_v60 = vpop.eup %9146  ;;  %v4452_v48 = vrot.slane %v4451_v38, 2  ;;  %v4473_v2 = vmul.f32 0.125, %v4441_v4  ;;  %v4446_v7 = vadd.f32 %v4445_v37, %v4444_v47  ;;  %v4480_v51 = vpack.c.bf16 %v4472_v10, %v4472_v10  ;;  %v8895_v37 = vld [vmem:[%s11632_s3 + $0xa8] sm:$0xff]  }
0x1810   :  { %v4456_v57 = vsel %vm3101_vm7, %v4411_v27, 0.0  ;;  %v4413_v56 = vmul.f32 %v9147_v60, %v10994_v62  ;;  %v4872_v28 = vsel %vm3371_vm8, %v4590_v22, 0  ;;  %v8899_v27 = vld [vmem:[%s11632_s3 + $0xb8] sm:$0xff]  }
0x1811   :  { %v4457_v5 = vrot.slane %v4456_v57, 4  ;;  %8436 = vmatmul.mubr.msk.bf16.vlgmr.msra.gmra.mrb[120].mxu0 %vm3101_vm7, %v4479_v49  ;;  %v4481_v39 = vpack.c.bf16 %v4473_v2, %v4473_v2  ;;  %v4453_v43 = vadd.f32 %v4452_v48, %v4451_v38  ;;  %v4447_v1 = vrot.slane %v4446_v7, 1  ;;  %v8897_v38 = vld [vmem:[%s11632_s3 + $0xb0] sm:$0xff]   ;;  %v8901_v60 = vld [vmem:[%s11632_s3 + $0x98] sm:$0xff]  }
0x1812   :  { %v4463_v35 = vsel %vm3101_vm7, %v4413_v56, 0.0  ;;  %8440 = vmatpush3.bf16.msra.mxu0 %v4688_v14  ;;  %8441 = vmatprep.mubr.msk.bf16.mxu0 %vm9329_vm5, %v9328_v44 }
0x1813   :  { %v4458_v55 = vadd.f32 %v4457_v5, %v4456_v57  ;;  %v4464_v42 = vrot.slane %v4463_v35, 4  ;;  %8448 = vmatmul.mubr.msk.bf16.vlgmr.msra.gmra.mrb[104].mxu1 %vm3101_vm7, %v4481_v39  ;;  %8451 = vmatprep.subr.bf16.mxu0 %v9328_v44  ;;  %v4454_v62 = vrot.slane %v4453_v43, 1  ;;  %v4448_v21 = vadd.f32 %v4447_v1, %v4446_v7 }
0x1814   :  { %8458 = vmatpush3.bf16.msra.mxu1 %v4826_v63  ;;  %8459 = vmatprep.mubr.msk.bf16.mxu1 %vm9329_vm5, %v9328_v44 }
0x1815   :  { %v4459_v25 = vrot.slane %v4458_v55, 2  ;;  %v4465_v61 = vadd.f32 %v4464_v42, %v4463_v35  ;;  %8469 = vmatprep.subr.bf16.mxu1 %v9328_v44  ;;  %v4455_v17 = vadd.f32 %v4454_v62, %v4453_v43  ;;  %v4474_v18 = vmul.f32 0.125, %v4448_v21 }
0x1817   :  { %v4466_v40 = vrot.slane %v4465_v61, 2  ;;  %v4475_v45 = vmul.f32 0.125, %v4455_v17  ;;  %v4460_v6 = vadd.f32 %v4459_v25, %v4458_v55  ;;  %v4482_v41 = vpack.c.bf16 %v4474_v18, %v4474_v18 }
0x1819   :  { %8442 = vmatmul.mubr.msk.bf16.vlgmr.msra.gmra.mrb[124].mxu0 %vm3101_vm7, %v4480_v51  ;;  %v4483_v53 = vpack.c.bf16 %v4475_v45, %v4475_v45  ;;  %v4467_v11 = vadd.f32 %v4466_v40, %v4465_v61  ;;  %v4461_v20 = vrot.slane %v4460_v6, 1 }
0x181a   :  { %8452 = vmatpush3.bf16.msra.mxu0 %v4780_v29  ;;  %8453 = vmatprep.mubr.msk.bf16.mxu0 %vm9329_vm5, %v9328_v44 }
0x181b   :  { %8460 = vmatmul.mubr.msk.bf16.vlgmr.msra.gmra.mrb[108].mxu1 %vm3101_vm7, %v4483_v53  ;;  %8463 = vmatprep.subr.bf16.mxu0 %v9328_v44  ;;  %v4468_v24 = vrot.slane %v4467_v11, 1  ;;  %v4462_v58 = vadd.f32 %v4461_v20, %v4460_v6 }
0x181c   :  { %8470 = vmatpush3.bf16.msra.mxu1 %v4918_v54  ;;  %8471 = vmatprep.mubr.msk.bf16.mxu1 %vm9329_vm5, %v9328_v44 }
0x181d   :  { %8491 = vmatprep.subr.bf16.mxu1 %v8894_v46  ;;  %v4469_v34 = vadd.f32 %v4468_v24, %v4467_v11  ;;  %v4476_v50 = vmul.f32 0.125, %v4462_v58  ;;  %v11122_v58 = vld [vmem:[#allocation7 + $0x4] ss:$0 sm:$0xff] }
0x181f   :  { %v4477_v47 = vmul.f32 0.125, %v4469_v34  ;;  %v4484_v4 = vpack.c.bf16 %v4476_v50, %v4476_v50 }
0x1821   :  { %8454 = vmatmul.mubr.msk.bf16.vlgmr.msra.gmra.mrb[128].mxu0 %vm3101_vm7, %v4482_v41  ;;  %v4485_v59 = vpack.c.bf16 %v4477_v47, %v4477_v47 }
0x1822   :  { %8464 = vmatpush3.bf16.msra.mxu0 %v4872_v28  ;;  %8465 = vmatprep.mubr.msk.bf16.mxu0 %vm9329_vm5, %v9328_v44 }
0x1823   :  { %8472 = vmatmul.mubr.msk.bf16.vlgmr.msra.gmra.mrb[112].mxu1 %vm3101_vm7, %v4485_v59  ;;  %8475 = vmatprep.subr.bf16.mxu0 %v8896_v8 }
0x1824   :  { %8492 = vmatpush3.bf16.msra.mxu1 %v8894_v46  ;;  %8499 = vmatprep.mubr.msk.bf16.mxu1 %vm283_vm2, %v10560_v15 }
0x1825   :  { %8493 = vmatprep.subr.bf16.mxu1 %v8895_v37 }
0x1828   :  { %8494 = vmatpush3.bf16.msra.mxu1 %v8895_v37 }
0x1829   :  { %8466 = vmatmul.mubr.msk.bf16.vlgmr.msra.gmra.mrb[132].mxu0 %vm3101_vm7, %v4484_v4  ;;  %8495 = vmatprep.subr.bf16.mxu1 %v8897_v38 }
0x182a   :  { %8476 = vmatpush3.bf16.msra.mxu0 %v8896_v8  ;;  %8483 = vmatprep.mubr.msk.bf16.mxu0 %vm283_vm2, %v10560_v15 }
0x182b   :  { %8477 = vmatprep.subr.bf16.mxu0 %v8898_v30 }
0x182c   :  { %8496 = vmatpush3.bf16.msra.mxu1 %v8897_v38 }
0x182d   :  { %8497 = vmatprep.subr.bf16.mxu1 %v8899_v27 }
0x182e   :  { %8478 = vmatpush3.bf16.msra.mxu0 %v8898_v30 }
0x182f   :  { %8479 = vmatprep.subr.bf16.mxu0 %v8900_v3 }
0x1830   :  { %8498 = vmatpush3.bf16.msra.mxu1 %v8899_v27 }
0x1831   :  { %8513 = vmatprep.subr.bf16.mxu1 %v9328_v44 }
0x1832   :  { %8480 = vmatpush3.bf16.msra.mxu0 %v8900_v3 }
0x1833   :  { %8500 = vmatmul.mubr.msk.bf16.vlgmr.msra.gmra.mrb[116].mxu1 %vm283_vm2, %v10566_v12  ;;  %8481 = vmatprep.subr.bf16.mxu0 %v8901_v60 }
0x1834   :  { %8503 = vmatprep.mubr.msk.bf16.mxu1 %vm283_vm2, %v10575_v13 }
0x1836   :  { %8482 = vmatpush3.bf16.msra.mxu0 %v8901_v60 }
0x1837   :  { %8507 = vmatprep.subr.bf16.mxu0 %v9328_v44 }
0x1839   :  { %8484 = vmatmul.mubr.msk.bf16.vlgmr.msra.gmra.mrb[136].mxu0 %vm283_vm2, %v10566_v12 }
0x183a   :  { %8487 = vmatprep.mubr.msk.bf16.mxu0 %vm283_vm2, %v10575_v13 }
0x183b   :  { %8504 = vmatmul.mubr.msk.bf16.gmra.mrb[120].mxu1 %vm283_vm2, %v10582_v31 }
0x183c   :  { %8515 = vmatprep.mubr.msk.bf16.mxu1 %vm9329_vm5, %v9328_v44 }
0x1841   :  { %8488 = vmatmul.mubr.msk.bf16.gmra.mrb[140].mxu0 %vm283_vm2, %v10582_v31 }
0x1842   :  { %8509 = vmatprep.mubr.msk.bf16.mxu0 %vm9329_vm5, %v9328_v44 }
0x18dc   :  { %v4632_v48 = vpop.f32.mrb[116].mxu0 }
0x18dd   :  { %v11098_v49 = vadd.f32 %v4632_v48, %v10843_v23  ;;  %v8431_v2 = vpop.f32.mrb[117].mxu0 }
0x18de   :  { %v4635_v7 = vpop.f32.mrb[118].mxu0 }
0x18df   :  { %v8432_v57 = vpop.f32.mrb[119].mxu0 }
0x18e4   :  { %v4678_v56 = vpop.f32.mrb[120].mxu0 }
0x18e5   :  { %v11101_v14 = vadd.f32 %v4678_v56, %v10845_v16  ;;  %v8437_v5 = vpop.f32.mrb[121].mxu0 }
0x18e6   :  { %v4681_v39 = vpop.f32.mrb[122].mxu0  ;;  %v4770_v43 = vpop.f32.mrb[104].mxu1 }
0x18e7   :  { %v11104_v63 = vadd.f32 %v4770_v43, %v10847_v32  ;;  %v8438_v35 = vpop.f32.mrb[123].mxu0  ;;  %v8449_v10 = vpop.f32.mrb[105].mxu1 }
0x18e8   :  { %v4773_v55 = vpop.f32.mrb[106].mxu1 }
0x18e9   :  { %v8450_v42 = vpop.f32.mrb[107].mxu1 }
0x18ec   :  { %v4724_v62 = vpop.f32.mrb[124].mxu0 }
0x18ed   :  { %v11107_v23 = vadd.f32 %v4724_v62, %v10849_v9  ;;  %v8443_v1 = vpop.f32.mrb[125].mxu0 }
0x18ee   :  { %v4727_v0 = vpop.f32.mrb[126].mxu0  ;;  %v4862_v25 = vpop.f32.mrb[108].mxu1 }
0x18ef   :  { %v11110_v16 = vadd.f32 %v4862_v25, %v10851_v19  ;;  %v8444_v61 = vpop.f32.mrb[127].mxu0  ;;  %v8461_v17 = vpop.f32.mrb[109].mxu1 }
0x18f0   :  { %v4865_v36 = vpop.f32.mrb[110].mxu1 }
0x18f1   :  { %v8462_v51 = vpop.f32.mrb[111].mxu1 }
0x18f4   :  { %v4816_v32 = vpop.f32.mrb[128].mxu0 }
0x18f5   :  { %v11113_v40 = vadd.f32 %v4816_v32, %v10853_v26  ;;  %v8455_v45 = vpop.f32.mrb[129].mxu0 }
0x18f6   :  { %v4819_v21 = vpop.f32.mrb[130].mxu0  ;;  %v4954_v6 = vpop.f32.mrb[112].mxu1 }
0x18f7   :  { %v11116_v9 = vadd.f32 %v4954_v6, %v10855_v52  ;;  %v8456_v29 = vpop.f32.mrb[131].mxu0  ;;  %v8473_v53 = vpop.f32.mrb[113].mxu1  ;;  %v8902_v6 = vld [vmem:[%s11633_s4 + $0x40] sm:$0xff]  }
0x18f8   :  { %v4957_v46 = vpop.f32.mrb[114].mxu1 }
0x18f9   :  { %v8474_v11 = vpop.f32.mrb[115].mxu1 }
0x18fc   :  { %v4908_v19 = vpop.f32.mrb[132].mxu0 }
0x18fd   :  { %v11119_v54 = vadd.f32 %v4908_v19, %v10857_v33  ;;  %v8467_v18 = vpop.f32.mrb[133].mxu0 }
0x18fe   :  { %v4911_v24 = vpop.f32.mrb[134].mxu0 }
0x18ff   :  { %v8468_v20 = vpop.f32.mrb[135].mxu0  ;;  %v8903_v24 = vld [vmem:[%s11633_s4 + $0x48] sm:$0xff]  }
0x1906   :  { %v8501_v22 = vpop.f32.mrb[116].mxu1 }
0x1907   :  { %v5142_v26 = vpop.f32.mrb[117].mxu1  ;;  %v5175_v37 = vpack.c.bf16 %v8501_v22, %v8501_v22  ;;  %v8904_v22 = vld [vmem:[%s11633_s4 + $0x50] sm:$0xff]  }
0x1908   :  { %v5173_v34 = vpack.c.bf16 %v5142_v26, %v5142_v26  ;;  %v8502_v41 = vpop.f32.mrb[118].mxu1  ;;  %v8905_v26 = vld [vmem:[%s11633_s4 + $0x58] sm:$0xff]  }
0x1909   :  { %v5145_v47 = vpop.f32.mrb[119].mxu1  ;;  %v5176_v3 = vpack.c.bf16 %v8502_v41, %v8502_v41  ;;  %v5277_v57 = vsel %vm2732_vm6, %v5175_v37, 0 }
0x190a   :  { %v5185_v8 = vsel %vm2732_vm6, %v5173_v34, 0  ;;  %v5174_v52 = vpack.c.bf16 %v5145_v47, %v5145_v47 }
0x190b   :  { %8508 = vmatpush3.bf16.xpose.msra.mxu0 %v5185_v8  ;;  %v5323_v5 = vsel %vm2732_vm6, %v5176_v3, 0 }
0x190c   :  { %v5231_v28 = vsel %vm2732_vm6, %v5174_v52, 0  ;;  %v8485_v59 = vpop.f32.mrb[136].mxu0  ;;  %8519 = vmatprep.subr.bf16.mxu0 %v9328_v44 }
0x190d   :  { %v5036_v33 = vpop.f32.mrb[137].mxu0  ;;  %8514 = vmatpush3.bf16.xpose.msra.mxu1 %v5231_v28  ;;  %v5045_v39 = vadd.f32 %v8485_v59, %v11122_v58 }
0x190e   :  { %v5037_v50 = vadd.f32 %v5036_v33, %v11122_v58  ;;  %v8486_v38 = vpop.f32.mrb[138].mxu0  ;;  %v8505_v4 = vpop.f32.mrb[120].mxu1  ;;  %8525 = vmatprep.subr.bf16.mxu1 %v9328_v44 }
0x190f   :  { %v5039_v30 = vpop.f32.mrb[139].mxu0  ;;  %v5158_v27 = vpop.f32.mrb[121].mxu1  ;;  %v5048_v10 = vadd.f32 %v8486_v38, %v11122_v58  ;;  %v5069_v1 = vpack.c.bf16 %v5045_v39, %v5045_v39  ;;  %v5179_v51 = vpack.c.bf16 %v8505_v4, %v8505_v4 }
0x1910   :  { %v5067_v60 = vpack.c.bf16 %v5037_v50, %v5037_v50  ;;  %v5040_v48 = vadd.f32 %v5039_v30, %v11122_v58  ;;  %v8506_v2 = vpop.f32.mrb[122].mxu1  ;;  %v5177_v55 = vpack.c.bf16 %v5158_v27, %v5158_v27 }
0x1911   :  { %v5161_v7 = vpop.f32.mrb[123].mxu1  ;;  %v5070_v25 = vpack.c.bf16 %v5048_v10, %v5048_v10  ;;  %v5180_v45 = vpack.c.bf16 %v8506_v2, %v8506_v2  ;;  %v5461_v29 = vsel %vm2732_vm6, %v5179_v51, 0 }
0x1912   :  { %v5068_v56 = vpack.c.bf16 %v5040_v48, %v5040_v48  ;;  %8510 = vmatmul.mubr.msk.bf16.vlgmr.msra.gmra.mrb[144].mxu0 %vm2732_vm6, %v5067_v60  ;;  %v5178_v0 = vpack.c.bf16 %v5161_v7, %v5161_v7  ;;  %v5369_v61 = vsel %vm2732_vm6, %v5177_v55, 0 }
0x1913   :  { %8520 = vmatpush3.bf16.xpose.msra.mxu0 %v5277_v57  ;;  %8521 = vmatprep.mubr.msk.bf16.mxu0 %vm9329_vm5, %v9328_v44  ;;  %v5507_v46 = vsel %vm2732_vm6, %v5180_v45, 0 }
0x1914   :  { %v8489_v43 = vpop.f32.mrb[140].mxu0  ;;  %8516 = vmatmul.mubr.msk.bf16.vlgmr.msra.gmra.mrb[124].mxu1 %vm2732_vm6, %v5068_v56  ;;  %8531 = vmatprep.subr.bf16.mxu0 %v9328_v44  ;;  %v5415_v17 = vsel %vm2732_vm6, %v5178_v0, 0 }
0x1915   :  { %v5052_v35 = vpop.f32.mrb[141].mxu0  ;;  %8526 = vmatpush3.bf16.xpose.msra.mxu1 %v5323_v5  ;;  %8527 = vmatprep.mubr.msk.bf16.mxu1 %vm9329_vm5, %v9328_v44  ;;  %v5061_v11 = vadd.f32 %v8489_v43, %v11122_v58 }
0x1916   :  { %v8490_v42 = vpop.f32.mrb[142].mxu0  ;;  %8537 = vmatprep.subr.bf16.mxu1 %v9328_v44  ;;  %v5053_v36 = vadd.f32 %v5052_v35, %v11122_v58 }
0x1917   :  { %v5055_v62 = vpop.f32.mrb[143].mxu0  ;;  %v5064_v19 = vadd.f32 %v8490_v42, %v11122_v58  ;;  %v5073_v18 = vpack.c.bf16 %v5061_v11, %v5061_v11 }
0x1918   :  { %v5056_v32 = vadd.f32 %v5055_v62, %v11122_v58  ;;  %v5071_v21 = vpack.c.bf16 %v5053_v36, %v5053_v36 }
0x1919   :  { %v5074_v20 = vpack.c.bf16 %v5064_v19, %v5064_v19 }
0x191a   :  { %8522 = vmatmul.mubr.msk.bf16.vlgmr.msra.gmra.mrb[148].mxu0 %vm2732_vm6, %v5069_v1  ;;  %v5072_v53 = vpack.c.bf16 %v5056_v32, %v5056_v32 }
0x191b   :  { %8532 = vmatpush3.bf16.xpose.msra.mxu0 %v5369_v61  ;;  %8533 = vmatprep.mubr.msk.bf16.mxu0 %vm9329_vm5, %v9328_v44 }
0x191c   :  { %8528 = vmatmul.mubr.msk.bf16.vlgmr.msra.gmra.mrb[128].mxu1 %vm2732_vm6, %v5070_v25  ;;  %8543 = vmatprep.subr.bf16.mxu0 %v9328_v44 }
0x191d   :  { %8538 = vmatpush3.bf16.xpose.msra.mxu1 %v5415_v17  ;;  %8539 = vmatprep.mubr.msk.bf16.mxu1 %vm9329_vm5, %v9328_v44 }
0x191e   :  { %8549 = vmatprep.subr.bf16.mxu1 %v9328_v44 }
0x1922   :  { %8534 = vmatmul.mubr.msk.bf16.vlgmr.msra.gmra.mrb[152].mxu0 %vm2732_vm6, %v5071_v21 }
0x1923   :  { %8544 = vmatpush3.bf16.xpose.msra.mxu0 %v5461_v29  ;;  %8545 = vmatprep.mubr.msk.bf16.mxu0 %vm9329_vm5, %v9328_v44 }
0x1924   :  { %8540 = vmatmul.mubr.msk.bf16.vlgmr.msra.gmra.mrb[132].mxu1 %vm2732_vm6, %v5072_v53  ;;  %8555 = vmatprep.subr.bf16.mxu0 %v8902_v6 }
0x1925   :  { %8550 = vmatpush3.bf16.xpose.msra.mxu1 %v5507_v46  ;;  %8551 = vmatprep.mubr.msk.bf16.mxu1 %vm9329_vm5, %v9328_v44 }
0x1926   :  { %8571 = vmatprep.subr.bf16.mxu1 %v9328_v44 }
0x192a   :  { %8546 = vmatmul.mubr.msk.bf16.vlgmr.msra.gmra.mrb[156].mxu0 %vm2732_vm6, %v5073_v18 }
0x192b   :  { %8556 = vmatpush3.bf16.msra.mxu0 %v8902_v6  ;;  %8563 = vmatprep.mubr.msk.bf16.mxu0 %vm283_vm2, %v10560_v15 }
0x192c   :  { %8552 = vmatmul.mubr.msk.bf16.vlgmr.msra.gmra.mrb[136].mxu1 %vm2732_vm6, %v5074_v20  ;;  %8557 = vmatprep.subr.bf16.mxu0 %v8903_v24 }
0x192d   :  { %8573 = vmatprep.mubr.msk.bf16.mxu1 %vm9329_vm5, %v9328_v44 }
0x192f   :  { %8558 = vmatpush3.bf16.msra.mxu0 %v8903_v24 }
0x1930   :  { %8559 = vmatprep.subr.bf16.mxu0 %v8904_v22 }
0x1933   :  { %8560 = vmatpush3.bf16.msra.mxu0 %v8904_v22 }
0x1934   :  { %8561 = vmatprep.subr.bf16.mxu0 %v8905_v26 }
0x1937   :  { %8562 = vmatpush3.bf16.msra.mxu0 %v8905_v26 }
0x1938   :  { %8589 = vmatprep.subr.bf16.mxu0 %v9328_v44 }
0x193a   :  { %8564 = vmatmul.mubr.msk.bf16.vlgmr.msra.gmra.mrb[160].mxu0 %vm283_vm2, %v10566_v12 }
0x193b   :  { %8567 = vmatprep.mubr.msk.bf16.mxu0 %vm283_vm2, %v10575_v13 }
0x1942   :  { %8568 = vmatmul.mubr.msk.bf16.gmra.mrb[164].mxu0 %vm283_vm2, %v10582_v31 }
0x1943   :  { %8591 = vmatprep.mubr.msk.bf16.mxu0 %vm9329_vm5, %v9328_v44 }
0x19e5   :  { %v11191_v34 = vpop.f32.mrb[144].mxu0 }
0x19e6   :  { %v8511_v41 = vpop.f32.mrb[145].mxu0  ;;  %v5549_v47 = vsel %vm3101_vm7, %v11191_v34, -inf }
0x19e7   :  { %v11195_v8 = vpop.f32.mrb[124].mxu1  ;;  %5550 = vmax.xlane.f32.xlu1 %v5549_v47  ;;  %v5224_v52 = vpop.f32.mrb[146].mxu0 }
0x19e8   :  { %v8512_v58 = vpop.f32.mrb[147].mxu0  ;;  %v8517_v28 = vpop.f32.mrb[125].mxu1  ;;  %v5552_v59 = vsel %vm3101_vm7, %v11195_v8, -inf }
0x19e9   :  { %5553 = vmax.xlane.f32.xlu0 %v5552_v59  ;;  %v5270_v33 = vpop.f32.mrb[126].mxu1 }
0x19ea   :  { %v8518_v37 = vpop.f32.mrb[127].mxu1 }
0x19ed   :  { %v11199_v50 = vpop.f32.mrb[148].mxu0 }
0x19ee   :  { %v8523_v38 = vpop.f32.mrb[149].mxu0  ;;  %v5555_v4 = vsel %vm3101_vm7, %v11199_v50, -inf }
0x19ef   :  { %v11203_v30 = vpop.f32.mrb[128].mxu1  ;;  %5556 = vmax.xlane.f32.xlu0 %v5555_v4  ;;  %v5316_v27 = vpop.f32.mrb[150].mxu0 }
0x19f0   :  { %v8524_v3 = vpop.f32.mrb[151].mxu0  ;;  %v8529_v60 = vpop.f32.mrb[129].mxu1  ;;  %v5558_v48 = vsel %vm3101_vm7, %v11203_v30, -inf }
0x19f1   :  { %v5362_v2 = vpop.f32.mrb[130].mxu1  ;;  %5559 = vmax.xlane.f32.xlu1 %v5558_v48 }
0x19f2   :  { %v8530_v7 = vpop.f32.mrb[131].mxu1 }
0x19f5   :  { %v11207_v57 = vpop.f32.mrb[152].mxu0 }
0x19f6   :  { %v8535_v56 = vpop.f32.mrb[153].mxu0  ;;  %v5561_v5 = vsel %vm3101_vm7, %v11207_v57, -inf }
0x19f7   :  { %v11211_v39 = vpop.f32.mrb[132].mxu1  ;;  %5562 = vmax.xlane.f32.xlu0 %v5561_v5  ;;  %v5408_v43 = vpop.f32.mrb[154].mxu0 }
0x19f8   :  { %v8536_v35 = vpop.f32.mrb[155].mxu0  ;;  %v8541_v10 = vpop.f32.mrb[133].mxu1  ;;  %v5564_v55 = vsel %vm3101_vm7, %v11211_v39, -inf }
0x19f9   :  { %v5454_v42 = vpop.f32.mrb[134].mxu1  ;;  %5565 = vmax.xlane.f32.xlu1 %v5564_v55 }
0x19fa   :  { %v8542_v62 = vpop.f32.mrb[135].mxu1 }
0x19fd   :  { %v11215_v1 = vpop.f32.mrb[156].mxu0 }
0x19fe   :  { %v8547_v0 = vpop.f32.mrb[157].mxu0  ;;  %v5567_v25 = vsel %vm3101_vm7, %v11215_v1, -inf }
0x19ff   :  { %v11219_v61 = vpop.f32.mrb[136].mxu1  ;;  %5568 = vmax.xlane.f32.xlu0 %v5567_v25  ;;  %v5500_v17 = vpop.f32.mrb[158].mxu0 }
0x1a00   :  { %v8548_v36 = vpop.f32.mrb[159].mxu0  ;;  %v8553_v51 = vpop.f32.mrb[137].mxu1  ;;  %v5570_v32 = vsel %vm3101_vm7, %v11219_v61, -inf }
0x1a01   :  { %v5546_v45 = vpop.f32.mrb[138].mxu1  ;;  %5571 = vmax.xlane.f32.xlu1 %v5570_v32 }
0x1a02   :  { %v8554_v21 = vpop.f32.mrb[139].mxu1 }
0x1a0d   :  { %v11223_v6 = vpop.f32.mrb[160].mxu0 }
0x1a0e   :  { %v5776_v29 = vpop.f32.mrb[161].mxu0 }
0x1a0f   :  { %v5807_v53 = vpack.c.bf16 %v5776_v29, %v5776_v29  ;;  %v8566_v46 = vpop.f32.mrb[162].mxu0 }
0x1a10   :  { %v5810_v11 = vpack.c.bf16 %v8566_v46, %v8566_v46  ;;  %v11225_v19 = vpop.f32.mrb[163].mxu0 }
0x1a11   :  { %v5819_v18 = vsel %vm3371_vm8, %v5807_v53, 0 }
0x1a12   :  { %v5957_v24 = vsel %vm3371_vm8, %v5810_v11, 0  ;;  %8572 = vmatpush3.bf16.msra.mxu1 %v5819_v18 }
0x1a13   :  { %8590 = vmatpush3.bf16.msra.mxu0 %v5957_v24  ;;  %8577 = vmatprep.subr.bf16.mxu1 %v9328_v44 }
0x1a14   :  { %8601 = vmatprep.subr.bf16.mxu0 %v9328_v44 }
0x1a15   :  { %v11231_v20 = vpop.f32.mrb[164].mxu0 }
0x1a16   :  { %v11233_v22 = vpop.f32.mrb[165].mxu0 }
0x1a17   :  { %v11235_v26 = vpop.f32.mrb[166].mxu0 }
0x1a18   :  { %v11237_v41 = vpop.f32.mrb[167].mxu0 }
0x1a74   :  { %v5551_v47 = vpop.xlane.xlu1 %5550 }
0x1a75   :  { %v5573_v52 = vsub.f32 %v11191_v34, %v5551_v47 }
0x1a76   :  { %v5554_v58 = vpop.xlane.xlu0 %5553 }
0x1a77   :  { %v5581_v28 = vmul.f32 1.442695, %v5573_v52  ;;  %v5574_v59 = vsub.f32 %v11195_v8, %v5554_v58 }
0x1a79   :  { %9148 = vpow2.f32 %v5581_v28  ;;  %v5583_v33 = vmul.f32 1.442695, %v5574_v59 }
0x1a7b   :  { %9150 = vpow2.f32 %v5583_v33 }
0x1a7c   :  { %v5557_v37 = vpop.xlane.xlu0 %5556 }
0x1a7d   :  { %v5575_v38 = vsub.f32 %v11199_v50, %v5557_v37 }
0x1a7e   :  { %v5560_v4 = vpop.xlane.xlu1 %5559 }
0x1a7f   :  { %v5585_v27 = vmul.f32 1.442695, %v5575_v38  ;;  %v5576_v3 = vsub.f32 %v11203_v30, %v5560_v4 }
0x1a81   :  { %9152 = vpow2.f32 %v5585_v27  ;;  %v5587_v60 = vmul.f32 1.442695, %v5576_v3 }
0x1a83   :  { %v9149_v48 = vpop.eup %9148  ;;  %9154 = vpow2.f32 %v5587_v60 }
0x1a84   :  { %v5563_v2 = vpop.xlane.xlu0 %5562  ;;  %v5597_v34 = vsel %vm3101_vm7, %v9149_v48, 0.0 }
0x1a85   :  { %v9151_v7 = vpop.eup %9150  ;;  %v5577_v8 = vsub.f32 %v11207_v57, %v5563_v2  ;;  %5598 = vadd.xlane.f32.xlu1 %v5597_v34 }
0x1a86   :  { %v5566_v56 = vpop.xlane.xlu1 %5565  ;;  %v5600_v5 = vsel %vm3101_vm7, %v9151_v7, 0.0 }
0x1a87   :  { %v5589_v43 = vmul.f32 1.442695, %v5577_v8  ;;  %v5578_v50 = vsub.f32 %v11211_v39, %v5566_v56  ;;  %5601 = vadd.xlane.f32.xlu0 %v5600_v5 }
0x1a89   :  { %9156 = vpow2.f32 %v5589_v43  ;;  %v5591_v30 = vmul.f32 1.442695, %v5578_v50 }
0x1a8b   :  { %v9153_v35 = vpop.eup %9152  ;;  %9158 = vpow2.f32 %v5591_v30 }
0x1a8c   :  { %v5569_v10 = vpop.xlane.xlu0 %5568  ;;  %v5603_v55 = vsel %vm3101_vm7, %v9153_v35, 0.0 }
0x1a8d   :  { %v9155_v42 = vpop.eup %9154  ;;  %v5579_v62 = vsub.f32 %v11215_v1, %v5569_v10  ;;  %5604 = vadd.xlane.f32.xlu0 %v5603_v55 }
0x1a8e   :  { %v5572_v57 = vpop.xlane.xlu1 %5571  ;;  %v5606_v0 = vsel %vm3101_vm7, %v9155_v42, 0.0 }
0x1a8f   :  { %v5593_v25 = vmul.f32 1.442695, %v5579_v62  ;;  %v5580_v17 = vsub.f32 %v11219_v61, %v5572_v57  ;;  %5607 = vadd.xlane.f32.xlu1 %v5606_v0 }
0x1a91   :  { %9160 = vpow2.f32 %v5593_v25  ;;  %v5595_v39 = vmul.f32 1.442695, %v5580_v17  ;;  %v5808_v25 = vpack.c.bf16 %v11225_v19, %v11225_v19 }
0x1a93   :  { %v9157_v36 = vpop.eup %9156  ;;  %9162 = vpow2.f32 %v5595_v39 }
0x1a94   :  { %v5609_v51 = vsel %vm3101_vm7, %v9157_v36, 0.0 }
0x1a95   :  { %v11252_v32 = vpop.eup %9158  ;;  %5610 = vadd.xlane.f32.xlu0 %v5609_v51 }
0x1a96   :  { %v5612_v1 = vsel %vm3101_vm7, %v11252_v32, 0.0 }
0x1a97   :  { %5613 = vadd.xlane.f32.xlu1 %v5612_v1 }
0x1a9b   :  { %v11256_v45 = vpop.eup %9160 }
0x1a9c   :  { %v5615_v21 = vsel %vm3101_vm7, %v11256_v45, 0.0 }
0x1a9d   :  { %v11260_v61 = vpop.eup %9162  ;;  %5616 = vadd.xlane.f32.xlu0 %v5615_v21 }
0x1a9e   :  { %v5618_v29 = vsel %vm3101_vm7, %v11260_v61, 0.0 }
0x1a9f   :  { %5619 = vadd.xlane.f32.xlu1 %v5618_v29 }
0x1b12   :  { %v5599_v53 = vpop.xlane.xlu1 %5598 }
0x1b13   :  { %9164 = vrcp.f32 %v5599_v53 }
0x1b14   :  { %v5602_v46 = vpop.xlane.xlu0 %5601 }
0x1b15   :  { %9166 = vrcp.f32 %v5602_v46 }
0x1b1a   :  { %v5605_v11 = vpop.xlane.xlu0 %5604 }
0x1b1b   :  { %9168 = vrcp.f32 %v5605_v11 }
0x1b1c   :  { %v5608_v18 = vpop.xlane.xlu1 %5607 }
0x1b1d   :  { %v9165_v24 = vpop.eup %9164  ;;  %9170 = vrcp.f32 %v5608_v18 }
0x1b1e   :  { %v5622_v47 = vmul.f32 %v9165_v24, %v9149_v48 }
0x1b1f   :  { %v9167_v52 = vpop.eup %9166 }
0x1b20   :  { %v5637_v58 = vsel %vm3101_vm7, %v5622_v47, 0.0  ;;  %v5624_v28 = vmul.f32 %v9167_v52, %v9151_v7  ;;  %v5865_v52 = vsel %vm3371_vm8, %v5808_v25, 0 }
0x1b21   :  { %v5638_v59 = vrot.slane %v5637_v58, 4 }
0x1b22   :  { %v5644_v33 = vsel %vm3101_vm7, %v5624_v28, 0.0  ;;  %v5611_v37 = vpop.xlane.xlu0 %5610 }
0x1b23   :  { %v5639_v38 = vadd.f32 %v5638_v59, %v5637_v58  ;;  %v5645_v4 = vrot.slane %v5644_v33, 4  ;;  %9172 = vrcp.f32 %v5611_v37 }
0x1b24   :  { %v5614_v27 = vpop.xlane.xlu1 %5613 }
0x1b25   :  { %v9169_v3 = vpop.eup %9168  ;;  %v5640_v60 = vrot.slane %v5639_v38, 2  ;;  %v5646_v2 = vadd.f32 %v5645_v4, %v5644_v33  ;;  %9174 = vrcp.f32 %v5614_v27  ;;  %v5809_v4 = vpack.c.bf16 %v11223_v6, %v11223_v6 }
0x1b26   :  { %v5626_v34 = vmul.f32 %v9169_v3, %v9153_v35 }
0x1b27   :  { %v9171_v8 = vpop.eup %9170  ;;  %v5647_v56 = vrot.slane %v5646_v2, 2  ;;  %v5641_v48 = vadd.f32 %v5640_v60, %v5639_v38  ;;  %v5911_v6 = vsel %vm3371_vm8, %v5809_v4, 0 }
0x1b28   :  { %v5651_v5 = vsel %vm3101_vm7, %v5626_v34, 0.0  ;;  %v5628_v43 = vmul.f32 %v9171_v8, %v9155_v42 }
0x1b29   :  { %v5652_v7 = vrot.slane %v5651_v5, 4  ;;  %v5642_v50 = vrot.slane %v5641_v48, 1  ;;  %v5648_v30 = vadd.f32 %v5647_v56, %v5646_v2  ;;  %v5812_v2 = vpack.c.bf16 %v11237_v41, %v11237_v41 }
0x1b2a   :  { %v5658_v10 = vsel %vm3101_vm7, %v5628_v43, 0.0  ;;  %v5617_v55 = vpop.xlane.xlu0 %5616 }
0x1b2b   :  { %v5653_v62 = vadd.f32 %v5652_v7, %v5651_v5  ;;  %v5659_v57 = vrot.slane %v5658_v10, 4  ;;  %9176 = vrcp.f32 %v5617_v55  ;;  %v5643_v0 = vadd.f32 %v5642_v50, %v5641_v48 }
0x1b2c   :  { %v5620_v35 = vpop.xlane.xlu1 %5619  ;;  %v5649_v17 = vrot.slane %v5648_v30, 1  ;;  %v6049_v41 = vsel %vm3371_vm8, %v5812_v2, 0  ;;  %v8910_v2 = vld [vmem:[%s11632_s3 + $0xc8] sm:$0xff]  }
0x1b2d   :  { %v9173_v39 = vpop.eup %9172  ;;  %v5654_v51 = vrot.slane %v5653_v62, 2  ;;  %v5660_v1 = vadd.f32 %v5659_v57, %v5658_v10  ;;  %9178 = vrcp.f32 %v5620_v35  ;;  %v5693_v42 = vmul.f32 0.125, %v5643_v0 }
0x1b2e   :  { %v5630_v21 = vmul.f32 %v9173_v39, %v9157_v36  ;;  %v5650_v11 = vadd.f32 %v5649_v17, %v5648_v30  ;;  %v5811_v17 = vpack.c.bf16 %v11233_v22, %v11233_v22  ;;  %v8906_v22 = vld [vmem:[%s11632_s3 + $0xe0] sm:$0xff]  }
0x1b2f   :  { %v9175_v29 = vpop.eup %9174  ;;  %v5661_v53 = vrot.slane %v5660_v1, 2  ;;  %v5701_v46 = vpack.c.bf16 %v5693_v42, %v5693_v42  ;;  %v5655_v18 = vadd.f32 %v5654_v51, %v5653_v62  ;;  %v5814_v42 = vpack.c.bf16 %v11235_v26, %v11235_v26 }
0x1b30   :  { %v5665_v24 = vsel %vm3101_vm7, %v5630_v21, 0.0  ;;  %v5632_v47 = vmul.f32 %v9175_v29, %v11252_v32  ;;  %v5694_v38 = vmul.f32 0.125, %v5650_v11 }
0x1b31   :  { %v5662_v19 = vadd.f32 %v5661_v53, %v5660_v1  ;;  %v5666_v58 = vrot.slane %v5665_v24, 4  ;;  %8574 = vmatmul.mubr.msk.bf16.vlgmr.msra.gmra.mrb[140].mxu1 %vm3101_vm7, %v5701_v46  ;;  %v5656_v36 = vrot.slane %v5655_v18, 1  ;;  %v6141_v26 = vsel %vm3371_vm8, %v5814_v42, 0 }
0x1b32   :  { %v5672_v28 = vsel %vm3101_vm7, %v5632_v47, 0.0  ;;  %8578 = vmatpush3.bf16.msra.mxu1 %v5865_v52  ;;  %8579 = vmatprep.mubr.msk.bf16.mxu1 %vm9329_vm5, %v9328_v44  ;;  %v5702_v5 = vpack.c.bf16 %v5694_v38, %v5694_v38 }
0x1b33   :  { %v5663_v59 = vrot.slane %v5662_v19, 1  ;;  %v5667_v33 = vadd.f32 %v5666_v58, %v5665_v24  ;;  %v5673_v37 = vrot.slane %v5672_v28, 4  ;;  %8583 = vmatprep.subr.bf16.mxu1 %v9328_v44  ;;  %v5657_v8 = vadd.f32 %v5656_v36, %v5655_v18 }
0x1b34   :  { %v6003_v18 = vsel %vm3371_vm8, %v5811_v17, 0 }
0x1b35   :  { %v9177_v32 = vpop.eup %9176  ;;  %v5668_v27 = vrot.slane %v5667_v33, 2  ;;  %v5674_v3 = vadd.f32 %v5673_v37, %v5672_v28  ;;  %v5664_v60 = vadd.f32 %v5663_v59, %v5662_v19  ;;  %v5695_v57 = vmul.f32 0.125, %v5657_v8  ;;  %v8908_v37 = vld [vmem:[%s11632_s3 + $0xc0] sm:$0xff]   ;;  %v8912_v8 = vld [vmem:[%s11632_s3 + $0xd0] sm:$0xff]  }
0x1b36   :  { %v5634_v34 = vmul.f32 %v9177_v32, %v11256_v45  ;;  %v5813_v28 = vpack.c.bf16 %v11231_v20, %v11231_v20 }
0x1b37   :  { %v9179_v56 = vpop.eup %9178  ;;  %v5675_v48 = vrot.slane %v5674_v3, 2  ;;  %v5696_v43 = vmul.f32 0.125, %v5664_v60  ;;  %v5669_v7 = vadd.f32 %v5668_v27, %v5667_v33  ;;  %v5703_v21 = vpack.c.bf16 %v5695_v57, %v5695_v57  ;;  %v8907_v27 = vld [vmem:[%s11632_s3 + $0xe8] sm:$0xff]  }
0x1b38   :  { %v5679_v50 = vsel %vm3101_vm7, %v5634_v34, 0.0  ;;  %v5636_v30 = vmul.f32 %v9179_v56, %v11260_v61  ;;  %v6095_v32 = vsel %vm3371_vm8, %v5813_v28, 0  ;;  %v8911_v34 = vld [vmem:[%s11632_s3 + $0xf8] sm:$0xff]  }
0x1b39   :  { %v5680_v10 = vrot.slane %v5679_v50, 4  ;;  %8580 = vmatmul.mubr.msk.bf16.vlgmr.msra.gmra.mrb[144].mxu1 %vm3101_vm7, %v5702_v5  ;;  %v5704_v55 = vpack.c.bf16 %v5696_v43, %v5696_v43  ;;  %v5676_v62 = vadd.f32 %v5675_v48, %v5674_v3  ;;  %v5670_v35 = vrot.slane %v5669_v7, 1  ;;  %v8909_v3 = vld [vmem:[%s11632_s3 + $0xf0] sm:$0xff]   ;;  %v8913_v56 = vld [vmem:[%s11632_s3 + $0xd8] sm:$0xff]  }
0x1b3a   :  { %v5686_v45 = vsel %vm3101_vm7, %v5636_v30, 0.0  ;;  %8584 = vmatpush3.bf16.msra.mxu1 %v5911_v6  ;;  %8585 = vmatprep.mubr.msk.bf16.mxu1 %vm9329_vm5, %v9328_v44 }
0x1b3b   :  { %v5681_v0 = vadd.f32 %v5680_v10, %v5679_v50  ;;  %v5687_v25 = vrot.slane %v5686_v45, 4  ;;  %8592 = vmatmul.mubr.msk.bf16.vlgmr.msra.gmra.mrb[168].mxu0 %vm3101_vm7, %v5704_v55  ;;  %8595 = vmatprep.subr.bf16.mxu1 %v9328_v44  ;;  %v5677_v61 = vrot.slane %v5676_v62, 1  ;;  %v5671_v46 = vadd.f32 %v5670_v35, %v5669_v7 }
0x1b3c   :  { %8602 = vmatpush3.bf16.msra.mxu0 %v6049_v41  ;;  %8603 = vmatprep.mubr.msk.bf16.mxu0 %vm9329_vm5, %v9328_v44 }
0x1b3d   :  { %v5682_v39 = vrot.slane %v5681_v0, 2  ;;  %v5688_v51 = vadd.f32 %v5687_v25, %v5686_v45  ;;  %8613 = vmatprep.subr.bf16.mxu0 %v9328_v44  ;;  %v5678_v1 = vadd.f32 %v5677_v61, %v5676_v62  ;;  %v5697_v52 = vmul.f32 0.125, %v5671_v46 }
0x1b3f   :  { %v5689_v29 = vrot.slane %v5688_v51, 2  ;;  %v5698_v53 = vmul.f32 0.125, %v5678_v1  ;;  %v5683_v11 = vadd.f32 %v5682_v39, %v5681_v0  ;;  %v5705_v59 = vpack.c.bf16 %v5697_v52, %v5697_v52 }
0x1b41   :  { %8586 = vmatmul.mubr.msk.bf16.vlgmr.msra.gmra.mrb[148].mxu1 %vm3101_vm7, %v5703_v21  ;;  %v5706_v24 = vpack.c.bf16 %v5698_v53, %v5698_v53  ;;  %v5690_v47 = vadd.f32 %v5689_v29, %v5688_v51  ;;  %v5684_v58 = vrot.slane %v5683_v11, 1 }
0x1b42   :  { %8596 = vmatpush3.bf16.msra.mxu1 %v6003_v18  ;;  %8597 = vmatprep.mubr.msk.bf16.mxu1 %vm9329_vm5, %v9328_v44 }
0x1b43   :  { %8604 = vmatmul.mubr.msk.bf16.vlgmr.msra.gmra.mrb[172].mxu0 %vm3101_vm7, %v5706_v24  ;;  %8607 = vmatprep.subr.bf16.mxu1 %v9328_v44  ;;  %v5691_v19 = vrot.slane %v5690_v47, 1  ;;  %v5685_v38 = vadd.f32 %v5684_v58, %v5683_v11 }
0x1b44   :  { %8614 = vmatpush3.bf16.msra.mxu0 %v6141_v26  ;;  %8615 = vmatprep.mubr.msk.bf16.mxu0 %vm9329_vm5, %v9328_v44 }
0x1b45   :  { %8635 = vmatprep.subr.bf16.mxu0 %v8906_v22  ;;  %v5692_v36 = vadd.f32 %v5691_v19, %v5690_v47  ;;  %v5699_v20 = vmul.f32 0.125, %v5685_v38  ;;  %v11388_v38 = vld [vmem:[#allocation7 + $0x5] ss:$0 sm:$0xff] }
0x1b47   :  { %v5700_v33 = vmul.f32 0.125, %v5692_v36  ;;  %v5707_v60 = vpack.c.bf16 %v5699_v20, %v5699_v20 }
0x1b49   :  { %8598 = vmatmul.mubr.msk.bf16.vlgmr.msra.gmra.mrb[152].mxu1 %vm3101_vm7, %v5705_v59  ;;  %v5708_v4 = vpack.c.bf16 %v5700_v33, %v5700_v33 }
0x1b4a   :  { %8608 = vmatpush3.bf16.msra.mxu1 %v6095_v32  ;;  %8609 = vmatprep.mubr.msk.bf16.mxu1 %vm9329_vm5, %v9328_v44 }
0x1b4b   :  { %8616 = vmatmul.mubr.msk.bf16.vlgmr.msra.gmra.mrb[176].mxu0 %vm3101_vm7, %v5708_v4  ;;  %8619 = vmatprep.subr.bf16.mxu1 %v8908_v37 }
0x1b4c   :  { %8636 = vmatpush3.bf16.msra.mxu0 %v8906_v22  ;;  %8643 = vmatprep.mubr.msk.bf16.mxu0 %vm283_vm2, %v10560_v15 }
0x1b4d   :  { %8637 = vmatprep.subr.bf16.mxu0 %v8907_v27 }
0x1b50   :  { %8638 = vmatpush3.bf16.msra.mxu0 %v8907_v27 }
0x1b51   :  { %8610 = vmatmul.mubr.msk.bf16.vlgmr.msra.gmra.mrb[156].mxu1 %vm3101_vm7, %v5707_v60  ;;  %8639 = vmatprep.subr.bf16.mxu0 %v8909_v3 }
0x1b52   :  { %8620 = vmatpush3.bf16.msra.mxu1 %v8908_v37  ;;  %8627 = vmatprep.mubr.msk.bf16.mxu1 %vm283_vm2, %v10560_v15 }
0x1b53   :  { %8621 = vmatprep.subr.bf16.mxu1 %v8910_v2 }
0x1b54   :  { %8640 = vmatpush3.bf16.msra.mxu0 %v8909_v3 }
0x1b55   :  { %8641 = vmatprep.subr.bf16.mxu0 %v8911_v34 }
0x1b56   :  { %8622 = vmatpush3.bf16.msra.mxu1 %v8910_v2 }
0x1b57   :  { %8623 = vmatprep.subr.bf16.mxu1 %v8912_v8 }
0x1b58   :  { %8642 = vmatpush3.bf16.msra.mxu0 %v8911_v34 }
0x1b59   :  { %8657 = vmatprep.subr.bf16.mxu0 %v9328_v44 }
0x1b5a   :  { %8624 = vmatpush3.bf16.msra.mxu1 %v8912_v8 }
0x1b5b   :  { %8644 = vmatmul.mubr.msk.bf16.vlgmr.msra.gmra.mrb[180].mxu0 %vm283_vm2, %v10566_v12  ;;  %8625 = vmatprep.subr.bf16.mxu1 %v8913_v56 }
0x1b5c   :  { %8647 = vmatprep.mubr.msk.bf16.mxu0 %vm283_vm2, %v10575_v13 }
0x1b5e   :  { %8626 = vmatpush3.bf16.msra.mxu1 %v8913_v56 }
0x1b5f   :  { %8651 = vmatprep.subr.bf16.mxu1 %v9328_v44 }
0x1b61   :  { %8628 = vmatmul.mubr.msk.bf16.vlgmr.msra.gmra.mrb[160].mxu1 %vm283_vm2, %v10566_v12 }
0x1b62   :  { %8631 = vmatprep.mubr.msk.bf16.mxu1 %vm283_vm2, %v10575_v13 }
0x1b63   :  { %8648 = vmatmul.mubr.msk.bf16.gmra.mrb[184].mxu0 %vm283_vm2, %v10582_v31 }
0x1b64   :  { %8659 = vmatprep.mubr.msk.bf16.mxu0 %vm9329_vm5, %v9328_v44 }
0x1b69   :  { %8632 = vmatmul.mubr.msk.bf16.gmra.mrb[164].mxu1 %vm283_vm2, %v10582_v31 }
0x1b6a   :  { %8653 = vmatprep.mubr.msk.bf16.mxu1 %vm9329_vm5, %v9328_v44 }
0x1c04   :  { %v5855_v48 = vpop.f32.mrb[140].mxu1 }
0x1c05   :  { %v11364_v5 = vadd.f32 %v5855_v48, %v11098_v49  ;;  %v8575_v43 = vpop.f32.mrb[141].mxu1 }
0x1c06   :  { %v5858_v7 = vpop.f32.mrb[142].mxu1 }
0x1c07   :  { %v8576_v50 = vpop.f32.mrb[143].mxu1 }
0x1c0c   :  { %v5901_v30 = vpop.f32.mrb[144].mxu1 }
0x1c0d   :  { %v11367_v6 = vadd.f32 %v5901_v30, %v11101_v14  ;;  %v8581_v10 = vpop.f32.mrb[145].mxu1 }
0x1c0e   :  { %v5904_v55 = vpop.f32.mrb[146].mxu1  ;;  %v5993_v62 = vpop.f32.mrb[168].mxu0 }
0x1c0f   :  { %v11370_v41 = vadd.f32 %v5993_v62, %v11104_v63  ;;  %v8582_v45 = vpop.f32.mrb[147].mxu1  ;;  %v8593_v57 = vpop.f32.mrb[169].mxu0 }
0x1c10   :  { %v5996_v0 = vpop.f32.mrb[170].mxu0 }
0x1c11   :  { %v8594_v25 = vpop.f32.mrb[171].mxu0 }
0x1c14   :  { %v5947_v61 = vpop.f32.mrb[148].mxu1 }
0x1c15   :  { %v11373_v49 = vadd.f32 %v5947_v61, %v11107_v23  ;;  %v8587_v35 = vpop.f32.mrb[149].mxu1 }
0x1c16   :  { %v5950_v17 = vpop.f32.mrb[150].mxu1  ;;  %v6085_v39 = vpop.f32.mrb[172].mxu0 }
0x1c17   :  { %v11376_v14 = vadd.f32 %v6085_v39, %v11110_v16  ;;  %v8588_v51 = vpop.f32.mrb[151].mxu1  ;;  %v8605_v1 = vpop.f32.mrb[173].mxu0 }
0x1c18   :  { %v6088_v42 = vpop.f32.mrb[174].mxu0 }
0x1c19   :  { %v8606_v21 = vpop.f32.mrb[175].mxu0 }
0x1c1c   :  { %v6039_v63 = vpop.f32.mrb[152].mxu1 }
0x1c1d   :  { %v11379_v29 = vadd.f32 %v6039_v63, %v11113_v40  ;;  %v8599_v53 = vpop.f32.mrb[153].mxu1 }
0x1c1e   :  { %v6042_v46 = vpop.f32.mrb[154].mxu1  ;;  %v6177_v11 = vpop.f32.mrb[176].mxu0 }
0x1c1f   :  { %v11382_v23 = vadd.f32 %v6177_v11, %v11116_v9  ;;  %v8600_v18 = vpop.f32.mrb[155].mxu1  ;;  %v8617_v24 = vpop.f32.mrb[177].mxu0  ;;  %v8914_v11 = vld [vmem:[%s11633_s4 + $0x60] sm:$0xff]  }
0x1c20   :  { %v6180_v22 = vpop.f32.mrb[178].mxu0 }
0x1c21   :  { %v8618_v47 = vpop.f32.mrb[179].mxu0 }
0x1c24   :  { %v6131_v16 = vpop.f32.mrb[156].mxu1 }
0x1c25   :  { %v11385_v26 = vadd.f32 %v6131_v16, %v11119_v54  ;;  %v8611_v52 = vpop.f32.mrb[157].mxu1 }
0x1c26   :  { %v6134_v19 = vpop.f32.mrb[158].mxu1 }
0x1c27   :  { %v8612_v58 = vpop.f32.mrb[159].mxu1  ;;  %v8915_v19 = vld [vmem:[%s11633_s4 + $0x68] sm:$0xff]  }
0x1c2e   :  { %v8645_v28 = vpop.f32.mrb[180].mxu0 }
0x1c2f   :  { %v6365_v40 = vpop.f32.mrb[181].mxu0  ;;  %v6398_v27 = vpack.c.bf16 %v8645_v28, %v8645_v28  ;;  %v8916_v28 = vld [vmem:[%s11633_s4 + $0x70] sm:$0xff]  }
0x1c30   :  { %v6396_v36 = vpack.c.bf16 %v6365_v40, %v6365_v40  ;;  %v8646_v59 = vpop.f32.mrb[182].mxu0  ;;  %v8917_v40 = vld [vmem:[%s11633_s4 + $0x78] sm:$0xff]  }
0x1c31   :  { %v6368_v33 = vpop.f32.mrb[183].mxu0  ;;  %v6399_v8 = vpack.c.bf16 %v8646_v59, %v8646_v59  ;;  %v6500_v50 = vsel %vm2732_vm6, %v6398_v27, 0 }
0x1c32   :  { %v6408_v37 = vsel %vm2732_vm6, %v6396_v36, 0  ;;  %v6397_v9 = vpack.c.bf16 %v6368_v33, %v6368_v33 }
0x1c33   :  { %8652 = vmatpush3.bf16.xpose.msra.mxu1 %v6408_v37  ;;  %v6546_v10 = vsel %vm2732_vm6, %v6399_v8, 0 }
0x1c34   :  { %v6454_v32 = vsel %vm2732_vm6, %v6397_v9, 0  ;;  %v8629_v4 = vpop.f32.mrb[160].mxu1  ;;  %8663 = vmatprep.subr.bf16.mxu1 %v9328_v44 }
0x1c35   :  { %v6259_v54 = vpop.f32.mrb[161].mxu1  ;;  %8658 = vmatpush3.bf16.xpose.msra.mxu0 %v6454_v32  ;;  %v6268_v55 = vadd.f32 %v8629_v4, %v11388_v38 }
0x1c36   :  { %v6260_v20 = vadd.f32 %v6259_v54, %v11388_v38  ;;  %v8630_v3 = vpop.f32.mrb[162].mxu1  ;;  %v8649_v60 = vpop.f32.mrb[184].mxu0  ;;  %8669 = vmatprep.subr.bf16.mxu0 %v9328_v44 }
0x1c37   :  { %v6262_v2 = vpop.f32.mrb[163].mxu1  ;;  %v6381_v34 = vpop.f32.mrb[185].mxu0  ;;  %v6271_v57 = vadd.f32 %v8630_v3, %v11388_v38  ;;  %v6292_v35 = vpack.c.bf16 %v6268_v55, %v6268_v55  ;;  %v6402_v21 = vpack.c.bf16 %v8649_v60, %v8649_v60 }
0x1c38   :  { %v6290_v56 = vpack.c.bf16 %v6260_v20, %v6260_v20  ;;  %v6263_v48 = vadd.f32 %v6262_v2, %v11388_v38  ;;  %v8650_v43 = vpop.f32.mrb[186].mxu0  ;;  %v6400_v0 = vpack.c.bf16 %v6381_v34, %v6381_v34 }
0x1c39   :  { %v6384_v7 = vpop.f32.mrb[187].mxu0  ;;  %v6293_v39 = vpack.c.bf16 %v6271_v57, %v6271_v57  ;;  %v6403_v53 = vpack.c.bf16 %v8650_v43, %v8650_v43  ;;  %v6684_v18 = vsel %vm2732_vm6, %v6402_v21, 0 }
0x1c3a   :  { %v6291_v30 = vpack.c.bf16 %v6263_v48, %v6263_v48  ;;  %8654 = vmatmul.mubr.msk.bf16.vlgmr.msra.gmra.mrb[168].mxu1 %vm2732_vm6, %v6290_v56  ;;  %v6401_v17 = vpack.c.bf16 %v6384_v7, %v6384_v7  ;;  %v6592_v51 = vsel %vm2732_vm6, %v6400_v0, 0 }
0x1c3b   :  { %8664 = vmatpush3.bf16.xpose.msra.mxu1 %v6500_v50  ;;  %8665 = vmatprep.mubr.msk.bf16.mxu1 %vm9329_vm5, %v9328_v44  ;;  %v6730_v22 = vsel %vm2732_vm6, %v6403_v53, 0 }
0x1c3c   :  { %v8633_v62 = vpop.f32.mrb[164].mxu1  ;;  %8660 = vmatmul.mubr.msk.bf16.vlgmr.msra.gmra.mrb[188].mxu0 %vm2732_vm6, %v6291_v30  ;;  %8675 = vmatprep.subr.bf16.mxu1 %v9328_v44  ;;  %v6638_v1 = vsel %vm2732_vm6, %v6401_v17, 0 }
0x1c3d   :  { %v6275_v45 = vpop.f32.mrb[165].mxu1  ;;  %8670 = vmatpush3.bf16.xpose.msra.mxu0 %v6546_v10  ;;  %8671 = vmatprep.mubr.msk.bf16.mxu0 %vm9329_vm5, %v9328_v44  ;;  %v6284_v47 = vadd.f32 %v8633_v62, %v11388_v38 }
0x1c3e   :  { %v8634_v25 = vpop.f32.mrb[166].mxu1  ;;  %8681 = vmatprep.subr.bf16.mxu0 %v9328_v44  ;;  %v6276_v42 = vadd.f32 %v6275_v45, %v11388_v38 }
0x1c3f   :  { %v6278_v61 = vpop.f32.mrb[167].mxu1  ;;  %v6287_v16 = vadd.f32 %v8634_v25, %v11388_v38  ;;  %v6296_v52 = vpack.c.bf16 %v6284_v47, %v6284_v47 }
0x1c40   :  { %v6279_v63 = vadd.f32 %v6278_v61, %v11388_v38  ;;  %v6294_v46 = vpack.c.bf16 %v6276_v42, %v6276_v42 }
0x1c41   :  { %v6297_v58 = vpack.c.bf16 %v6287_v16, %v6287_v16 }
0x1c42   :  { %8666 = vmatmul.mubr.msk.bf16.vlgmr.msra.gmra.mrb[172].mxu1 %vm2732_vm6, %v6292_v35  ;;  %v6295_v24 = vpack.c.bf16 %v6279_v63, %v6279_v63 }
0x1c43   :  { %8676 = vmatpush3.bf16.xpose.msra.mxu1 %v6592_v51  ;;  %8677 = vmatprep.mubr.msk.bf16.mxu1 %vm9329_vm5, %v9328_v44 }
0x1c44   :  { %8672 = vmatmul.mubr.msk.bf16.vlgmr.msra.gmra.mrb[192].mxu0 %vm2732_vm6, %v6293_v39  ;;  %8687 = vmatprep.subr.bf16.mxu1 %v9328_v44 }
0x1c45   :  { %8682 = vmatpush3.bf16.xpose.msra.mxu0 %v6638_v1  ;;  %8683 = vmatprep.mubr.msk.bf16.mxu0 %vm9329_vm5, %v9328_v44 }
0x1c46   :  { %8693 = vmatprep.subr.bf16.mxu0 %v9328_v44 }
0x1c4a   :  { %8678 = vmatmul.mubr.msk.bf16.vlgmr.msra.gmra.mrb[176].mxu1 %vm2732_vm6, %v6294_v46 }
0x1c4b   :  { %8688 = vmatpush3.bf16.xpose.msra.mxu1 %v6684_v18  ;;  %8689 = vmatprep.mubr.msk.bf16.mxu1 %vm9329_vm5, %v9328_v44 }
0x1c4c   :  { %8684 = vmatmul.mubr.msk.bf16.vlgmr.msra.gmra.mrb[196].mxu0 %vm2732_vm6, %v6295_v24  ;;  %8699 = vmatprep.subr.bf16.mxu1 %v8914_v11 }
0x1c4d   :  { %8694 = vmatpush3.bf16.xpose.msra.mxu0 %v6730_v22  ;;  %8695 = vmatprep.mubr.msk.bf16.mxu0 %vm9329_vm5, %v9328_v44 }
0x1c4e   :  { %8715 = vmatprep.subr.bf16.mxu0 %v9328_v44 }
0x1c52   :  { %8690 = vmatmul.mubr.msk.bf16.vlgmr.msra.gmra.mrb[180].mxu1 %vm2732_vm6, %v6296_v52 }
0x1c53   :  { %8700 = vmatpush3.bf16.msra.mxu1 %v8914_v11  ;;  %8707 = vmatprep.mubr.msk.bf16.mxu1 %vm283_vm2, %v10560_v15 }
0x1c54   :  { %8696 = vmatmul.mubr.msk.bf16.vlgmr.msra.gmra.mrb[200].mxu0 %vm2732_vm6, %v6297_v58  ;;  %8701 = vmatprep.subr.bf16.mxu1 %v8915_v19 }
0x1c55   :  { %8717 = vmatprep.mubr.msk.bf16.mxu0 %vm9329_vm5, %v9328_v44 }
0x1c57   :  { %8702 = vmatpush3.bf16.msra.mxu1 %v8915_v19 }
0x1c58   :  { %8703 = vmatprep.subr.bf16.mxu1 %v8916_v28 }
0x1c5b   :  { %8704 = vmatpush3.bf16.msra.mxu1 %v8916_v28 }
0x1c5c   :  { %8705 = vmatprep.subr.bf16.mxu1 %v8917_v40 }
0x1c5f   :  { %8706 = vmatpush3.bf16.msra.mxu1 %v8917_v40 }
0x1c60   :  { %8733 = vmatprep.subr.bf16.mxu1 %v9328_v44 }
0x1c62   :  { %8708 = vmatmul.mubr.msk.bf16.vlgmr.msra.gmra.mrb[184].mxu1 %vm283_vm2, %v10566_v12 }
0x1c63   :  { %8711 = vmatprep.mubr.msk.bf16.mxu1 %vm283_vm2, %v10575_v13 }
0x1c6a   :  { %8712 = vmatmul.mubr.msk.bf16.gmra.mrb[188].mxu1 %vm283_vm2, %v10582_v31 }
0x1c6b   :  { %8735 = vmatprep.mubr.msk.bf16.mxu1 %vm9329_vm5, %v9328_v44 }
0x1d0d   :  { %v11457_v15 = vpop.f32.mrb[168].mxu1 }
0x1d0e   :  { %v8655_v36 = vpop.f32.mrb[169].mxu1  ;;  %v6772_v59 = vsel %vm3101_vm7, %v11457_v15, -inf }
0x1d0f   :  { %6773 = vmax.xlane.f32.xlu1 %v6772_v59  ;;  %v6447_v33 = vpop.f32.mrb[170].mxu1  ;;  %v11461_v37 = vpop.f32.mrb[188].mxu0 }
0x1d10   :  { %v8656_v12 = vpop.f32.mrb[171].mxu1  ;;  %v8661_v9 = vpop.f32.mrb[189].mxu0  ;;  %v6775_v13 = vsel %vm3101_vm7, %v11461_v37, -inf }
0x1d11   :  { %6776 = vmax.xlane.f32.xlu0 %v6775_v13  ;;  %v6493_v31 = vpop.f32.mrb[190].mxu0 }
0x1d12   :  { %v8662_v38 = vpop.f32.mrb[191].mxu0 }
0x1d15   :  { %v11465_v32 = vpop.f32.mrb[172].mxu1 }
0x1d16   :  { %v8667_v4 = vpop.f32.mrb[173].mxu1  ;;  %v6778_v54 = vsel %vm3101_vm7, %v11465_v32, -inf }
0x1d17   :  { %6779 = vmax.xlane.f32.xlu1 %v6778_v54  ;;  %v6539_v27 = vpop.f32.mrb[174].mxu1  ;;  %v6582_v20 = vpop.f32.mrb[192].mxu0 }
0x1d18   :  { %v8668_v3 = vpop.f32.mrb[175].mxu1  ;;  %v8673_v60 = vpop.f32.mrb[193].mxu0  ;;  %v6781_v2 = vsel %vm3101_vm7, %v6582_v20, -inf }
0x1d19   :  { %6782 = vmax.xlane.f32.xlu0 %v6781_v2  ;;  %v6585_v34 = vpop.f32.mrb[194].mxu0 }
0x1d1a   :  { %v8674_v8 = vpop.f32.mrb[195].mxu0 }
0x1d1d   :  { %v11470_v56 = vpop.f32.mrb[176].mxu1 }
0x1d1e   :  { %v8679_v48 = vpop.f32.mrb[177].mxu1  ;;  %v6784_v43 = vsel %vm3101_vm7, %v11470_v56, -inf }
0x1d1f   :  { %6785 = vmax.xlane.f32.xlu1 %v6784_v43  ;;  %v6631_v7 = vpop.f32.mrb[178].mxu1  ;;  %v11474_v50 = vpop.f32.mrb[196].mxu0 }
0x1d20   :  { %v8680_v30 = vpop.f32.mrb[179].mxu1  ;;  %v8685_v10 = vpop.f32.mrb[197].mxu0  ;;  %v6787_v55 = vsel %vm3101_vm7, %v11474_v50, -inf }
0x1d21   :  { %6788 = vmax.xlane.f32.xlu0 %v6787_v55  ;;  %v6677_v62 = vpop.f32.mrb[198].mxu0 }
0x1d22   :  { %v8686_v45 = vpop.f32.mrb[199].mxu0 }
0x1d25   :  { %v11478_v57 = vpop.f32.mrb[180].mxu1 }
0x1d26   :  { %v8691_v0 = vpop.f32.mrb[181].mxu1  ;;  %v6790_v25 = vsel %vm3101_vm7, %v11478_v57, -inf }
0x1d27   :  { %6791 = vmax.xlane.f32.xlu1 %v6790_v25  ;;  %v6723_v61 = vpop.f32.mrb[182].mxu1  ;;  %v11482_v35 = vpop.f32.mrb[200].mxu0 }
0x1d28   :  { %v8692_v17 = vpop.f32.mrb[183].mxu1  ;;  %v8697_v39 = vpop.f32.mrb[201].mxu0  ;;  %v6793_v51 = vsel %vm3101_vm7, %v11482_v35, -inf }
0x1d29   :  { %6794 = vmax.xlane.f32.xlu0 %v6793_v51  ;;  %v6769_v1 = vpop.f32.mrb[202].mxu0 }
0x1d2a   :  { %v8698_v42 = vpop.f32.mrb[203].mxu0 }
0x1d35   :  { %v11486_v21 = vpop.f32.mrb[184].mxu1 }
0x1d36   :  { %v6999_v63 = vpop.f32.mrb[185].mxu1 }
0x1d37   :  { %v7030_v53 = vpack.c.bf16 %v6999_v63, %v6999_v63  ;;  %v8710_v46 = vpop.f32.mrb[186].mxu1 }
0x1d38   :  { %v7033_v11 = vpack.c.bf16 %v8710_v46, %v8710_v46  ;;  %v11488_v18 = vpop.f32.mrb[187].mxu1 }
0x1d39   :  { %v7042_v24 = vsel %vm3371_vm8, %v7030_v53, 0 }
0x1d3a   :  { %v7180_v22 = vsel %vm3371_vm8, %v7033_v11, 0  ;;  %8716 = vmatpush3.bf16.msra.mxu0 %v7042_v24 }
0x1d3b   :  { %8734 = vmatpush3.bf16.msra.mxu1 %v7180_v22  ;;  %8721 = vmatprep.subr.bf16.mxu0 %v9328_v44 }
0x1d3c   :  { %8745 = vmatprep.subr.bf16.mxu1 %v9328_v44 }
0x1d3d   :  { %v11494_v47 = vpop.f32.mrb[188].mxu1 }
0x1d3e   :  { %v11496_v16 = vpop.f32.mrb[189].mxu1 }
0x1d3f   :  { %v11498_v52 = vpop.f32.mrb[190].mxu1 }
0x1d40   :  { %v11500_v19 = vpop.f32.mrb[191].mxu1 }
0x1d9c   :  { %v6774_v58 = vpop.xlane.xlu1 %6773 }
0x1d9d   :  { %v6796_v28 = vsub.f32 %v11457_v15, %v6774_v58 }
0x1d9e   :  { %v6777_v40 = vpop.xlane.xlu0 %6776 }
0x1d9f   :  { %v6804_v36 = vmul.f32 1.442695, %v6796_v28  ;;  %v6797_v59 = vsub.f32 %v11461_v37, %v6777_v40 }
0x1da1   :  { %9180 = vpow2.f32 %v6804_v36  ;;  %v6806_v33 = vmul.f32 1.442695, %v6797_v59 }
0x1da3   :  { %9182 = vpow2.f32 %v6806_v33 }
0x1da4   :  { %v6780_v12 = vpop.xlane.xlu1 %6779 }
0x1da5   :  { %v6798_v9 = vsub.f32 %v11465_v32, %v6780_v12 }
0x1da6   :  { %v6783_v13 = vpop.xlane.xlu0 %6782 }
0x1da7   :  { %v6808_v31 = vmul.f32 1.442695, %v6798_v9  ;;  %v6799_v38 = vsub.f32 %v6582_v20, %v6783_v13 }
0x1da9   :  { %9184 = vpow2.f32 %v6808_v31  ;;  %v6810_v4 = vmul.f32 1.442695, %v6799_v38 }
0x1dab   :  { %v9181_v54 = vpop.eup %9180  ;;  %9186 = vpow2.f32 %v6810_v4 }
0x1dac   :  { %v6786_v27 = vpop.xlane.xlu1 %6785  ;;  %v6820_v15 = vsel %vm3101_vm7, %v9181_v54, 0.0 }
0x1dad   :  { %v9183_v3 = vpop.eup %9182  ;;  %v6800_v60 = vsub.f32 %v11470_v56, %v6786_v27  ;;  %6821 = vadd.xlane.f32.xlu1 %v6820_v15 }
0x1dae   :  { %v6789_v37 = vpop.xlane.xlu0 %6788  ;;  %v6823_v2 = vsel %vm3101_vm7, %v9183_v3, 0.0 }
0x1daf   :  { %v6812_v34 = vmul.f32 1.442695, %v6800_v60  ;;  %v6801_v32 = vsub.f32 %v11474_v50, %v6789_v37  ;;  %6824 = vadd.xlane.f32.xlu0 %v6823_v2 }
0x1db1   :  { %9188 = vpow2.f32 %v6812_v34  ;;  %v6814_v20 = vmul.f32 1.442695, %v6801_v32 }
0x1db3   :  { %v9185_v8 = vpop.eup %9184  ;;  %9190 = vpow2.f32 %v6814_v20 }
0x1db4   :  { %v6792_v48 = vpop.xlane.xlu1 %6791  ;;  %v6826_v43 = vsel %vm3101_vm7, %v9185_v8, 0.0 }
0x1db5   :  { %v9187_v7 = vpop.eup %9186  ;;  %v6802_v30 = vsub.f32 %v11478_v57, %v6792_v48  ;;  %6827 = vadd.xlane.f32.xlu1 %v6826_v43  ;;  %v7031_v43 = vpack.c.bf16 %v11488_v18, %v11488_v18 }
0x1db6   :  { %v6795_v56 = vpop.xlane.xlu0 %6794  ;;  %v6829_v10 = vsel %vm3101_vm7, %v9187_v7, 0.0 }
0x1db7   :  { %v6816_v55 = vmul.f32 1.442695, %v6802_v30  ;;  %v6803_v62 = vsub.f32 %v11482_v35, %v6795_v56  ;;  %6830 = vadd.xlane.f32.xlu0 %v6829_v10 }
0x1db9   :  { %9192 = vpow2.f32 %v6816_v55  ;;  %v6818_v50 = vmul.f32 1.442695, %v6803_v62 }
0x1dbb   :  { %v9189_v45 = vpop.eup %9188  ;;  %9194 = vpow2.f32 %v6818_v50 }
0x1dbc   :  { %v6832_v0 = vsel %vm3101_vm7, %v9189_v45, 0.0 }
0x1dbd   :  { %v11514_v25 = vpop.eup %9190  ;;  %6833 = vadd.xlane.f32.xlu1 %v6832_v0 }
0x1dbe   :  { %v6835_v57 = vsel %vm3101_vm7, %v11514_v25, 0.0 }
0x1dbf   :  { %6836 = vadd.xlane.f32.xlu0 %v6835_v57 }
0x1dc3   :  { %v11518_v61 = vpop.eup %9192 }
0x1dc4   :  { %v6838_v17 = vsel %vm3101_vm7, %v11518_v61, 0.0 }
0x1dc5   :  { %v11522_v35 = vpop.eup %9194  ;;  %6839 = vadd.xlane.f32.xlu1 %v6838_v17 }
0x1dc6   :  { %v6841_v39 = vsel %vm3101_vm7, %v11522_v35, 0.0 }
0x1dc7   :  { %6842 = vadd.xlane.f32.xlu0 %v6841_v39 }
0x1e3a   :  { %v6822_v51 = vpop.xlane.xlu1 %6821 }
0x1e3b   :  { %9196 = vrcp.f32 %v6822_v51 }
0x1e3c   :  { %v6825_v1 = vpop.xlane.xlu0 %6824 }
0x1e3d   :  { %9198 = vrcp.f32 %v6825_v1 }
0x1e42   :  { %v6828_v42 = vpop.xlane.xlu1 %6827 }
0x1e43   :  { %9200 = vrcp.f32 %v6828_v42  ;;  %v7088_v42 = vsel %vm3371_vm8, %v7031_v43, 0 }
0x1e44   :  { %v6831_v63 = vpop.xlane.xlu0 %6830 }
0x1e45   :  { %v9197_v53 = vpop.eup %9196  ;;  %9202 = vrcp.f32 %v6831_v63 }
0x1e46   :  { %v6845_v46 = vmul.f32 %v9197_v53, %v9181_v54 }
0x1e47   :  { %v9199_v11 = vpop.eup %9198 }
0x1e48   :  { %v6860_v24 = vsel %vm3101_vm7, %v6845_v46, 0.0  ;;  %v6847_v22 = vmul.f32 %v9199_v11, %v9183_v3 }
0x1e49   :  { %v6861_v58 = vrot.slane %v6860_v24, 4 }
0x1e4a   :  { %v6867_v28 = vsel %vm3101_vm7, %v6847_v22, 0.0  ;;  %v6834_v40 = vpop.xlane.xlu1 %6833 }
0x1e4b   :  { %v6862_v36 = vadd.f32 %v6861_v58, %v6860_v24  ;;  %v6868_v59 = vrot.slane %v6867_v28, 4  ;;  %9204 = vrcp.f32 %v6834_v40  ;;  %v7032_v58 = vpack.c.bf16 %v11486_v21, %v11486_v21 }
0x1e4c   :  { %v6837_v33 = vpop.xlane.xlu0 %6836 }
0x1e4d   :  { %v9201_v12 = vpop.eup %9200  ;;  %v6863_v9 = vrot.slane %v6862_v36, 2  ;;  %v6869_v13 = vadd.f32 %v6868_v59, %v6867_v28  ;;  %9206 = vrcp.f32 %v6837_v33  ;;  %v7035_v59 = vpack.c.bf16 %v11500_v19, %v11500_v19 }
0x1e4e   :  { %v6849_v31 = vmul.f32 %v9201_v12, %v9185_v8  ;;  %v7134_v21 = vsel %vm3371_vm8, %v7032_v58, 0 }
0x1e4f   :  { %v9203_v38 = vpop.eup %9202  ;;  %v6870_v4 = vrot.slane %v6869_v13, 2  ;;  %v6864_v54 = vadd.f32 %v6863_v9, %v6862_v36  ;;  %v7272_v19 = vsel %vm3371_vm8, %v7035_v59, 0 }
0x1e50   :  { %v6874_v27 = vsel %vm3101_vm7, %v6849_v31, 0.0  ;;  %v6851_v15 = vmul.f32 %v9203_v38, %v9187_v7 }
0x1e51   :  { %v6875_v3 = vrot.slane %v6874_v27, 4  ;;  %v6865_v60 = vrot.slane %v6864_v54, 1  ;;  %v6871_v37 = vadd.f32 %v6870_v4, %v6869_v13 }
0x1e52   :  { %v6881_v2 = vsel %vm3101_vm7, %v6851_v15, 0.0  ;;  %v6840_v34 = vpop.xlane.xlu1 %6839 }
0x1e53   :  { %v6876_v32 = vadd.f32 %v6875_v3, %v6874_v27  ;;  %v6882_v20 = vrot.slane %v6881_v2, 4  ;;  %9208 = vrcp.f32 %v6840_v34  ;;  %v6866_v48 = vadd.f32 %v6865_v60, %v6864_v54 }
0x1e54   :  { %v6843_v8 = vpop.xlane.xlu0 %6842  ;;  %v6872_v30 = vrot.slane %v6871_v37, 1 }
0x1e55   :  { %v9205_v56 = vpop.eup %9204  ;;  %v6877_v10 = vrot.slane %v6876_v32, 2  ;;  %v6883_v55 = vadd.f32 %v6882_v20, %v6881_v2  ;;  %9210 = vrcp.f32 %v6843_v8  ;;  %v6916_v7 = vmul.f32 0.125, %v6866_v48 }
0x1e56   :  { %v6853_v62 = vmul.f32 %v9205_v56, %v9189_v45  ;;  %v6873_v17 = vadd.f32 %v6872_v30, %v6871_v37  ;;  %v7034_v20 = vpack.c.bf16 %v11496_v16, %v11496_v16  ;;  %v7037_v30 = vpack.c.bf16 %v11498_v52, %v11498_v52 }
0x1e57   :  { %v9207_v50 = vpop.eup %9206  ;;  %v6884_v0 = vrot.slane %v6883_v55, 2  ;;  %v6924_v57 = vpack.c.bf16 %v6916_v7, %v6916_v7  ;;  %v6878_v39 = vadd.f32 %v6877_v10, %v6876_v32 }
0x1e58   :  { %v6888_v51 = vsel %vm3101_vm7, %v6853_v62, 0.0  ;;  %v6855_v1 = vmul.f32 %v9207_v50, %v11514_v25  ;;  %v6917_v22 = vmul.f32 0.125, %v6873_v17  ;;  %v7226_v50 = vsel %vm3371_vm8, %v7034_v20, 0 }
0x1e59   :  { %v6885_v18 = vadd.f32 %v6884_v0, %v6883_v55  ;;  %v6889_v63 = vrot.slane %v6888_v51, 4  ;;  %8718 = vmatmul.mubr.msk.bf16.vlgmr.msra.gmra.mrb[204].mxu0 %vm3101_vm7, %v6924_v57  ;;  %v6879_v45 = vrot.slane %v6878_v39, 1  ;;  %v7364_v16 = vsel %vm3371_vm8, %v7037_v30, 0 }
0x1e5a   :  { %v6895_v53 = vsel %vm3101_vm7, %v6855_v1, 0.0  ;;  %8722 = vmatpush3.bf16.msra.mxu0 %v7088_v42  ;;  %8723 = vmatprep.mubr.msk.bf16.mxu0 %vm9329_vm5, %v9328_v44  ;;  %v6925_v31 = vpack.c.bf16 %v6917_v22, %v6917_v22  ;;  %v8920_v22 = vld [vmem:[%s11634_s5 + $0x10] sm:$0xff]  }
0x1e5b   :  { %v6886_v46 = vrot.slane %v6885_v18, 1  ;;  %v6890_v11 = vadd.f32 %v6889_v63, %v6888_v51  ;;  %v6896_v24 = vrot.slane %v6895_v53, 4  ;;  %8727 = vmatprep.subr.bf16.mxu0 %v9328_v44  ;;  %v6880_v12 = vadd.f32 %v6879_v45, %v6878_v39 }
0x1e5c   :  { %v7036_v51 = vpack.c.bf16 %v11494_v47, %v11494_v47 }
0x1e5d   :  { %v9209_v25 = vpop.eup %9208  ;;  %v6891_v28 = vrot.slane %v6890_v11, 2  ;;  %v6897_v40 = vadd.f32 %v6896_v24, %v6895_v53  ;;  %v6887_v36 = vadd.f32 %v6886_v46, %v6885_v18  ;;  %v6918_v37 = vmul.f32 0.125, %v6880_v12  ;;  %v8919_v24 = vld [vmem:[%s11634_s5 + $0x8] sm:$0xff]  }
0x1e5e   :  { %v6857_v33 = vmul.f32 %v9209_v25, %v11518_v61  ;;  %v7318_v53 = vsel %vm3371_vm8, %v7036_v51, 0  ;;  %v8921_v25 = vld [vmem:[%s11634_s5 + $0x18] sm:$0xff]  }
0x1e5f   :  { %v9211_v9 = vpop.eup %9210  ;;  %v6898_v13 = vrot.slane %v6897_v40, 2  ;;  %v6919_v38 = vmul.f32 0.125, %v6887_v36  ;;  %v6892_v4 = vadd.f32 %v6891_v28, %v6890_v11  ;;  %v6926_v56 = vpack.c.bf16 %v6918_v37, %v6918_v37  ;;  %v8918_v11 = vld [vmem:[%s11634_s5] sm:$0xff]  }
0x1e60   :  { %v6902_v54 = vsel %vm3101_vm7, %v6857_v33, 0.0  ;;  %v6859_v27 = vmul.f32 %v9211_v9, %v11522_v35  ;;  %v11601_v33 = vld [vmem:[#allocation7 + $0x6] ss:$0 sm:$0xff] }
0x1e61   :  { %v6903_v15 = vrot.slane %v6902_v54, 4  ;;  %8724 = vmatmul.mubr.msk.bf16.vlgmr.msra.gmra.mrb[208].mxu0 %vm3101_vm7, %v6925_v31  ;;  %v6927_v3 = vpack.c.bf16 %v6919_v38, %v6919_v38  ;;  %v6899_v60 = vadd.f32 %v6898_v13, %v6897_v40  ;;  %v6893_v32 = vrot.slane %v6892_v4, 1 }
0x1e62   :  { %v6909_v61 = vsel %vm3101_vm7, %v6859_v27, 0.0  ;;  %8728 = vmatpush3.bf16.msra.mxu0 %v7134_v21  ;;  %8729 = vmatprep.mubr.msk.bf16.mxu0 %vm9329_vm5, %v9328_v44 }
0x1e63   :  { %v6904_v2 = vadd.f32 %v6903_v15, %v6902_v54  ;;  %v6910_v34 = vrot.slane %v6909_v61, 4  ;;  %8736 = vmatmul.mubr.msk.bf16.vlgmr.msra.gmra.mrb[192].mxu1 %vm3101_vm7, %v6927_v3  ;;  %8739 = vmatprep.subr.bf16.mxu0 %v9328_v44  ;;  %v6900_v35 = vrot.slane %v6899_v60, 1  ;;  %v6894_v7 = vadd.f32 %v6893_v32, %v6892_v4 }
0x1e64   :  { %8746 = vmatpush3.bf16.msra.mxu1 %v7272_v19  ;;  %8747 = vmatprep.mubr.msk.bf16.mxu1 %vm9329_vm5, %v9328_v44 }
0x1e65   :  { %v6905_v48 = vrot.slane %v6904_v2, 2  ;;  %v6911_v43 = vadd.f32 %v6910_v34, %v6909_v61  ;;  %8757 = vmatprep.subr.bf16.mxu1 %v9328_v44  ;;  %v6901_v8 = vadd.f32 %v6900_v35, %v6899_v60  ;;  %v6920_v52 = vmul.f32 0.125, %v6894_v7 }
0x1e67   :  { %v6912_v10 = vrot.slane %v6911_v43, 2  ;;  %v6921_v55 = vmul.f32 0.125, %v6901_v8  ;;  %v6906_v62 = vadd.f32 %v6905_v48, %v6904_v2  ;;  %v6928_v42 = vpack.c.bf16 %v6920_v52, %v6920_v52 }
0x1e69   :  { %8730 = vmatmul.mubr.msk.bf16.vlgmr.msra.gmra.mrb[212].mxu0 %vm3101_vm7, %v6926_v56  ;;  %v6929_v0 = vpack.c.bf16 %v6921_v55, %v6921_v55  ;;  %v6913_v57 = vadd.f32 %v6912_v10, %v6911_v43  ;;  %v6907_v39 = vrot.slane %v6906_v62, 1 }
0x1e6a   :  { %8740 = vmatpush3.bf16.msra.mxu0 %v7226_v50  ;;  %8741 = vmatprep.mubr.msk.bf16.mxu0 %vm9329_vm5, %v9328_v44 }
0x1e6b   :  { %8748 = vmatmul.mubr.msk.bf16.vlgmr.msra.gmra.mrb[196].mxu1 %vm3101_vm7, %v6929_v0  ;;  %8751 = vmatprep.subr.bf16.mxu0 %v9328_v44  ;;  %v6914_v17 = vrot.slane %v6913_v57, 1  ;;  %v6908_v63 = vadd.f32 %v6907_v39, %v6906_v62 }
0x1e6c   :  { %8758 = vmatpush3.bf16.msra.mxu1 %v7364_v16  ;;  %8759 = vmatprep.mubr.msk.bf16.mxu1 %vm9329_vm5, %v9328_v44 }
0x1e6d   :  { %v6915_v1 = vadd.f32 %v6914_v17, %v6913_v57  ;;  %8775 = vmatprep.subr.bf16.mxu1 %v9328_v44  ;;  %v6922_v46 = vmul.f32 0.125, %v6908_v63 }
0x1e6f   :  { %v6923_v18 = vmul.f32 0.125, %v6915_v1  ;;  %v6930_v47 = vpack.c.bf16 %v6922_v46, %v6922_v46 }
0x1e71   :  { %8742 = vmatmul.mubr.msk.bf16.vlgmr.msra.gmra.mrb[216].mxu0 %vm3101_vm7, %v6928_v42  ;;  %v6931_v45 = vpack.c.bf16 %v6923_v18, %v6923_v18 }
0x1e72   :  { %8752 = vmatpush3.bf16.msra.mxu0 %v7318_v53  ;;  %8753 = vmatprep.mubr.msk.bf16.mxu0 %vm9329_vm5, %v9328_v44 }
0x1e73   :  { %8760 = vmatmul.mubr.msk.bf16.vlgmr.msra.gmra.mrb[200].mxu1 %vm3101_vm7, %v6931_v45  ;;  %8763 = vmatprep.subr.bf16.mxu0 %v9328_v44 }
0x1e74   :  { %8779 = vmatprep.mubr.msk.bf16.mxu1 %vm9329_vm5, %v9328_v44 }
0x1e79   :  { %8754 = vmatmul.mubr.msk.bf16.vlgmr.msra.gmra.mrb[220].mxu0 %vm3101_vm7, %v6930_v47 }
0x1e7a   :  { %8771 = vmatprep.mubr.msk.bf16.mxu0 %vm9329_vm5, %v9328_v44  ;;  %8764 = vmatpush3.bf16.msra.mxu0 %v8918_v11 }
0x1e7b   :  { %8765 = vmatprep.subr.bf16.mxu0 %v9328_v44 }
0x1e7e   :  { %8766 = vmatpush3.bf16.msra.mxu0 %v8919_v24 }
0x1e7f   :  { %8767 = vmatprep.subr.bf16.mxu0 %v9328_v44 }
0x1e82   :  { %8768 = vmatpush3.bf16.msra.mxu0 %v8920_v22 }
0x1e83   :  { %8769 = vmatprep.subr.bf16.mxu0 %v9328_v44 }
0x1e86   :  { %8770 = vmatpush3.bf16.msra.mxu0 %v8921_v25 }
0x1f2c   :  { %v7078_v58 = vpop.f32.mrb[204].mxu0 }
0x1f2d   :  { %v7406_v28 = vadd.f32 %v7078_v58, %v11364_v5  ;;  %v8719_v40 = vpop.f32.mrb[205].mxu0 }
0x1f2e   :  { %v7081_v36 = vpop.f32.mrb[206].mxu0 }
0x1f2f   :  { %v8720_v59 = vpop.f32.mrb[207].mxu0  ;;  %v7415_v9 = vadd.f32 %v11601_v33, %v7406_v28 }
0x1f31   :  { %v7423_v3 = vpack.c.bf16 %v7415_v9, %v7415_v9 }
0x1f33   :  { %v7448_v34 = vunpack.c.l.b16 %v7423_v3 }
0x1f34   :  { %v7124_v12 = vpop.f32.mrb[208].mxu0 }
0x1f35   :  { %v7407_v13 = vadd.f32 %v7124_v12, %v11367_v6  ;;  %v8725_v31 = vpop.f32.mrb[209].mxu0 }
0x1f36   :  { %v7127_v38 = vpop.f32.mrb[210].mxu0  ;;  %v7216_v4 = vpop.f32.mrb[192].mxu1 }
0x1f37   :  { %v7416_v54 = vadd.f32 %v11601_v33, %v7407_v13  ;;  %v7409_v27 = vadd.f32 %v7216_v4, %v11370_v41  ;;  %v8726_v21 = vpop.f32.mrb[211].mxu0  ;;  %v8737_v15 = vpop.f32.mrb[193].mxu1 }
0x1f38   :  { %v7219_v5 = vpop.f32.mrb[194].mxu1 }
0x1f39   :  { %v7424_v60 = vpack.c.bf16 %v7416_v54, %v7416_v54  ;;  %v8738_v19 = vpop.f32.mrb[195].mxu1  ;;  %v7418_v61 = vadd.f32 %v11601_v33, %v7409_v27 }
0x1f3a   :  { %v7439_v19 = vld [vmem:[#allocation7 + $0x7] ss:$0 sm:$0xff] }
0x1f3b   :  { %v7449_v37 = vunpack.c.l.b16 %v7424_v60  ;;  %v7426_v20 = vpack.c.bf16 %v7418_v61, %v7418_v61  ;;  %v8922_v60 = vld [vmem:[%s11635_s6] sm:$0xff]  }
0x1f3c   :  { %v7170_v2 = vpop.f32.mrb[212].mxu0  ;;  %8776 = vmatpush3.bf16.msra.mxu1 %v8922_v60 }
0x1f3d   :  { %v7456_v6 = vrot.slane %v7449_v37, 7  ;;  %v7408_v35 = vadd.f32 %v7170_v2, %v11373_v49  ;;  %v8731_v32 = vpop.f32.mrb[213].mxu0  ;;  %v7451_v50 = vunpack.c.l.b16 %v7426_v20  ;;  %8777 = vmatprep.subr.bf16.mxu1 %v9328_v44 }
0x1f3e   :  { %v7173_v48 = vpop.f32.mrb[214].mxu0  ;;  %v7308_v43 = vpop.f32.mrb[196].mxu1 }
0x1f3f   :  { %v7458_v41 = vsel %vm7457_vm9, %v7456_v6, %v7448_v34  ;;  %v7417_v8 = vadd.f32 %v11601_v33, %v7408_v35  ;;  %v7411_v30 = vadd.f32 %v7308_v43, %v11376_v14  ;;  %v8732_v56 = vpop.f32.mrb[215].mxu0  ;;  %v8749_v10 = vpop.f32.mrb[197].mxu1  ;;  %v7462_v39 = vrot.slane %v7451_v50, 5 }
0x1f40   :  { %v7311_v55 = vpop.f32.mrb[198].mxu1 }
0x1f41   :  { %v7425_v7 = vpack.c.bf16 %v7417_v8, %v7417_v8  ;;  %v8750_v62 = vpop.f32.mrb[199].mxu1  ;;  %v7420_v0 = vadd.f32 %v11601_v33, %v7411_v30  ;;  %v7557_v8 = vld [vmem:[#allocation7 + $0x10] ss:$0 sm:$0xff] }
0x1f43   :  { %v7450_v57 = vunpack.c.l.b16 %v7425_v7  ;;  %v7428_v51 = vpack.c.bf16 %v7420_v0, %v7420_v0 }
0x1f44   :  { %v7262_v49 = vpop.f32.mrb[216].mxu0 }
0x1f45   :  { %v7459_v16 = vrot.slane %v7450_v57, 6  ;;  %v7410_v52 = vadd.f32 %v7262_v49, %v11379_v29  ;;  %v8743_v17 = vpop.f32.mrb[217].mxu0  ;;  %v7453_v22 = vunpack.c.l.b16 %v7428_v51 }
0x1f46   :  { %v7265_v1 = vpop.f32.mrb[218].mxu0  ;;  %v7400_v14 = vpop.f32.mrb[200].mxu1 }
0x1f47   :  { %v7461_v42 = vsel %vm7460_vm10, %v7459_v16, %v7458_v41  ;;  %v7419_v18 = vadd.f32 %v11601_v33, %v7410_v52  ;;  %v7413_v63 = vadd.f32 %v7400_v14, %v11382_v23  ;;  %v8744_v53 = vpop.f32.mrb[219].mxu0  ;;  %v8761_v45 = vpop.f32.mrb[201].mxu1  ;;  %v7468_v59 = vrot.slane %v7453_v22, 3 }
0x1f48   :  { %v7464_v46 = vsel %vm7463_vm11, %v7462_v39, %v7461_v42  ;;  %v7403_v47 = vpop.f32.mrb[202].mxu1 }
0x1f49   :  { %v7427_v11 = vpack.c.bf16 %v7419_v18, %v7419_v18  ;;  %v8762_v24 = vpop.f32.mrb[203].mxu1  ;;  %v7422_v29 = vadd.f32 %v11601_v33, %v7413_v63 }
0x1f4b   :  { %v7452_v25 = vunpack.c.l.b16 %v7427_v11  ;;  %v7430_v12 = vpack.c.bf16 %v7422_v29, %v7422_v29 }
0x1f4c   :  { %v7354_v58 = vpop.f32.mrb[220].mxu0 }
0x1f4d   :  { %v7465_v28 = vrot.slane %v7452_v25, 4  ;;  %v7412_v40 = vadd.f32 %v7354_v58, %v11385_v26  ;;  %v8755_v36 = vpop.f32.mrb[221].mxu0  ;;  %v7455_v54 = vunpack.c.l.b16 %v7430_v12 }
0x1f4e   :  { %v7357_v23 = vpop.f32.mrb[222].mxu0 }
0x1f4f   :  { %v7467_v9 = vsel %vm7466_vm12, %v7465_v28, %v7464_v46  ;;  %v7421_v13 = vadd.f32 %v11601_v33, %v7412_v40  ;;  %v8756_v31 = vpop.f32.mrb[223].mxu0  ;;  %v7474_v15 = vrot.slane %v7455_v54, 1  ;;  %v8923_v33 = vld [vmem:[%s11635_s6 + $0x8] sm:$0xff]  }
0x1f50   :  { %v7470_v38 = vsel %vm7469_vm13, %v7468_v59, %v7467_v9  ;;  %8778 = vmatpush3.bf16.msra.mxu1 %v8923_v33 }
0x1f51   :  { %v7429_v4 = vpack.c.bf16 %v7421_v13, %v7421_v13 }
0x1f53   :  { %v7454_v27 = vunpack.c.l.b16 %v7429_v4 }
0x1f55   :  { %v7471_v21 = vrot.slane %v7454_v27, 2 }
0x1f57   :  { %v7473_v5 = vsel %vm7472_vm14, %v7471_v21, %v7470_v38 }
0x1f58   :  { %v7476_v3 = vsel %vm7475_vm15, %v7474_v15, %v7473_v5 }
0x1f59   :  { %v7477_v26 = vpack.c.b16 %v7476_v3, %v7476_v3 }
0x1f5b   :  { %8772 = vmatmul.mubr.msk.bf16.vlgmr.msra.gmra.mrb[224].mxu0 %vm283_vm2, %v7477_v26 }
0x202e   :  { %v7539_v61 = vpop.f32.mrb[224].mxu0 }
0x202f   :  { %v7540_v37 = vadd.f32 %v7539_v61, %v7439_v19  ;;  %v8773_v2 = vpop.f32.mrb[225].mxu0 }
0x2030   :  { %v7542_v34 = vpop.f32.mrb[226].mxu0 }
0x2031   :  { %v7545_v6 = vsub.f32 0.0, %v7540_v37  ;;  %v8774_v35 = vpop.f32.mrb[227].mxu0 }
0x2033   :  { %v7546_v32 = vmul.f32 1.442695, %v7545_v6 }
0x2035   :  { %9212 = vpow2.f32 %v7546_v32 }
0x203f   :  { %v9213_v20 = vpop.eup %9212 }
0x2040   :  { %v7548_v48 = vadd.f32 1.0, %v9213_v20 }
0x2042   :  { %9214 = vrcp.f32 %v7548_v48 }
0x204c   :  { %v9215_v43 = vpop.eup %9214 }
0x204d   :  { %v7551_v41 = vmul.f32 %v9215_v43, %v7540_v37 }
0x204f   :  { %v7552_v44 = vpack.c.bf16 %v7551_v41, %v7551_v41 }
0x2051   :  { %8780 = vmatmul.mubr.msk.bf16.vlgmr.msra.gmra.mrb[204].mxu1 %vm7570_vm0, %v7552_v44 }
0x2124   :  { %v7608_v30 = vpop.f32.mrb[204].mxu1 }
0x2125   :  { %v7609_v56 = vadd.f32 %v7608_v30, %v7557_v8  ;;  %v8781_v10 = vpop.f32.mrb[205].mxu1 }
0x2126   :  { %v7611_v55 = vpop.f32.mrb[206].mxu1 }
0x2127   :  { %7615 = vst.msk [vmem:[%s11637_s8] sm:$0xff] %vm7614_vm1, %v7609_v56  ;;  %v8782_v7 = vpop.f32.mrb[207].mxu1 }
0x2128   :  { %7620 = vsyncpa [#allocation4], 1 }
0x2129   :  { %7621 = vsyncpa [#allocation6], 1 }

</bundles_post_ra>
